<compile_context>
chip_gen: v7x
topology: tpu7x:2x2x1
jax: 0.10.0
libtpu: 0.0.40
codegen_flags: <defaults>
</compile_context>

<pallas_src>
import functools

import numpy as np
import jax
import jax.numpy as jnp
from jax import lax
from jax.experimental import pallas as pl
from jax.experimental.pallas import tpu as pltpu


# --------------------------- per-generation sizing --------------------------------

def _device_vmem_bytes():
    try:
        return int(pltpu.get_tpu_info().vmem_capacity_bytes)
    except Exception:
        return 64 * 1024 * 1024          # conservative fallback (v7x-sized VMEM)


_VMEM_BYTES = _device_vmem_bytes()
if _VMEM_BYTES >= 128 * 1024 * 1024:     # v5e / v6e: 128 MiB VMEM per TensorCore
    _TB_CAP = 192                        # peak live ~40 MiB at tb=192
    _VMEM_LIMIT = 96 * 1024 * 1024
else:                                    # v7x: 64 MiB VMEM per TensorCore
    _TB_CAP = 96
    _VMEM_LIMIT = 48 * 1024 * 1024


def _supports_pipeline_mode():
    try:
        pl.BlockSpec((8, 128), lambda b: (0, 0), pipeline_mode=pl.Buffered(1))
        return True
    except Exception:
        return False


_HAS_PIPELINE_MODE = _supports_pipeline_mode()


def _const_spec(shape):
    """BlockSpec for a grid-invariant (weight/bias) operand; single-buffered if supported."""
    nd = len(shape)
    if _HAS_PIPELINE_MODE:
        return pl.BlockSpec(shape, lambda b: (0,) * nd, pipeline_mode=pl.Buffered(1))
    return pl.BlockSpec(shape, lambda b: (0,) * nd)


# ----------------------------- fused network kernel -------------------------------

def _net_kernel(xw_ref, w1_ref, b1_ref, w2_ref, b2_ref,
                wf1_ref, bf1_ref, wf2_ref, bf2_ref, out_ref, fc1_in_ref, *, tb):
    """Whole Net forward for a tile of `tb` images, entirely in VMEM.

    xw_ref    : (tb, 24, 140) bf16  input with the 5 conv1 KH taps folded into lanes
    w1_ref    : (140, 768)    bf16  conv1 banded matrix; out lanes = (even/odd ow, 32 cout)
    b1_ref    : (1, 768)      f32
    w2_ref    : (5, 384, 512) bf16  conv2 as 5 banded matrices; out lanes = (even/odd ow, 64 cout)
    b2_ref    : (1, 512)      f32
    wf1_ref   : (1024, 512)   bf16  fc1; input rows = (h, w, c) channels-last order
    bf1_ref   : (1, 512)      f32
    wf2_ref   : (512, 128)    bf16  fc2 padded from 10 -> 128 output lanes
    bf2_ref   : (1, 128)      f32
    out_ref   : (tb, 128)     f32   log-probs in lanes 0..9, padding elsewhere
    fc1_in_ref: (tb, 1024)    bf16  VMEM scratch: pooled rows scattered at lane offsets h*256
    """
    f32 = jnp.float32
    bf16 = jnp.bfloat16

    # ---- conv1 (5x5, 1->32) + ReLU: ONE K=140 matmul (KH folded into lanes by the wrapper,
    #      KW folded into the banded weight matrix at prepare_params time) ----------------
    x1 = xw_ref[...].reshape(tb * 24, 140)                        # bf16, rows = (n, oh)
    acc1 = jnp.dot(x1, w1_ref[...], preferred_element_type=f32)   # (tb*24, 768) f32
    a1 = jnp.maximum(acc1 + b1_ref[...], 0.0)

    # ---- max-pool 2x2 #1: lanes are [even ow | odd ow], rows are (n, oh) -----------------
    a1 = jnp.maximum(a1[:, :384], a1[:, 384:])                    # pool along W -> (tb*24, 384)
    a1 = a1.reshape(tb, 12, 2, 384)
    p1 = jnp.maximum(a1[:, :, 0, :], a1[:, :, 1, :])              # pool along H -> (tb, 12, 384)

    # ---- conv2 (5x5, 32->64) + ReLU: 5 banded matmuls, contraction over (ow, cin)=384;
    #      accumulator initialized by the first dot (no zeros round trip) ------------------
    acc2 = jnp.dot(p1[:, 0:8, :].reshape(tb * 8, 384).astype(bf16), w2_ref[0],
                   preferred_element_type=f32)
    for i in range(1, 5):
        xi = p1[:, i:i + 8, :].reshape(tb * 8, 384).astype(bf16)
        acc2 = acc2 + jnp.dot(xi, w2_ref[i], preferred_element_type=f32)
    h2 = jnp.maximum(acc2 + b2_ref[...], 0.0)                     # (tb*8, 512) f32

    # ---- max-pool 2x2 #2, scattering the 4 pooled rows to lane offsets h*256 of the fc1
    #      input scratch so fc1 becomes a single K=1024 matmul -----------------------------
    h2 = jnp.maximum(h2[:, :256], h2[:, 256:])                    # pool along W -> (tb*8, 256)
    h2 = h2.reshape(tb, 4, 2, 256)
    p2 = jnp.maximum(h2[:, :, 0, :], h2[:, :, 1, :])              # pool along H -> (tb, 4, 256)
    for h in range(4):
        fc1_in_ref[:, h * 256:(h + 1) * 256] = p2[:, h, :].astype(bf16)

    # ---- fc1 + ReLU (single K=1024 matmul) ------------------------------------------------
    z1 = jnp.dot(fc1_in_ref[...], wf1_ref[...], preferred_element_type=f32)
    z1 = jnp.maximum(z1 + bf1_ref[...], 0.0)                      # (tb, 512) f32

    # ---- fc2 (padded to 128 lanes) + log_softmax over the 10 real classes -----------------
    z2 = jnp.dot(z1.astype(bf16), wf2_ref[...], preferred_element_type=f32) + bf2_ref[...]
    lane = lax.broadcasted_iota(jnp.int32, (tb, 128), 1)
    z2 = jnp.where(lane < 10, z2, -1e30)                          # mask padded classes
    m = jnp.max(z2, axis=-1, keepdims=True)
    lse = jnp.log(jnp.sum(jnp.exp(z2 - m), axis=-1, keepdims=True))
    out_ref[...] = (z2 - m - lse).astype(out_ref.dtype)


# ----------------------------- pallas_call wrapper ---------------------------------

def _run_fused_net(prep, xw, tb):
    """xw: (Bp, 24, 140) bf16, Bp % tb == 0.  Returns (Bp, 128) f32 log-probs."""
    Bp = xw.shape[0]
    grid = (Bp // tb,)

    flops = 2 * Bp * (24 * 140 * 768 + 5 * 8 * 384 * 512 + 1024 * 512 + 512 * 128)
    weight_bytes = 2 * (140 * 768 + 5 * 384 * 512 + 1024 * 512 + 512 * 128) \
        + 4 * (768 + 512 + 512 + 128)
    cost = pl.CostEstimate(flops=flops, transcendentals=129 * Bp,
                           bytes_accessed=weight_bytes + 2 * Bp * 24 * 140 + 4 * Bp * 128)

    kern = functools.partial(_net_kernel, tb=tb)
    return pl.pallas_call(
        kern,
        out_shape=jax.ShapeDtypeStruct((Bp, 128), jnp.float32),
        grid_spec=pltpu.PrefetchScalarGridSpec(
            num_scalar_prefetch=0,
            grid=grid,
            in_specs=[
                pl.BlockSpec((tb, 24, 140), lambda b: (b, 0, 0)),  # input (batch tiled, dbl-buf)
                _const_spec((140, 768)),                           # conv1 banded, KH-folded
                _const_spec((1, 768)),
                _const_spec((5, 384, 512)),                        # conv2 banded
                _const_spec((1, 512)),
                _const_spec((1024, 512)),                          # fc1 (channels-last rows)
                _const_spec((1, 512)),
                _const_spec((512, 128)),                           # fc2 (lane-padded)
                _const_spec((1, 128)),
            ],
            out_specs=pl.BlockSpec((tb, 128), lambda b: (b, 0)),
            scratch_shapes=[pltpu.VMEM((tb, 1024), jnp.bfloat16)],
        ),
        compiler_params=pltpu.CompilerParams(
            dimension_semantics=("parallel",),    # batch tiles -> megacore / v7x 2 TCs
            vmem_limit_bytes=_VMEM_LIMIT,
        ),
        cost_estimate=cost,
    )(xw, prep["w1"], prep["b1"], prep["w2"], prep["b2"],
      prep["wf1"], prep["bf1"], prep["wf2"], prep["bf2"])


# ------------------------------ parameters -----------------------------------------

def init_params(key):
    """Parameters in PyTorch layouts of Net (conv: OIHW, linear: (out, in))."""
    ks = jax.random.split(key, 8)

    def nrm(k, shape, scale=0.05):
        return (scale * jax.random.normal(k, shape)).astype(jnp.float32)

    return {
        "conv1_w": nrm(ks[0], (32, 1, 5, 5)),
        "conv1_b": nrm(ks[1], (32,)),
        "conv2_w": nrm(ks[2], (64, 32, 5, 5)),
        "conv2_b": nrm(ks[3], (64,)),
        "fc1_w": nrm(ks[4], (512, 4 * 4 * 64)),
        "fc1_b": nrm(ks[5], (512,)),
        "fc2_w": nrm(ks[6], (10, 512)),
        "fc2_b": nrm(ks[7], (10,)),
    }


def prepare_params(params):
    """One-time repack of PyTorch-layout weights into the kernel's banded / channels-last,
    pre-transposed, lane-padded, bf16 layouts (done at init, never per forward call)."""
    # conv1 banded + KH-folded: W1[kh*28 + w, s*384 + owp*32 + co] = w1[co, kh, w - ow],
    # with ow = 2*owp + s (even output columns first, then odd -> pool1 is a lane-half max).
    w1 = np.asarray(params["conv1_w"], np.float32).reshape(32, 5, 5)      # [co, kh, kw]
    b1 = np.asarray(params["conv1_b"], np.float32)
    W1 = np.zeros((5, 28, 2 * 12 * 32), np.float32)
    for i in range(5):
        for s in range(2):
            for owp in range(12):
                ow = 2 * owp + s
                col = s * 384 + owp * 32
                for j in range(5):
                    W1[i, ow + j, col:col + 32] = w1[:, i, j]
    W1 = W1.reshape(5 * 28, 768)
    b1g = np.tile(b1, 24)[None, :]                                         # (1, 768)

    # conv2 banded: W2[i, owp*32 + ci, s*256 + ow2p*64 + co] = w2[co, ci, i, owp - ow2]
    w2 = np.asarray(params["conv2_w"], np.float32)                         # [co, ci, kh, kw]
    b2 = np.asarray(params["conv2_b"], np.float32)
    W2 = np.zeros((5, 12 * 32, 2 * 4 * 64), np.float32)
    for i in range(5):
        for s in range(2):
            for ow2p in range(4):
                ow2 = 2 * ow2p + s
                col = s * 256 + ow2p * 64
                for j in range(5):
                    owp = ow2 + j
                    W2[i, owp * 32:owp * 32 + 32, col:col + 64] = w2[:, :, i, j].T
    b2g = np.tile(b2, 8)[None, :]                                          # (1, 512)

    # fc1: permute input features (C,H,W) -> (H,W,C), transpose to (K=1024, N=512).
    wf1 = np.asarray(params["fc1_w"], np.float32).reshape(512, 64, 4, 4)   # [out, c, h, w]
    wf1 = wf1.transpose(2, 3, 1, 0).reshape(4 * 4 * 64, 512)               # row = h*256 + w*64 + c
    bf1 = np.asarray(params["fc1_b"], np.float32)[None, :]                 # (1, 512)

    # fc2: transpose to (K, N), pad N from 10 -> 128 lanes (padding masked in-kernel).
    wf2 = np.zeros((512, 128), np.float32)
    wf2[:, :10] = np.asarray(params["fc2_w"], np.float32).T
    bf2 = np.zeros((1, 128), np.float32)
    bf2[0, :10] = np.asarray(params["fc2_b"], np.float32)

    return {
        "w1": jnp.asarray(W1, dtype=jnp.bfloat16), "b1": jnp.asarray(b1g),
        "w2": jnp.asarray(W2, dtype=jnp.bfloat16), "b2": jnp.asarray(b2g),
        "wf1": jnp.asarray(wf1, dtype=jnp.bfloat16), "bf1": jnp.asarray(bf1),
        "wf2": jnp.asarray(wf2, dtype=jnp.bfloat16), "bf2": jnp.asarray(bf2),
    }


# ------------------------------ forward pass ----------------------------------------

@jax.jit
def net_forward(prep, x):
    """x: (B, 1, 28, 28) float32 NCHW (PyTorch convention) -> (B, 10) log-probs."""
    B = x.shape[0]
    if B <= 8:
        tb = B                                       # single tiny tile
    else:
        # Largest tile that fits the generation's VMEM budget, multiple of 8, and
        # always >= 2 grid steps so v7x's two TensorCores both get work.
        nsteps = max(2, -(-B // _TB_CAP))
        tb = min(_TB_CAP, ((-(-B // nsteps) + 7) // 8) * 8)
    Bp = -(-B // tb) * tb

    x3 = x.reshape(B, 28, 28)                        # Cin == 1
    if Bp != B:
        x3 = jnp.pad(x3, ((0, Bp - B), (0, 0), (0, 0)))
    # Fold the 5 conv1 KH taps into lanes (K=140) once, outside the kernel (layout plumbing
    # on a tiny input), and cast matmul operands to bf16; f32 accumulation happens in-kernel.
    xw = jnp.concatenate([x3[:, i:i + 24, :] for i in range(5)], axis=-1)  # (Bp, 24, 140)
    xw = xw.astype(jnp.bfloat16)

    out = _run_fused_net(prep, xw, tb)               # (Bp, 128)
    return out[:B, :10]


def reference_forward(params, x):
    """Pure-JAX/XLA reference identical to the PyTorch Net.forward (validation only)."""
    dn = ("NCHW", "OIHW", "NCHW")
    y = lax.conv_general_dilated(x, params["conv1_w"], (1, 1), "VALID", dimension_numbers=dn)
    y = jax.nn.relu(y + params["conv1_b"][None, :, None, None])
    y = lax.reduce_window(y, -jnp.inf, lax.max, (1, 1, 2, 2), (1, 1, 2, 2), "VALID")
    y = lax.conv_general_dilated(y, params["conv2_w"], (1, 1), "VALID", dimension_numbers=dn)
    y = jax.nn.relu(y + params["conv2_b"][None, :, None, None])
    y = lax.reduce_window(y, -jnp.inf, lax.max, (1, 1, 2, 2), (1, 1, 2, 2), "VALID")
    y = y.reshape(y.shape[0], -1)                               # PyTorch (C, H, W) flatten
    y = jax.nn.relu(y @ params["fc1_w"].T + params["fc1_b"])
    y = y @ params["fc2_w"].T + params["fc2_b"]
    return jax.nn.log_softmax(y, axis=-1)


if __name__ == "__main__":
    key = jax.random.PRNGKey(0)
    k_params, k_x = jax.random.split(key)
    params = init_params(k_params)
    prep = prepare_params(params)

    batch = 2
    x = jax.random.normal(k_x, (batch, 1, 28, 28), dtype=jnp.float32)

    out = jax.block_until_ready(net_forward(prep, x))

    assert out.shape == (batch, 10), out.shape
    assert out.dtype == jnp.float32
    assert bool(jnp.all(jnp.isfinite(out)))
    # rows of log_softmax must exponentiate-sum to 1
    assert bool(jnp.all(jnp.abs(jnp.sum(jnp.exp(out), axis=1) - 1.0) < 1e-4))
    # match the pure-XLA reference of the PyTorch forward (bf16 matmuls, f32 accumulation)
    ref = jax.block_until_ready(reference_forward(params, x))
    assert bool(jnp.max(jnp.abs(out - ref)) < 5e-2), float(jnp.max(jnp.abs(out - ref)))

    print("KERNEL_OK")
</pallas_src>

<mosaic_0001>
module attributes {stable_mosaic.version = 11 : i64} {
  func.func @_net_kernel(%arg0: i32, %arg1: memref<2x24x140xbf16, #tpu.memory_space<vmem>>, %arg2: memref<140x768xbf16, #tpu.memory_space<vmem>>, %arg3: memref<1x768xf32, #tpu.memory_space<vmem>>, %arg4: memref<5x384x512xbf16, #tpu.memory_space<vmem>>, %arg5: memref<1x512xf32, #tpu.memory_space<vmem>>, %arg6: memref<1024x512xbf16, #tpu.memory_space<vmem>>, %arg7: memref<1x512xf32, #tpu.memory_space<vmem>>, %arg8: memref<512x128xbf16, #tpu.memory_space<vmem>>, %arg9: memref<1x128xf32, #tpu.memory_space<vmem>>, %arg10: memref<2x128xf32, #tpu.memory_space<vmem>>, %arg11: memref<2x1024xbf16, #tpu.memory_space<vmem>>) attributes {dimension_semantics = [#tpu.dimension_semantics<parallel>], iteration_bounds = array<i64: 1>, scalar_prefetch = 0 : i64, scratch_operands = 1 : i64, tpu.core_type = #tpu.core_type<tc>, window_params = [{transform_indices = @transform_0, window_bounds = array<i64: 2, 24, 140>}, {pipeline_mode = #tpu.pipeline_mode<synchronous>, transform_indices = @transform_1, window_bounds = array<i64: 140, 768>}, {pipeline_mode = #tpu.pipeline_mode<synchronous>, transform_indices = @transform_2, window_bounds = array<i64: 1, 768>}, {pipeline_mode = #tpu.pipeline_mode<synchronous>, transform_indices = @transform_3, window_bounds = array<i64: 5, 384, 512>}, {pipeline_mode = #tpu.pipeline_mode<synchronous>, transform_indices = @transform_4, window_bounds = array<i64: 1, 512>}, {pipeline_mode = #tpu.pipeline_mode<synchronous>, transform_indices = @transform_5, window_bounds = array<i64: 1024, 512>}, {pipeline_mode = #tpu.pipeline_mode<synchronous>, transform_indices = @transform_6, window_bounds = array<i64: 1, 512>}, {pipeline_mode = #tpu.pipeline_mode<synchronous>, transform_indices = @transform_7, window_bounds = array<i64: 512, 128>}, {pipeline_mode = #tpu.pipeline_mode<synchronous>, transform_indices = @transform_8, window_bounds = array<i64: 1, 128>}, {transform_indices = @transform_9, window_bounds = array<i64: 2, 128>}]} {
    %c0 = arith.constant 0 : index
    %c0_0 = arith.constant 0 : index
    %c0_1 = arith.constant 0 : index
    %0 = vector.load %arg1[%c0, %c0_0, %c0_1] : memref<2x24x140xbf16, #tpu.memory_space<vmem>>, vector<2x24x140xbf16>
    %1 = vector.shape_cast %0 : vector<2x24x140xbf16> to vector<48x140xbf16>
    %c0_2 = arith.constant 0 : index
    %c0_3 = arith.constant 0 : index
    %2 = vector.load %arg2[%c0_2, %c0_3] : memref<140x768xbf16, #tpu.memory_space<vmem>>, vector<140x768xbf16>
    %cst = arith.constant dense<0.000000e+00> : vector<48x768xf32>
    %3 = tpu.matmul %1, %2, %cst {dimension_numbers = #tpu.dot_dimension_numbers<[1], [0], [0], [1], [0, 0, 1, 1], [], []>} : vector<48x140xbf16>, vector<140x768xbf16>, vector<48x768xf32> -> vector<48x768xf32>
    %c0_4 = arith.constant 0 : index
    %c0_5 = arith.constant 0 : index
    %4 = vector.load %arg3[%c0_4, %c0_5] : memref<1x768xf32, #tpu.memory_space<vmem>>, vector<1x768xf32>
    %5 = vector.broadcast %4 : vector<1x768xf32> to vector<48x768xf32>
    %6 = arith.addf %3, %5 : vector<48x768xf32>
    %cst_6 = arith.constant 0.000000e+00 : f32
    %7 = vector.broadcast %cst_6 : f32 to vector<48x768xf32>
    %8 = arith.maximumf %6, %7 : vector<48x768xf32>
    %9 = vector.extract_strided_slice %8 {offsets = [0, 0], sizes = [48, 384], strides = [1, 1]} : vector<48x768xf32> to vector<48x384xf32>
    %10 = vector.extract_strided_slice %8 {offsets = [0, 384], sizes = [48, 384], strides = [1, 1]} : vector<48x768xf32> to vector<48x384xf32>
    %11 = arith.maximumf %9, %10 : vector<48x384xf32>
    %12 = vector.shape_cast %11 : vector<48x384xf32> to vector<2x12x2x384xf32>
    %13 = vector.extract_strided_slice %12 {offsets = [0, 0, 0, 0], sizes = [2, 12, 1, 384], strides = [1, 1, 1, 1]} : vector<2x12x2x384xf32> to vector<2x12x1x384xf32>
    %14 = vector.shape_cast %13 : vector<2x12x1x384xf32> to vector<2x12x384xf32>
    %15 = vector.extract_strided_slice %12 {offsets = [0, 0, 1, 0], sizes = [2, 12, 1, 384], strides = [1, 1, 1, 1]} : vector<2x12x2x384xf32> to vector<2x12x1x384xf32>
    %16 = vector.shape_cast %15 : vector<2x12x1x384xf32> to vector<2x12x384xf32>
    %17 = arith.maximumf %14, %16 : vector<2x12x384xf32>
    %18 = vector.extract_strided_slice %17 {offsets = [0, 0, 0], sizes = [2, 8, 384], strides = [1, 1, 1]} : vector<2x12x384xf32> to vector<2x8x384xf32>
    %19 = vector.shape_cast %18 : vector<2x8x384xf32> to vector<16x384xf32>
    %20 = arith.truncf %19 : vector<16x384xf32> to vector<16x384xbf16>
    %c0_7 = arith.constant 0 : index
    %c0_8 = arith.constant 0 : index
    %c0_9 = arith.constant 0 : index
    %21 = vector.load %arg4[%c0_7, %c0_8, %c0_9] : memref<5x384x512xbf16, #tpu.memory_space<vmem>>, vector<1x384x512xbf16>
    %22 = vector.shape_cast %21 : vector<1x384x512xbf16> to vector<384x512xbf16>
    %cst_10 = arith.constant dense<0.000000e+00> : vector<16x512xf32>
    %23 = tpu.matmul %20, %22, %cst_10 {dimension_numbers = #tpu.dot_dimension_numbers<[1], [0], [0], [1], [0, 0, 1, 1], [], []>} : vector<16x384xbf16>, vector<384x512xbf16>, vector<16x512xf32> -> vector<16x512xf32>
    %24 = vector.extract_strided_slice %17 {offsets = [0, 1, 0], sizes = [2, 8, 384], strides = [1, 1, 1]} : vector<2x12x384xf32> to vector<2x8x384xf32>
    %25 = vector.shape_cast %24 : vector<2x8x384xf32> to vector<16x384xf32>
    %26 = arith.truncf %25 : vector<16x384xf32> to vector<16x384xbf16>
    %c1 = arith.constant 1 : index
    %c0_11 = arith.constant 0 : index
    %c0_12 = arith.constant 0 : index
    %27 = vector.load %arg4[%c1, %c0_11, %c0_12] : memref<5x384x512xbf16, #tpu.memory_space<vmem>>, vector<1x384x512xbf16>
    %28 = vector.shape_cast %27 : vector<1x384x512xbf16> to vector<384x512xbf16>
    %cst_13 = arith.constant dense<0.000000e+00> : vector<16x512xf32>
    %29 = tpu.matmul %26, %28, %cst_13 {dimension_numbers = #tpu.dot_dimension_numbers<[1], [0], [0], [1], [0, 0, 1, 1], [], []>} : vector<16x384xbf16>, vector<384x512xbf16>, vector<16x512xf32> -> vector<16x512xf32>
    %30 = arith.addf %23, %29 : vector<16x512xf32>
    %31 = vector.extract_strided_slice %17 {offsets = [0, 2, 0], sizes = [2, 8, 384], strides = [1, 1, 1]} : vector<2x12x384xf32> to vector<2x8x384xf32>
    %32 = vector.shape_cast %31 : vector<2x8x384xf32> to vector<16x384xf32>
    %33 = arith.truncf %32 : vector<16x384xf32> to vector<16x384xbf16>
    %c2 = arith.constant 2 : index
    %c0_14 = arith.constant 0 : index
    %c0_15 = arith.constant 0 : index
    %34 = vector.load %arg4[%c2, %c0_14, %c0_15] : memref<5x384x512xbf16, #tpu.memory_space<vmem>>, vector<1x384x512xbf16>
    %35 = vector.shape_cast %34 : vector<1x384x512xbf16> to vector<384x512xbf16>
    %cst_16 = arith.constant dense<0.000000e+00> : vector<16x512xf32>
    %36 = tpu.matmul %33, %35, %cst_16 {dimension_numbers = #tpu.dot_dimension_numbers<[1], [0], [0], [1], [0, 0, 1, 1], [], []>} : vector<16x384xbf16>, vector<384x512xbf16>, vector<16x512xf32> -> vector<16x512xf32>
    %37 = arith.addf %30, %36 : vector<16x512xf32>
    %38 = vector.extract_strided_slice %17 {offsets = [0, 3, 0], sizes = [2, 8, 384], strides = [1, 1, 1]} : vector<2x12x384xf32> to vector<2x8x384xf32>
    %39 = vector.shape_cast %38 : vector<2x8x384xf32> to vector<16x384xf32>
    %40 = arith.truncf %39 : vector<16x384xf32> to vector<16x384xbf16>
    %c3 = arith.constant 3 : index
    %c0_17 = arith.constant 0 : index
    %c0_18 = arith.constant 0 : index
    %41 = vector.load %arg4[%c3, %c0_17, %c0_18] : memref<5x384x512xbf16, #tpu.memory_space<vmem>>, vector<1x384x512xbf16>
    %42 = vector.shape_cast %41 : vector<1x384x512xbf16> to vector<384x512xbf16>
    %cst_19 = arith.constant dense<0.000000e+00> : vector<16x512xf32>
    %43 = tpu.matmul %40, %42, %cst_19 {dimension_numbers = #tpu.dot_dimension_numbers<[1], [0], [0], [1], [0, 0, 1, 1], [], []>} : vector<16x384xbf16>, vector<384x512xbf16>, vector<16x512xf32> -> vector<16x512xf32>
    %44 = arith.addf %37, %43 : vector<16x512xf32>
    %45 = vector.extract_strided_slice %17 {offsets = [0, 4, 0], sizes = [2, 8, 384], strides = [1, 1, 1]} : vector<2x12x384xf32> to vector<2x8x384xf32>
    %46 = vector.shape_cast %45 : vector<2x8x384xf32> to vector<16x384xf32>
    %47 = arith.truncf %46 : vector<16x384xf32> to vector<16x384xbf16>
    %c4 = arith.constant 4 : index
    %c0_20 = arith.constant 0 : index
    %c0_21 = arith.constant 0 : index
    %48 = vector.load %arg4[%c4, %c0_20, %c0_21] : memref<5x384x512xbf16, #tpu.memory_space<vmem>>, vector<1x384x512xbf16>
    %49 = vector.shape_cast %48 : vector<1x384x512xbf16> to vector<384x512xbf16>
    %cst_22 = arith.constant dense<0.000000e+00> : vector<16x512xf32>
    %50 = tpu.matmul %47, %49, %cst_22 {dimension_numbers = #tpu.dot_dimension_numbers<[1], [0], [0], [1], [0, 0, 1, 1], [], []>} : vector<16x384xbf16>, vector<384x512xbf16>, vector<16x512xf32> -> vector<16x512xf32>
    %51 = arith.addf %44, %50 : vector<16x512xf32>
    %c0_23 = arith.constant 0 : index
    %c0_24 = arith.constant 0 : index
    %52 = vector.load %arg5[%c0_23, %c0_24] : memref<1x512xf32, #tpu.memory_space<vmem>>, vector<1x512xf32>
    %53 = vector.broadcast %52 : vector<1x512xf32> to vector<16x512xf32>
    %54 = arith.addf %51, %53 : vector<16x512xf32>
    %cst_25 = arith.constant 0.000000e+00 : f32
    %55 = vector.broadcast %cst_25 : f32 to vector<16x512xf32>
    %56 = arith.maximumf %54, %55 : vector<16x512xf32>
    %57 = vector.extract_strided_slice %56 {offsets = [0, 0], sizes = [16, 256], strides = [1, 1]} : vector<16x512xf32> to vector<16x256xf32>
    %58 = vector.extract_strided_slice %56 {offsets = [0, 256], sizes = [16, 256], strides = [1, 1]} : vector<16x512xf32> to vector<16x256xf32>
    %59 = arith.maximumf %57, %58 : vector<16x256xf32>
    %60 = vector.shape_cast %59 : vector<16x256xf32> to vector<2x4x2x256xf32>
    %61 = vector.extract_strided_slice %60 {offsets = [0, 0, 0, 0], sizes = [2, 4, 1, 256], strides = [1, 1, 1, 1]} : vector<2x4x2x256xf32> to vector<2x4x1x256xf32>
    %62 = vector.shape_cast %61 : vector<2x4x1x256xf32> to vector<2x4x256xf32>
    %63 = vector.extract_strided_slice %60 {offsets = [0, 0, 1, 0], sizes = [2, 4, 1, 256], strides = [1, 1, 1, 1]} : vector<2x4x2x256xf32> to vector<2x4x1x256xf32>
    %64 = vector.shape_cast %63 : vector<2x4x1x256xf32> to vector<2x4x256xf32>
    %65 = arith.maximumf %62, %64 : vector<2x4x256xf32>
    %66 = vector.extract_strided_slice %65 {offsets = [0, 0, 0], sizes = [2, 1, 256], strides = [1, 1, 1]} : vector<2x4x256xf32> to vector<2x1x256xf32>
    %67 = vector.shape_cast %66 : vector<2x1x256xf32> to vector<2x256xf32>
    %68 = arith.truncf %67 : vector<2x256xf32> to vector<2x256xbf16>
    %c0_26 = arith.constant 0 : index
    %c0_27 = arith.constant 0 : index
    %69 = vector.load %arg11[%c0_26, %c0_27] : memref<2x1024xbf16, #tpu.memory_space<vmem>>, vector<2x256xbf16>
    tpu.vector_store %arg11[%c0_26, %c0_27], %68 {strides = array<i32>} : memref<2x1024xbf16, #tpu.memory_space<vmem>>, vector<2x256xbf16>,
    %70 = vector.extract_strided_slice %65 {offsets = [0, 1, 0], sizes = [2, 1, 256], strides = [1, 1, 1]} : vector<2x4x256xf32> to vector<2x1x256xf32>
    %71 = vector.shape_cast %70 : vector<2x1x256xf32> to vector<2x256xf32>
    %72 = arith.truncf %71 : vector<2x256xf32> to vector<2x256xbf16>
    %c0_28 = arith.constant 0 : index
    %c256 = arith.constant 256 : index
    %73 = vector.load %arg11[%c0_28, %c256] : memref<2x1024xbf16, #tpu.memory_space<vmem>>, vector<2x256xbf16>
    tpu.vector_store %arg11[%c0_28, %c256], %72 {strides = array<i32>} : memref<2x1024xbf16, #tpu.memory_space<vmem>>, vector<2x256xbf16>,
    %74 = vector.extract_strided_slice %65 {offsets = [0, 2, 0], sizes = [2, 1, 256], strides = [1, 1, 1]} : vector<2x4x256xf32> to vector<2x1x256xf32>
    %75 = vector.shape_cast %74 : vector<2x1x256xf32> to vector<2x256xf32>
    %76 = arith.truncf %75 : vector<2x256xf32> to vector<2x256xbf16>
    %c0_29 = arith.constant 0 : index
    %c512 = arith.constant 512 : index
    %77 = vector.load %arg11[%c0_29, %c512] : memref<2x1024xbf16, #tpu.memory_space<vmem>>, vector<2x256xbf16>
    tpu.vector_store %arg11[%c0_29, %c512], %76 {strides = array<i32>} : memref<2x1024xbf16, #tpu.memory_space<vmem>>, vector<2x256xbf16>,
    %78 = vector.extract_strided_slice %65 {offsets = [0, 3, 0], sizes = [2, 1, 256], strides = [1, 1, 1]} : vector<2x4x256xf32> to vector<2x1x256xf32>
    %79 = vector.shape_cast %78 : vector<2x1x256xf32> to vector<2x256xf32>
    %80 = arith.truncf %79 : vector<2x256xf32> to vector<2x256xbf16>
    %c0_30 = arith.constant 0 : index
    %c768 = arith.constant 768 : index
    %81 = vector.load %arg11[%c0_30, %c768] : memref<2x1024xbf16, #tpu.memory_space<vmem>>, vector<2x256xbf16>
    tpu.vector_store %arg11[%c0_30, %c768], %80 {strides = array<i32>} : memref<2x1024xbf16, #tpu.memory_space<vmem>>, vector<2x256xbf16>,
    %c0_31 = arith.constant 0 : index
    %c0_32 = arith.constant 0 : index
    %82 = vector.load %arg11[%c0_31, %c0_32] : memref<2x1024xbf16, #tpu.memory_space<vmem>>, vector<2x1024xbf16>
    %c0_33 = arith.constant 0 : index
    %c0_34 = arith.constant 0 : index
    %83 = vector.load %arg6[%c0_33, %c0_34] : memref<1024x512xbf16, #tpu.memory_space<vmem>>, vector<1024x512xbf16>
    %cst_35 = arith.constant dense<0.000000e+00> : vector<2x512xf32>
    %84 = tpu.matmul %82, %83, %cst_35 {dimension_numbers = #tpu.dot_dimension_numbers<[1], [0], [0], [1], [0, 0, 1, 1], [], []>} : vector<2x1024xbf16>, vector<1024x512xbf16>, vector<2x512xf32> -> vector<2x512xf32>
    %c0_36 = arith.constant 0 : index
    %c0_37 = arith.constant 0 : index
    %85 = vector.load %arg7[%c0_36, %c0_37] : memref<1x512xf32, #tpu.memory_space<vmem>>, vector<1x512xf32>
    %86 = vector.broadcast %85 : vector<1x512xf32> to vector<2x512xf32>
    %87 = arith.addf %84, %86 : vector<2x512xf32>
    %cst_38 = arith.constant 0.000000e+00 : f32
    %88 = vector.broadcast %cst_38 : f32 to vector<2x512xf32>
    %89 = arith.maximumf %87, %88 : vector<2x512xf32>
    %90 = arith.truncf %89 : vector<2x512xf32> to vector<2x512xbf16>
    %c0_39 = arith.constant 0 : index
    %c0_40 = arith.constant 0 : index
    %91 = vector.load %arg8[%c0_39, %c0_40] : memref<512x128xbf16, #tpu.memory_space<vmem>>, vector<512x128xbf16>
    %cst_41 = arith.constant dense<0.000000e+00> : vector<2x128xf32>
    %92 = tpu.matmul %90, %91, %cst_41 {dimension_numbers = #tpu.dot_dimension_numbers<[1], [0], [0], [1], [0, 0, 1, 1], [], []>} : vector<2x512xbf16>, vector<512x128xbf16>, vector<2x128xf32> -> vector<2x128xf32>
    %c0_42 = arith.constant 0 : index
    %c0_43 = arith.constant 0 : index
    %93 = vector.load %arg9[%c0_42, %c0_43] : memref<1x128xf32, #tpu.memory_space<vmem>>, vector<1x128xf32>
    %94 = vector.broadcast %93 : vector<1x128xf32> to vector<2x128xf32>
    %95 = arith.addf %92, %94 : vector<2x128xf32>
    %96 = tpu.iota {dimensions = array<i32: 1>} : vector<2x128xi32>
    %c10_i32 = arith.constant 10 : i32
    %97 = vector.broadcast %c10_i32 : i32 to vector<2x128xi32>
    %98 = arith.cmpi slt, %96, %97 : vector<2x128xi32>
    %cst_44 = arith.constant -1.000000e+30 : f32
    %99 = vector.broadcast %cst_44 : f32 to vector<2x128xf32>
    %100 = arith.select %98, %95, %99 : vector<2x128xi1>, vector<2x128xf32>
    %cst_45 = arith.constant dense<0xFF800000> : vector<2xf32>
    %101 = vector.multi_reduction <maximumf>, %100, %cst_45 [1] : vector<2x128xf32> to vector<2xf32>
    %102 = vector.shape_cast %101 : vector<2xf32> to vector<2x1xf32>
    %103 = vector.broadcast %102 : vector<2x1xf32> to vector<2x128xf32>
    %104 = arith.subf %100, %103 : vector<2x128xf32>
    %105 = math.exp %104 : vector<2x128xf32>
    %cst_46 = arith.constant dense<0.000000e+00> : vector<2xf32>
    %106 = vector.multi_reduction <add>, %105, %cst_46 [1] : vector<2x128xf32> to vector<2xf32>
    %107 = vector.shape_cast %106 : vector<2xf32> to vector<2x1xf32>
    %108 = math.log %107 : vector<2x1xf32>
    %109 = vector.broadcast %102 : vector<2x1xf32> to vector<2x128xf32>
    %110 = arith.subf %100, %109 : vector<2x128xf32>
    %111 = vector.broadcast %108 : vector<2x1xf32> to vector<2x128xf32>
    %112 = arith.subf %110, %111 : vector<2x128xf32>
    %c0_47 = arith.constant 0 : index
    %c0_48 = arith.constant 0 : index
    %113 = vector.load %arg10[%c0_47, %c0_48] : memref<2x128xf32, #tpu.memory_space<vmem>>, vector<2x128xf32>
    tpu.vector_store %arg10[%c0_47, %c0_48], %112 {strides = array<i32>} : memref<2x128xf32, #tpu.memory_space<vmem>>, vector<2x128xf32>,
    return
  }
  func.func @transform_0(%arg0: i32) -> (i32, i32, i32) {
    %c0_i32 = arith.constant 0 : i32
    %c0_i32_0 = arith.constant 0 : i32
    %c0_i32_1 = arith.constant 0 : i32
    return %arg0, %c0_i32, %c0_i32_0 : i32, i32, i32
  }
  func.func @transform_1(%arg0: i32) -> (i32, i32) {
    %c0_i32 = arith.constant 0 : i32
    %c0_i32_0 = arith.constant 0 : i32
    %c0_i32_1 = arith.constant 0 : i32
    return %c0_i32, %c0_i32_0 : i32, i32
  }
  func.func @transform_2(%arg0: i32) -> (i32, i32) {
    %c0_i32 = arith.constant 0 : i32
    %c0_i32_0 = arith.constant 0 : i32
    %c0_i32_1 = arith.constant 0 : i32
    return %c0_i32, %c0_i32_0 : i32, i32
  }
  func.func @transform_3(%arg0: i32) -> (i32, i32, i32) {
    %c0_i32 = arith.constant 0 : i32
    %c0_i32_0 = arith.constant 0 : i32
    %c0_i32_1 = arith.constant 0 : i32
    %c0_i32_2 = arith.constant 0 : i32
    return %c0_i32, %c0_i32_0, %c0_i32_1 : i32, i32, i32
  }
  func.func @transform_4(%arg0: i32) -> (i32, i32) {
    %c0_i32 = arith.constant 0 : i32
    %c0_i32_0 = arith.constant 0 : i32
    %c0_i32_1 = arith.constant 0 : i32
    return %c0_i32, %c0_i32_0 : i32, i32
  }
  func.func @transform_5(%arg0: i32) -> (i32, i32) {
    %c0_i32 = arith.constant 0 : i32
    %c0_i32_0 = arith.constant 0 : i32
    %c0_i32_1 = arith.constant 0 : i32
    return %c0_i32, %c0_i32_0 : i32, i32
  }
  func.func @transform_6(%arg0: i32) -> (i32, i32) {
    %c0_i32 = arith.constant 0 : i32
    %c0_i32_0 = arith.constant 0 : i32
    %c0_i32_1 = arith.constant 0 : i32
    return %c0_i32, %c0_i32_0 : i32, i32
  }
  func.func @transform_7(%arg0: i32) -> (i32, i32) {
    %c0_i32 = arith.constant 0 : i32
    %c0_i32_0 = arith.constant 0 : i32
    %c0_i32_1 = arith.constant 0 : i32
    return %c0_i32, %c0_i32_0 : i32, i32
  }
  func.func @transform_8(%arg0: i32) -> (i32, i32) {
    %c0_i32 = arith.constant 0 : i32
    %c0_i32_0 = arith.constant 0 : i32
    %c0_i32_1 = arith.constant 0 : i32
    return %c0_i32, %c0_i32_0 : i32, i32
  }
  func.func @transform_9(%arg0: i32) -> (i32, i32) {
    %c0_i32 = arith.constant 0 : i32
    %c0_i32_0 = arith.constant 0 : i32
    return %arg0, %c0_i32 : i32, i32
  }
}

</mosaic_0001>

<bundles_post_ra>
// kernel: net_forward.1
= control target key start
LH: loop header
LB: loop body
LE: loop exit
PB: predicated region body
PF: predicated region fallthrough
CT: control target
= control target key end

     0   :  { %14 = vsyncpa [#allocation4], 0  ;;  %s12773_s0 = inlined_call_operand.vmem [shape: bf16[2,24,140], index: 0, kind: input, shape index: {}]   ;;  %s12774_s1 = inlined_call_operand.hbm [shape: bf16[140,768], index: 1, kind: input, shape index: {}]   ;;  %s12775_s2 = inlined_call_operand.hbm [shape: f32[1,768], index: 2, kind: input, shape index: {}]   ;;  %s12776_s3 = inlined_call_operand.hbm [shape: bf16[5,384,512], index: 3, kind: input, shape index: {}]   ;;  %s12777_s4 = inlined_call_operand.hbm [shape: f32[1,512], index: 4, kind: input, shape index: {}]   ;;  %s12778_s5 = inlined_call_operand.hbm [shape: bf16[1024,512], index: 5, kind: input, shape index: {}]   ;;  %s12779_s6 = inlined_call_operand.hbm [shape: f32[1,512], index: 6, kind: input, shape index: {}]   ;;  %s12780_s7 = inlined_call_operand.hbm [shape: bf16[512,128], index: 7, kind: input, shape index: {}]   ;;  %s12781_s8 = inlined_call_operand.hbm [shape: f32[1,128], index: 8, kind: input, shape index: {}]   ;;  %s12782_s9 = inlined_call_operand.hbm [shape: f32[2,128], index: 9, kind: output, shape index: {}]  }
   0x1   :  { %15 = vsyncpa [#allocation7], 0 }
   0x2   :  { %16 = vsyncpa [#allocation10], 0 }
   0x3   :  { %17 = vsyncpa [#allocation13], 0 }
   0x4   :  { %18 = vsyncpa [#allocation16], 0 }
   0x5   :  { %19 = vsyncpa [#allocation5], 0  ;;  %s11359_s30 = smov [#allocation6]   ;;  %s11360_s11 = smov [#allocation9]  }
   0x6   :  { %s40_s10 = sshll.u32 %s11359_s30, 4  ;;  %s62_s12 = sshll.u32 %s11360_s11, 4  ;;  %s41_s10 = int_to_ptr.vmem [resolvable:$true] %s40_s10  ;;  %s63_s12 = int_to_ptr.vmem [resolvable:$true] %s62_s12 }
   0x7   :  { %s11149_s15 = scalar_lea.hbm %s12775_s2, 96 }
   0x8   :  { %p11150_p0 = scmp.ne.s32.totalorder %s12775_s2, %s11149_s15  ;;  %p11153_p1 = scmp.lt.u32.totalorder %s11149_s15, %s12775_s2 }
   0xa   :  { %p11155_p2 = pnand %p11153_p1, %p11150_p0 }
   0xc   :  { %11158 = shalt.err (!%p11155_p2)
}
   0xd   :  { %s11159_s20 = scalar_lea.vmem %s41_s10, 96  ;;  %p11164_p4 = scmp.lt.s32.totalorder %s41_s10, %s41_s10 }
   0xe   :  { %p11160_p3 = scmp.ne.s32.totalorder %s41_s10, %s11159_s20  ;;  %p11165_p5 = scmp.lt.s32.totalorder %s11159_s20, %s11159_s20 }
  0x10   :  { %p11166_p6 = por %p11165_p5, %p11164_p4 }
  0x12   :  { %p11167_p7 = pnand %p11166_p6, %p11160_p3 }
  0x14   :  { %11170 = shalt.err (!%p11167_p7)
}
  0x15   :  { %43 = dma.hbm_to_vmem [thread:$0]  %s12775_s2, 96, %s41_s10, [#allocation7]  }
  0x16   :  { %s11171_s25 = scalar_lea.hbm %s12777_s4, 64 }
  0x17   :  { %p11172_p8 = scmp.ne.s32.totalorder %s12777_s4, %s11171_s25  ;;  %p11175_p9 = scmp.lt.u32.totalorder %s11171_s25, %s12777_s4 }
  0x19   :  { %p11177_p10 = pnand %p11175_p9, %p11172_p8 }
  0x1b   :  { %11180 = shalt.err (!%p11177_p10)
}
  0x1c   :  { %s11181_s30 = scalar_lea.vmem %s63_s12, 64  ;;  %p11186_p12 = scmp.lt.s32.totalorder %s63_s12, %s63_s12 }
  0x1d   :  { %p11182_p11 = scmp.ne.s32.totalorder %s63_s12, %s11181_s30  ;;  %p11187_p13 = scmp.lt.s32.totalorder %s11181_s30, %s11181_s30 }
  0x1f   :  { %p11188_p0 = por %p11187_p13, %p11186_p12 }
  0x21   :  { %p11189_p1 = pnand %p11188_p0, %p11182_p11 }
  0x23   :  { %11192 = shalt.err (!%p11189_p1)
}
  0x24   :  { %65 = dma.hbm_to_vmem [thread:$0]  %s12777_s4, 64, %s63_s12, [#allocation10]  }
  0x25   :  { %s11361_s11 = smov [#allocation12]   ;;  %s11362_s14 = smov [#allocation3]  }
  0x26   :  { %s84_s13 = sshll.u32 %s11361_s11, 4  ;;  %s27_s15 = sshll.u32 %s11362_s14, 4  ;;  %s85_s13 = int_to_ptr.vmem [resolvable:$true] %s84_s13  ;;  %s11452_s15 = int_to_ptr.vmem [resolvable:$true] %s27_s15 }
  0x27   :  { %s11193_s18 = scalar_lea.hbm %s12779_s6, 64 }
  0x28   :  { %p11194_p2 = scmp.ne.s32.totalorder %s12779_s6, %s11193_s18  ;;  %p11197_p3 = scmp.lt.u32.totalorder %s11193_s18, %s12779_s6 }
  0x2a   :  { %p11199_p4 = pnand %p11197_p3, %p11194_p2 }
  0x2c   :  { %11202 = shalt.err (!%p11199_p4)
}
  0x2d   :  { %s11203_s4 = scalar_lea.vmem %s85_s13, 64  ;;  %p11208_p6 = scmp.lt.s32.totalorder %s85_s13, %s85_s13 }
  0x2e   :  { %p11204_p5 = scmp.ne.s32.totalorder %s85_s13, %s11203_s4  ;;  %p11209_p7 = scmp.lt.s32.totalorder %s11203_s4, %s11203_s4 }
  0x30   :  { %p11210_p8 = por %p11209_p7, %p11208_p6 }
  0x32   :  { %p11211_p9 = pnand %p11210_p8, %p11204_p5 }
  0x34   :  { %11214 = shalt.err (!%p11211_p9)
}
  0x35   :  { %87 = dma.hbm_to_vmem [thread:$0]  %s12779_s6, 64, %s85_s13, [#allocation13]  }
  0x36   :  { %s11215_s26 = scalar_lea.hbm %s12774_s1, 6912 }
  0x37   :  { %p11216_p10 = scmp.ne.s32.totalorder %s12774_s1, %s11215_s26  ;;  %p11219_p11 = scmp.lt.u32.totalorder %s11215_s26, %s12774_s1 }
  0x39   :  { %p11221_p12 = pnand %p11219_p11, %p11216_p10 }
  0x3b   :  { %11224 = shalt.err (!%p11221_p12)
}
  0x3c   :  { %s11225_s2 = scalar_lea.vmem %s11452_s15, 6912  ;;  %p11230_p0 = scmp.lt.s32.totalorder %s11452_s15, %s11452_s15 }
  0x3d   :  { %p11226_p13 = scmp.ne.s32.totalorder %s11452_s15, %s11225_s2  ;;  %p11231_p1 = scmp.lt.s32.totalorder %s11225_s2, %s11225_s2 }
  0x3f   :  { %p11232_p2 = por %p11231_p1, %p11230_p0 }
  0x41   :  { %p11233_p3 = pnand %p11232_p2, %p11226_p13 }
  0x43   :  { %11236 = shalt.err (!%p11233_p3)
}
  0x44   :  { %s11363_s6 = smov 384   ;;  %s11364_s10 = smov 24  }
  0x45   :  { %33 = dma.hbm_to_vmem [thread:$0]  %s12774_s1, 6912, %s11452_s15, [#allocation4], %s11363_s6, %s11363_s6, %s11364_s10  }
  0x46   :  { %s11365_s14 = smov [#allocation8]   ;;  %s11237_s19 = scalar_lea.hbm %s12776_s3, 61440 }
  0x47   :  { %s49_s16 = sshll.u32 %s11365_s14, 4  ;;  %p11238_p4 = scmp.ne.s32.totalorder %s12776_s3, %s11237_s19  ;;  %s50_s16 = int_to_ptr.vmem [resolvable:$true] %s49_s16 }
  0x48   :  { %p11241_p5 = scmp.lt.u32.totalorder %s11237_s19, %s12776_s3 }
  0x4a   :  { %p11243_p6 = pnand %p11241_p5, %p11238_p4 }
  0x4c   :  { %11246 = shalt.err (!%p11243_p6)
}
  0x4d   :  { %s11247_s12 = scalar_lea.vmem %s50_s16, 61440  ;;  %p11252_p8 = scmp.lt.s32.totalorder %s50_s16, %s50_s16 }
  0x4e   :  { %p11248_p7 = scmp.ne.s32.totalorder %s50_s16, %s11247_s12  ;;  %p11253_p9 = scmp.lt.s32.totalorder %s11247_s12, %s11247_s12 }
  0x50   :  { %p11254_p10 = por %p11253_p9, %p11252_p8 }
  0x52   :  { %p11255_p11 = pnand %p11254_p10, %p11248_p7 }
  0x54   :  { %11258 = shalt.err (!%p11255_p11)
}
  0x55   :  { %s11366_s1 = smov 256   ;;  %s11367_s15 = smov 16  }
  0x56   :  { %55 = dma.hbm_to_vmem [thread:$0]  %s12776_s3, 61440, %s50_s16, [#allocation7], %s11366_s1, %s11366_s1, %s11367_s15  }
  0x57   :  { %s11368_s25 = smov [#allocation11]   ;;  %s11369_s27 = smov [#allocation14]  }
  0x58   :  { %s71_s26 = sshll.u32 %s11368_s25, 4  ;;  %s93_s28 = sshll.u32 %s11369_s27, 4  ;;  %s72_s26 = int_to_ptr.vmem [resolvable:$true] %s71_s26  ;;  %s94_s28 = int_to_ptr.vmem [resolvable:$true] %s93_s28 }
  0x59   :  { %s11259_s2 = scalar_lea.hbm %s12778_s5, 32768 }
  0x5a   :  { %p11260_p12 = scmp.ne.s32.totalorder %s12778_s5, %s11259_s2  ;;  %p11263_p13 = scmp.lt.u32.totalorder %s11259_s2, %s12778_s5 }
  0x5c   :  { %p11265_p0 = pnand %p11263_p13, %p11260_p12 }
  0x5e   :  { %11268 = shalt.err (!%p11265_p0)
}
  0x5f   :  { %s11269_s3 = scalar_lea.vmem %s72_s26, 32768  ;;  %p11274_p2 = scmp.lt.s32.totalorder %s72_s26, %s72_s26 }
  0x60   :  { %p11270_p1 = scmp.ne.s32.totalorder %s72_s26, %s11269_s3  ;;  %p11275_p3 = scmp.lt.s32.totalorder %s11269_s3, %s11269_s3 }
  0x62   :  { %p11276_p4 = por %p11275_p3, %p11274_p2 }
  0x64   :  { %p11277_p5 = pnand %p11276_p4, %p11270_p1 }
  0x66   :  { %11280 = shalt.err (!%p11277_p5)
}
  0x67   :  { %77 = dma.hbm_to_vmem [thread:$0]  %s12778_s5, 32768, %s72_s26, [#allocation10], %s11366_s1, %s11366_s1, %s11367_s15  }
  0x68   :  { %s11281_s19 = scalar_lea.hbm %s12780_s7, 4096 }
  0x69   :  { %p11282_p6 = scmp.ne.s32.totalorder %s12780_s7, %s11281_s19  ;;  %p11285_p7 = scmp.lt.u32.totalorder %s11281_s19, %s12780_s7 }
  0x6b   :  { %p11287_p8 = pnand %p11285_p7, %p11282_p6 }
  0x6d   :  { %11290 = shalt.err (!%p11287_p8)
}
  0x6e   :  { %s11291_s12 = scalar_lea.vmem %s94_s28, 4096  ;;  %p11296_p10 = scmp.lt.s32.totalorder %s94_s28, %s94_s28 }
  0x6f   :  { %p11292_p9 = scmp.ne.s32.totalorder %s94_s28, %s11291_s12  ;;  %p11297_p11 = scmp.lt.s32.totalorder %s11291_s12, %s11291_s12 }
  0x71   :  { %p11298_p12 = por %p11297_p11, %p11296_p10 }
  0x73   :  { %p11299_p13 = pnand %p11298_p12, %p11292_p9 }
  0x75   :  { %11302 = shalt.err (!%p11299_p13)
}
  0x76   :  { %s11370_s5 = smov 64   ;;  %s11371_s1 = smov 4  }
  0x77   :  { %99 = dma.hbm_to_vmem [thread:$0]  %s12780_s7, 4096, %s94_s28, [#allocation13], %s11370_s5, %s11370_s5, %s11371_s1  }
  0x78   :  { %s11372_s24 = smov [#allocation15]   ;;  %s11303_s29 = scalar_lea.hbm %s12781_s8, 16 }
  0x79   :  { %s106_s25 = sshll.u32 %s11372_s24, 4  ;;  %p11304_p0 = scmp.ne.s32.totalorder %s12781_s8, %s11303_s29  ;;  %s107_s25 = int_to_ptr.vmem [resolvable:$true] %s106_s25 }
  0x7a   :  { %p11307_p1 = scmp.lt.u32.totalorder %s11303_s29, %s12781_s8 }
  0x7c   :  { %p11309_p2 = pnand %p11307_p1, %p11304_p0 }
  0x7e   :  { %11312 = shalt.err (!%p11309_p2)
}
  0x7f   :  { %s11313_s11 = scalar_lea.vmem %s107_s25, 16  ;;  %s11317_s7 = scalar_lea.vmem %s107_s25, 32 }
  0x80   :  { %p11314_p3 = scmp.ne.s32.totalorder %s107_s25, %s11313_s11  ;;  %p11318_p4 = scmp.lt.s32.totalorder %s107_s25, %s107_s25 }
  0x81   :  { %p11319_p5 = scmp.lt.s32.totalorder %s11317_s7, %s11313_s11 }
  0x83   :  { %p11320_p6 = por %p11319_p5, %p11318_p4 }
  0x85   :  { %p11321_p7 = pnand %p11320_p6, %p11314_p3 }
  0x87   :  { %11324 = shalt.err (!%p11321_p7)
}
  0x88   :  { %109 = dma.hbm_to_vmem [thread:$0]  %s12781_s8, 16, %s107_s25, [#allocation16]  }
  0x89   :  { %11347 = dma.done.wait [#allocation4], 6912  }
  0x8a   :  { %11348 = vsyncadd [#allocation4], 4294960384 }
  0x8b   :  { %11349 = dma.done.wait [#allocation7], 61536  }
  0x8c   :  { %11350 = vsyncadd [#allocation7], 4294905760 }
  0x8d   :  { %11351 = dma.done.wait [#allocation10], 32832  }
  0x8e   :  { %11352 = vsyncadd [#allocation10], 4294934464 }
  0x8f   :  { %11353 = dma.done.wait [#allocation13], 4160  }
  0x90   :  { %11354 = vsyncadd [#allocation13], 4294963136 }
  0x91   :  { %11355 = dma.done.wait [#allocation16], 16  }
  0x92   :  { %11356 = vsyncadd [#allocation16], 4294967280  ;;  %v9918_v0 = vld [vmem:[#allocation3 + $0x4] ss:$24 sps:$4 sm:$0xff]   ;;  %v9922_v2 = vld [vmem:[#allocation3] ss:$24 sps:$4 sm:$0xff]  }
  0x93   :  { %v9920_v1 = vld [vmem:[#allocation3 + $0xc] ss:$24 sps:$4 sm:$0xff]   ;;  %547 = vmatprep.subr.bf16.mxu0 %v9918_v0  ;;  %v9923_v3 = vld [vmem:[#allocation3 + $0x8] ss:$24 sps:$4 sm:$0xff]   ;;  %v9926_v5 = vld [vmem:[#allocation3 + $0x3c] ss:$24 sps:$4 sm:$0xff]  }
  0x94   :  { %610 = vmatprep.subr.bf16.mxu1 %v9920_v1  ;;  %v9924_v4 = vld [vmem:[#allocation3 + $0x34] ss:$24 sps:$4 sm:$0xff]   ;;  %548 = vmatpush1.bf16.msra.mxu0 %v9922_v2  ;;  %v9928_v6 = vld [vmem:[#allocation3 + $0x30] ss:$24 sps:$4 sm:$0xff]   ;;  %v9930_v8 = vld [vmem:[#allocation3 + $0x64] ss:$24 sps:$4 sm:$0xff]  }
  0x95   :  { %611 = vmatpush1.bf16.msra.mxu1 %v9923_v3  ;;  %549 = vmatprep.subr.bf16.mxu0 %v9924_v4  ;;  %v9929_v7 = vld [vmem:[#allocation3 + $0x38] ss:$24 sps:$4 sm:$0xff]   ;;  %v9932_v9 = vld [vmem:[#allocation3 + $0x6c] ss:$24 sps:$4 sm:$0xff]   ;;  %v9935_v11 = vld [vmem:[#allocation3 + $0x68] ss:$24 sps:$4 sm:$0xff]  }
  0x96   :  { %612 = vmatprep.subr.bf16.mxu1 %v9926_v5  ;;  %v9934_v10 = vld [vmem:[#allocation3 + $0x60] ss:$24 sps:$4 sm:$0xff]   ;;  %v9936_v12 = vld [vmem:[#allocation3 + $0x94] ss:$24 sps:$4 sm:$0xff]   ;;  %v9940_v14 = vld [vmem:[#allocation3 + $0x90] ss:$24 sps:$4 sm:$0xff]  }
  0x97   :  { %v9938_v13 = vld [vmem:[#allocation3 + $0x9c] ss:$24 sps:$4 sm:$0xff]   ;;  %v9941_v15 = vld [vmem:[#allocation3 + $0x98] ss:$24 sps:$4 sm:$0xff]   ;;  %v9944_v17 = vld [vmem:[#allocation3 + $0xcc] ss:$24 sps:$4 sm:$0xff]  }
  0x98   :  { %550 = vmatpush1.bf16.msra.mxu0 %v9928_v6  ;;  %v9942_v16 = vld [vmem:[#allocation3 + $0xc4] ss:$24 sps:$4 sm:$0xff]   ;;  %v9946_v18 = vld [vmem:[#allocation3 + $0xc0] ss:$24 sps:$4 sm:$0xff]   ;;  %v9948_v20 = vld [vmem:[#allocation3 + $0xf4] ss:$24 sps:$4 sm:$0xff]  }
  0x99   :  { %613 = vmatpush1.bf16.msra.mxu1 %v9929_v7  ;;  %551 = vmatprep.subr.bf16.mxu0 %v9930_v8  ;;  %v9947_v19 = vld [vmem:[#allocation3 + $0xc8] ss:$24 sps:$4 sm:$0xff]   ;;  %v9950_v21 = vld [vmem:[#allocation3 + $0xfc] ss:$24 sps:$4 sm:$0xff]   ;;  %v9953_v23 = vld [vmem:[#allocation3 + $0xf8] ss:$24 sps:$4 sm:$0xff]  }
  0x9a   :  { %614 = vmatprep.subr.bf16.mxu1 %v9932_v9  ;;  %v9952_v22 = vld [vmem:[#allocation3 + $0xf0] ss:$24 sps:$4 sm:$0xff]   ;;  %v9954_v24 = vld [vmem:[#allocation3 + $0x124] ss:$24 sps:$4 sm:$0xff]   ;;  %v9958_v26 = vld [vmem:[#allocation3 + $0x120] ss:$24 sps:$4 sm:$0xff]  }
  0x9b   :  { %v9956_v25 = vld [vmem:[#allocation3 + $0x12c] ss:$24 sps:$4 sm:$0xff]   ;;  %v9959_v27 = vld [vmem:[#allocation3 + $0x128] ss:$24 sps:$4 sm:$0xff]   ;;  %vm518_vm0 = vcmask 97280   ;;  %vm528_vm1 = vcmask 1045504  }
  0x9c   :  { %552 = vmatpush1.bf16.msra.mxu0 %v9934_v10  ;;  %v9960_v28 = vld [vmem:[#allocation3 + $0x154] ss:$24 sps:$4 sm:$0xff]   ;;  %v9972_v30 = vld [vmem:[%s12773_s0 + $0x4] ss:$8 sps:$4 sm:$0xff]   ;;  %v9964_v31 = vld [vmem:[#allocation3 + $0x150] ss:$24 sps:$4 sm:$0xff]  }
  0x9d   :  { %615 = vmatpush1.bf16.msra.mxu1 %v9935_v11  ;;  %553 = vmatprep.subr.bf16.mxu0 %v9936_v12  ;;  %v9962_v29 = vld [vmem:[#allocation3 + $0x15c] ss:$24 sps:$4 sm:$0xff]   ;;  %v9965_v32 = vld [vmem:[#allocation3 + $0x158] ss:$24 sps:$4 sm:$0xff]   ;;  %vm1770_vm2 = vcmask 1041409   ;;  %vm1773_vm3 = vcmask 1042434  }
  0x9e   :  { %616 = vmatprep.subr.bf16.mxu1 %v9938_v13  ;;  %v9966_v33 = vld [vmem:[#allocation3 + $0x184] ss:$24 sps:$4 sm:$0x3f]   ;;  %8931 = vmatprep.mubr.msk.bf16.mxu0 %vm518_vm0, %v9972_v30  ;;  %v9970_v35 = vld [vmem:[#allocation3 + $0x180] ss:$24 sps:$4 sm:$0x3f]  }
  0x9f   :  { %v9968_v34 = vld [vmem:[#allocation3 + $0x18c] ss:$24 sps:$4 sm:$0x3f]   ;;  %8935 = vmatprep.mubr.msk.bf16.mxu1 %vm518_vm0, %v9972_v30  ;;  %v9971_v36 = vld [vmem:[#allocation3 + $0x188] ss:$24 sps:$4 sm:$0x3f]  }
  0xa0   :  { %554 = vmatpush1.bf16.msra.mxu0 %v9940_v14  ;;  %v530_v37 = vsel %vm528_vm1, %v9970_v35, 0  ;;  %v536_v38 = vsel %vm528_vm1, %v9971_v36, 0  ;;  %v9977_v39 = vld [vmem:[#allocation3 + $0x14] ss:$24 sps:$4 sm:$0xff]   ;;  %v9974_v40 = vld [vmem:[%s12773_s0] ss:$8 sps:$4 sm:$0xff]   ;;  %v12783_v35 = vlaneseq }
  0xa1   :  { %617 = vmatpush1.bf16.msra.mxu1 %v9941_v15  ;;  %555 = vmatprep.subr.bf16.mxu0 %v9942_v16  ;;  %v9975_v41 = vld [vmem:[#allocation3 + $0x10] ss:$24 sps:$4 sm:$0xff]   ;;  %v9987_v42 = vld [vmem:[%s12773_s0 + $0x14] ss:$8 sps:$4 sm:$0xff]   ;;  %v9980_v43 = vld [vmem:[#allocation3 + $0x44] ss:$24 sps:$4 sm:$0xff]  }
  0xa2   :  { %618 = vmatprep.subr.bf16.mxu1 %v9944_v17  ;;  %v9978_v44 = vld [vmem:[#allocation3 + $0x40] ss:$24 sps:$4 sm:$0xff]   ;;  %v9983_v45 = vld [vmem:[#allocation3 + $0x74] ss:$24 sps:$4 sm:$0xff]   ;;  %v9992_v46 = vld [vmem:[%s12773_s0 + $0x10] ss:$8 sps:$4 sm:$0xff]  }
  0xa3   :  { %v9981_v47 = vld [vmem:[#allocation3 + $0x70] ss:$24 sps:$4 sm:$0xff]   ;;  %v9996_v48 = vld [vmem:[%s12773_s0 + $0x24] ss:$8 sps:$4 sm:$0xff]   ;;  %v9984_v50 = vld [vmem:[#allocation3 + $0xa0] ss:$24 sps:$4 sm:$0xff]  }
  0xa4   :  { %556 = vmatpush1.bf16.msra.mxu0 %v9946_v18  ;;  %v9986_v49 = vld [vmem:[#allocation3 + $0xa4] ss:$24 sps:$4 sm:$0xff]   ;;  %v9991_v51 = vld [vmem:[#allocation3 + $0xd4] ss:$24 sps:$4 sm:$0xff]   ;;  %v10001_v52 = vld [vmem:[%s12773_s0 + $0x20] ss:$8 sps:$4 sm:$0xff]  }
  0xa5   :  { %619 = vmatpush1.bf16.msra.mxu1 %v9947_v19  ;;  %557 = vmatprep.subr.bf16.mxu0 %v9948_v20  ;;  %v9989_v53 = vld [vmem:[#allocation3 + $0xd0] ss:$24 sps:$4 sm:$0xff]   ;;  %v9995_v54 = vld [vmem:[#allocation3 + $0x104] ss:$24 sps:$4 sm:$0xff]   ;;  %v9993_v55 = vld [vmem:[#allocation3 + $0x100] ss:$24 sps:$4 sm:$0xff]  }
  0xa6   :  { %620 = vmatprep.subr.bf16.mxu1 %v9950_v21  ;;  %v10000_v56 = vld [vmem:[#allocation3 + $0x134] ss:$24 sps:$4 sm:$0xff]   ;;  %v9998_v57 = vld [vmem:[#allocation3 + $0x130] ss:$24 sps:$4 sm:$0xff]   ;;  %v10004_v58 = vld [vmem:[#allocation3 + $0x164] ss:$24 sps:$4 sm:$0xff]  }
  0xa7   :  { %v10002_v59 = vld [vmem:[#allocation3 + $0x160] ss:$24 sps:$4 sm:$0xff]   ;;  %v10005_v60 = vld [vmem:[#allocation3 + $0x194] ss:$24 sps:$4 sm:$0x3f]   ;;  %vm1776_vm4 = vcmask 1043459  }
  0xa8   :  { %558 = vmatpush1.bf16.msra.mxu0 %v9952_v22  ;;  %v10007_v61 = vld [vmem:[#allocation3 + $0x190] ss:$24 sps:$4 sm:$0x3f]   ;;  %v10010_v0 = vld [vmem:[#allocation8 + $0x304] ss:$16 sps:$4 sm:$0xff]   ;;  %vm1779_vm5 = vcmask 1044484  }
  0xa9   :  { %621 = vmatpush1.bf16.msra.mxu1 %v9953_v23  ;;  %559 = vmatprep.subr.bf16.mxu0 %v9954_v24  ;;  %v542_v62 = vsel %vm528_vm1, %v10007_v61, 0  ;;  %v10008_v63 = vld [vmem:[#allocation8 + $0x300] ss:$16 sps:$4 sm:$0xff]   ;;  %v10011_v1 = vld [vmem:[#allocation8 + $0x308] ss:$16 sps:$4 sm:$0xff]   ;;  %vm1782_vm6 = vcmask 1045509  }
  0xaa   :  { %622 = vmatprep.subr.bf16.mxu1 %v9956_v25  ;;  %v10013_v2 = vld [vmem:[#allocation8 + $0x30c] ss:$16 sps:$4 sm:$0xff]   ;;  %v10014_v3 = vld [vmem:[#allocation8 + $0x320] ss:$16 sps:$4 sm:$0xff]   ;;  %v10016_v4 = vld [vmem:[#allocation8 + $0x324] ss:$16 sps:$4 sm:$0xff]  }
  0xab   :  { %v10017_v5 = vld [vmem:[#allocation8 + $0x328] ss:$16 sps:$4 sm:$0xff]   ;;  %v10019_v6 = vld [vmem:[#allocation8 + $0x32c] ss:$16 sps:$4 sm:$0xff]   ;;  %v10020_v7 = vld [vmem:[#allocation8 + $0x340] ss:$16 sps:$4 sm:$0xff]  }
  0xac   :  { %560 = vmatpush1.bf16.msra.mxu0 %v9958_v26  ;;  %v10022_v8 = vld [vmem:[#allocation8 + $0x344] ss:$16 sps:$4 sm:$0xff]   ;;  %v10023_v9 = vld [vmem:[#allocation8 + $0x348] ss:$16 sps:$4 sm:$0xff]   ;;  %v10025_v10 = vld [vmem:[#allocation8 + $0x34c] ss:$16 sps:$4 sm:$0xff]  }
  0xad   :  { %623 = vmatpush1.bf16.msra.mxu1 %v9959_v27  ;;  %561 = vmatprep.subr.bf16.mxu0 %v9960_v28  ;;  %v10026_v11 = vld [vmem:[#allocation8 + $0x360] ss:$16 sps:$4 sm:$0xff]   ;;  %v10028_v12 = vld [vmem:[#allocation8 + $0x364] ss:$16 sps:$4 sm:$0xff]   ;;  %v10029_v13 = vld [vmem:[#allocation8 + $0x368] ss:$16 sps:$4 sm:$0xff]  }
  0xae   :  { %624 = vmatprep.subr.bf16.mxu1 %v9962_v29  ;;  %v10031_v14 = vld [vmem:[#allocation8 + $0x36c] ss:$16 sps:$4 sm:$0xff]   ;;  %v10034_v15 = vld [vmem:[#allocation8 + $0x384] ss:$16 sps:$4 sm:$0xff]   ;;  %v10032_v17 = vld [vmem:[#allocation8 + $0x380] ss:$16 sps:$4 sm:$0xff]  }
  0xaf   :  { %v10037_v16 = vld [vmem:[#allocation8 + $0x38c] ss:$16 sps:$4 sm:$0xff]   ;;  %v10035_v18 = vld [vmem:[#allocation8 + $0x388] ss:$16 sps:$4 sm:$0xff]   ;;  %v10040_v19 = vld [vmem:[#allocation8 + $0x3a4] ss:$16 sps:$4 sm:$0xff]  }
  0xb0   :  { %562 = vmatpush1.bf16.msra.mxu0 %v9964_v31  ;;  %v10043_v20 = vld [vmem:[#allocation8 + $0x3ac] ss:$16 sps:$4 sm:$0xff]   ;;  %v10038_v21 = vld [vmem:[#allocation8 + $0x3a0] ss:$16 sps:$4 sm:$0xff]   ;;  %v10041_v22 = vld [vmem:[#allocation8 + $0x3a8] ss:$16 sps:$4 sm:$0xff]  }
  0xb1   :  { %625 = vmatpush1.bf16.msra.mxu1 %v9965_v32  ;;  %8930 = vmatprep.subr.msk.bf16.mxu0 %vm528_vm1, %v9966_v33  ;;  %v10046_v23 = vld [vmem:[#allocation8 + $0x3c4] ss:$16 sps:$4 sm:$0xff]   ;;  %v10049_v24 = vld [vmem:[#allocation8 + $0x3cc] ss:$16 sps:$4 sm:$0xff]   ;;  %v10044_v25 = vld [vmem:[#allocation8 + $0x3c0] ss:$16 sps:$4 sm:$0xff]  }
  0xb2   :  { %8934 = vmatprep.subr.msk.bf16.mxu1 %vm528_vm1, %v9968_v34  ;;  %v10047_v26 = vld [vmem:[#allocation8 + $0x3c8] ss:$16 sps:$4 sm:$0xff]   ;;  %v10052_v27 = vld [vmem:[#allocation8 + $0x3e4] ss:$16 sps:$4 sm:$0xff]   ;;  %v10055_v28 = vld [vmem:[#allocation8 + $0x3ec] ss:$16 sps:$4 sm:$0xff]  }
  0xb3   :  { %v10050_v29 = vld [vmem:[#allocation8 + $0x3e0] ss:$16 sps:$4 sm:$0xff]   ;;  %v10058_v31 = vld [vmem:[#allocation8 + $0x404] ss:$16 sps:$4 sm:$0xff]   ;;  %v10061_v32 = vld [vmem:[#allocation8 + $0x40c] ss:$16 sps:$4 sm:$0xff]  }
  0xb4   :  { %564 = vmatpush1.bf16.msra.mxu0 %v530_v37  ;;  %v10056_v33 = vld [vmem:[#allocation8 + $0x400] ss:$16 sps:$4 sm:$0xff]   ;;  %v10059_v34 = vld [vmem:[#allocation8 + $0x408] ss:$16 sps:$4 sm:$0xff]   ;;  %v10064_v36 = vld [vmem:[#allocation8 + $0x424] ss:$16 sps:$4 sm:$0xff]  }
  0xb5   :  { %627 = vmatpush1.bf16.msra.mxu1 %v536_v38  ;;  %673 = vmatprep.subr.bf16.mxu0 %v9977_v39  ;;  %v10067_v37 = vld [vmem:[#allocation8 + $0x42c] ss:$16 sps:$4 sm:$0xff]   ;;  %v11565_v38 = vshrl.u32 %v12783_v35, 7  ;;  %v10062_v39 = vld [vmem:[#allocation8 + $0x420] ss:$16 sps:$4 sm:$0xff]   ;;  %vm1785_vm7 = vcmask 1046534  }
  0xb6   :  { %2346 = vmatprep.subr.bf16.mxu1 %v10010_v0  ;;  %v10080_v61 = vld [vmem:[#allocation8 + $0x480] ss:$16 sps:$4 sm:$0xff]   ;;  %vm1788_vm8 = vcmask 1047559   ;;  %vm8837_vm10 = vcmask 1041408   ;;  %s11377_s0 = smov [#allocation17]  }
  0xb7   :  { %580 = vmatmul.mubr.bf16.vlgmr.msra.gmra.mrb[0].mxu0 %v9974_v40  ;;  %12846 = vst [vmem:[#allocation24_spill] sm:$0xff] %v11565_v38  ;;  %s8857_s5 = sshll.u32 %s11377_s0, 4  ;;  %s8858_s5 = int_to_ptr.vmem [resolvable:$true] %s8857_s5 }
  0xb8   :  { %643 = vmatmul.mubr.bf16.vlgmr.msra.gmra.mrb[0].mxu1 %v9974_v40  ;;  %674 = vmatpush1.bf16.msra.mxu0 %v9975_v41  ;;  %v11567_v41 = vld [vmem:[#allocation6] sm:$0x3f]  ;;  %s11325_s1 = scalar_lea.vmem %s8858_s5, 32  ;;  %p11330_p9 = scmp.lt.s32.totalorder %s8858_s5, %s8858_s5 }
  0xb9   :  { %8932 = vmatprep.mubr.msk.bf16.mxu0 %vm518_vm0, %v9987_v42  ;;  %675 = vmatprep.subr.bf16.mxu0 %v9980_v43  ;;  %v10073_v43 = vld [vmem:[#allocation8 + $0x44c] ss:$16 sps:$4 sm:$0xff]   ;;  %p11326_p8 = scmp.ne.s32.totalorder %s8858_s5, %s11325_s1  ;;  %p11331_p10 = scmp.lt.s32.totalorder %s11325_s1, %s11325_s1 }
  0xba   :  { %8936 = vmatprep.mubr.msk.bf16.mxu1 %vm518_vm0, %v9987_v42  ;;  %2347 = vmatpush1.bf16.msra.mxu1 %v10008_v63 }
  0xbb   :  { %2348 = vmatprep.subr.bf16.mxu1 %v10016_v4  ;;  %p11332_p11 = por %p11331_p10, %p11330_p9 }
  0xbc   :  { %676 = vmatpush1.bf16.msra.mxu0 %v9978_v44  ;;  %v11570_v44 = vsub.s32 0, %v11565_v38 }
  0xbd   :  { %677 = vmatprep.subr.bf16.mxu0 %v9983_v45  ;;  %v10068_v45 = vld [vmem:[#allocation8 + $0x440] ss:$16 sps:$4 sm:$0xff]   ;;  %p11333_p12 = pnand %p11332_p11, %p11326_p8 }
  0xbe   :  { %2349 = vmatpush1.bf16.msra.mxu1 %v10014_v3  ;;  %12847 = vst [vmem:[#allocation25_spill] sm:$0xff] %v11570_v44 }
  0xbf   :  { %590 = vmatmul.mubr.bf16.gmra.mrb[4].mxu0 %v9992_v46  ;;  %2350 = vmatprep.subr.bf16.mxu1 %v10022_v8  ;;  %v10088_v8 = vld [vmem:[#allocation8 + $0x4a4] ss:$16 sps:$4 sm:$0xff]  }
  0xc0   :  { %653 = vmatmul.mubr.bf16.gmra.mrb[4].mxu1 %v9992_v46  ;;  %678 = vmatpush1.bf16.msra.mxu0 %v9981_v47  ;;  %v11573_v47 = vsub.s32 3, %v11565_v38 }
  0xc1   :  { %8933 = vmatprep.mubr.msk.bf16.mxu0 %vm518_vm0, %v9996_v48  ;;  %679 = vmatprep.subr.bf16.mxu0 %v9986_v49  ;;  %v10079_v49 = vld [vmem:[#allocation8 + $0x46c] ss:$16 sps:$4 sm:$0xff]  }
  0xc2   :  { %8937 = vmatprep.mubr.msk.bf16.mxu1 %vm518_vm0, %v9996_v48  ;;  %2351 = vmatpush1.bf16.msra.mxu1 %v10020_v7  ;;  %12848 = vst [vmem:[#allocation26_spill] sm:$0xff] %v11573_v47 }
  0xc3   :  { %2352 = vmatprep.subr.bf16.mxu1 %v10028_v12  ;;  %v10089_v12 = vld [vmem:[#allocation8 + $0x4a8] ss:$16 sps:$4 sm:$0xff]  }
  0xc4   :  { %680 = vmatpush1.bf16.msra.mxu0 %v9984_v50  ;;  %v11577_v50 = vrot.slane %v11567_v41, %v11570_v44 }
  0xc5   :  { %681 = vmatprep.subr.bf16.mxu0 %v9991_v51  ;;  %v10074_v51 = vld [vmem:[#allocation8 + $0x460] ss:$16 sps:$4 sm:$0xff]  }
  0xc6   :  { %2353 = vmatpush1.bf16.msra.mxu1 %v10026_v11  ;;  %v10086_v11 = vld [vmem:[#allocation8 + $0x4a0] ss:$16 sps:$4 sm:$0xff]  }
  0xc7   :  { %600 = vmatmul.mubr.bf16.gmra.mrb[8].mxu0 %v10001_v52  ;;  %2354 = vmatprep.subr.bf16.mxu1 %v10034_v15 }
  0xc8   :  { %663 = vmatmul.mubr.bf16.gmra.mrb[8].mxu1 %v10001_v52  ;;  %682 = vmatpush1.bf16.msra.mxu0 %v9989_v53  ;;  %v11581_v53 = vrot.slane %v11567_v41, %v11573_v47 }
  0xc9   :  { %8939 = vmatprep.mubr.msk.bf16.mxu0 %vm518_vm0, %v9972_v30  ;;  %683 = vmatprep.subr.bf16.mxu0 %v9995_v54  ;;  %v10053_v30 = vld [vmem:[#allocation8 + $0x3e8] ss:$16 sps:$4 sm:$0xff]  }
  0xca   :  { %2355 = vmatpush1.bf16.msra.mxu1 %v10032_v17 }
  0xcb   :  { %2356 = vmatprep.subr.bf16.mxu1 %v10040_v19  ;;  %v10097_v19 = vld [vmem:[#allocation8 + $0x4cc] ss:$16 sps:$4 sm:$0xff]  }
  0xcc   :  { %684 = vmatpush1.bf16.msra.mxu0 %v9993_v55 }
  0xcd   :  { %685 = vmatprep.subr.bf16.mxu0 %v10000_v56  ;;  %v10082_v56 = vld [vmem:[#allocation8 + $0x484] ss:$16 sps:$4 sm:$0xff]  }
  0xce   :  { %2357 = vmatpush1.bf16.msra.mxu1 %v10038_v21 }
  0xcf   :  { %2358 = vmatprep.subr.bf16.mxu1 %v10046_v23  ;;  %v10092_v23 = vld [vmem:[#allocation8 + $0x4c0] ss:$16 sps:$4 sm:$0xff]  }
  0xd0   :  { %686 = vmatpush1.bf16.msra.mxu0 %v9998_v57  ;;  %v10085_v57 = vld [vmem:[#allocation8 + $0x48c] ss:$16 sps:$4 sm:$0xff]  }
  0xd1   :  { %687 = vmatprep.subr.bf16.mxu0 %v10004_v58 }
  0xd2   :  { %2359 = vmatpush1.bf16.msra.mxu1 %v10044_v25 }
  0xd3   :  { %2360 = vmatprep.subr.bf16.mxu1 %v10052_v27 }
  0xd4   :  { %688 = vmatpush1.bf16.msra.mxu0 %v10002_v59 }
  0xd5   :  { %8938 = vmatprep.subr.msk.bf16.mxu0 %vm528_vm1, %v10005_v60 }
  0xd6   :  { %2361 = vmatpush1.bf16.msra.mxu1 %v10050_v29  ;;  %v10100_v29 = vld [vmem:[#allocation8 + $0x4e4] ss:$16 sps:$4 sm:$0xff]  }
  0xd7   :  { %2362 = vmatprep.subr.bf16.mxu1 %v10058_v31 }
  0xd8   :  { %690 = vmatpush1.bf16.msra.mxu0 %v542_v62  ;;  %v10083_v62 = vld [vmem:[#allocation8 + $0x488] ss:$16 sps:$4 sm:$0xff]  }
  0xd9   :  { %2432 = vmatprep.subr.bf16.mxu0 %v10013_v2 }
  0xda   :  { %2363 = vmatpush1.bf16.msra.mxu1 %v10056_v33 }
  0xdb   :  { %706 = vmatmul.mubr.bf16.vlgmr.msra.gmra.mrb[12].mxu0 %v9974_v40  ;;  %v10065_v40 = vld [vmem:[#allocation8 + $0x428] ss:$16 sps:$4 sm:$0xff]   ;;  %2364 = vmatprep.subr.bf16.mxu1 %v10064_v36 }
  0xdc   :  { %8940 = vmatprep.mubr.msk.bf16.mxu0 %vm518_vm0, %v9987_v42  ;;  %2433 = vmatpush1.bf16.msra.mxu0 %v10011_v1  ;;  %v10070_v42 = vld [vmem:[#allocation8 + $0x444] ss:$16 sps:$4 sm:$0xff]  }
  0xdd   :  { %2434 = vmatprep.subr.bf16.mxu0 %v10019_v6 }
  0xde   :  { %2365 = vmatpush1.bf16.msra.mxu1 %v10062_v39  ;;  %v10103_v39 = vld [vmem:[#allocation8 + $0x4ec] ss:$16 sps:$4 sm:$0xff]  }
  0xdf   :  { %2366 = vmatprep.subr.bf16.mxu1 %v10070_v42 }
  0xe0   :  { %2435 = vmatpush1.bf16.msra.mxu0 %v10017_v5 }
  0xe1   :  { %2436 = vmatprep.subr.bf16.mxu0 %v10025_v10 }
  0xe2   :  { %2367 = vmatpush1.bf16.msra.mxu1 %v10068_v45 }
  0xe3   :  { %716 = vmatmul.mubr.bf16.gmra.mrb[16].mxu0 %v9992_v46  ;;  %v10071_v46 = vld [vmem:[#allocation8 + $0x448] ss:$16 sps:$4 sm:$0xff]  }
  0xe4   :  { %8941 = vmatprep.mubr.msk.bf16.mxu0 %vm518_vm0, %v9996_v48  ;;  %2437 = vmatpush1.bf16.msra.mxu0 %v10023_v9  ;;  %v10076_v48 = vld [vmem:[#allocation8 + $0x464] ss:$16 sps:$4 sm:$0xff]   ;;  %v10091_v9 = vld [vmem:[#allocation8 + $0x4ac] ss:$16 sps:$4 sm:$0xff]  }
  0xe5   :  { %2438 = vmatprep.subr.bf16.mxu0 %v10031_v14  ;;  %2368 = vmatprep.subr.bf16.mxu1 %v10076_v48 }
  0xe6   :  { %2369 = vmatpush1.bf16.msra.mxu1 %v10074_v51 }
  0xe7   :  { %2370 = vmatprep.subr.bf16.mxu1 %v10082_v56 }
  0xe8   :  { %2439 = vmatpush1.bf16.msra.mxu0 %v10029_v13 }
  0xe9   :  { %2440 = vmatprep.subr.bf16.mxu0 %v10037_v16 }
  0xea   :  { %2371 = vmatpush1.bf16.msra.mxu1 %v10080_v61 }
  0xeb   :  { %726 = vmatmul.mubr.bf16.gmra.mrb[20].mxu0 %v10001_v52  ;;  %v10077_v52 = vld [vmem:[#allocation8 + $0x468] ss:$16 sps:$4 sm:$0xff]   ;;  %2372 = vmatprep.subr.bf16.mxu1 %v10088_v8 }
  0xec   :  { %2441 = vmatpush1.bf16.msra.mxu0 %v10035_v18  ;;  %v10094_v18 = vld [vmem:[#allocation8 + $0x4c4] ss:$16 sps:$4 sm:$0xff]  }
  0xed   :  { %2442 = vmatprep.subr.bf16.mxu0 %v10043_v20 }
  0xee   :  { %2373 = vmatpush1.bf16.msra.mxu1 %v10086_v11  ;;  %v11373_v11 = vmov 1983009808  }
  0xef   :  { %2374 = vmatprep.subr.bf16.mxu1 %v10094_v18 }
  0xf0   :  { %2443 = vmatpush1.bf16.msra.mxu0 %v10041_v22 }
  0xf1   :  { %2444 = vmatprep.subr.bf16.mxu0 %v10049_v24  ;;  %v10095_v24 = vld [vmem:[#allocation8 + $0x4c8] ss:$16 sps:$4 sm:$0xff]  }
  0xf2   :  { %2375 = vmatpush1.bf16.msra.mxu1 %v10092_v23 }
  0xf3   :  { %2376 = vmatprep.subr.bf16.mxu1 %v10100_v29 }
  0xf4   :  { %2445 = vmatpush1.bf16.msra.mxu0 %v10047_v26 }
  0xf5   :  { %2446 = vmatprep.subr.bf16.mxu0 %v10055_v28  ;;  %v10098_v28 = vld [vmem:[#allocation8 + $0x4e0] ss:$16 sps:$4 sm:$0xff]  }
  0xf6   :  { %2377 = vmatpush1.bf16.msra.mxu1 %v10098_v28 }
  0xf8   :  { %2447 = vmatpush1.bf16.msra.mxu0 %v10053_v30 }
  0xf9   :  { %2448 = vmatprep.subr.bf16.mxu0 %v10061_v32 }
  0xfc   :  { %2449 = vmatpush1.bf16.msra.mxu0 %v10059_v34  ;;  %v10101_v34 = vld [vmem:[#allocation8 + $0x4e8] ss:$16 sps:$4 sm:$0xff]  }
  0xfd   :  { %2450 = vmatprep.subr.bf16.mxu0 %v10067_v37 }
 0x100   :  { %2451 = vmatpush1.bf16.msra.mxu0 %v10065_v40 }
 0x101   :  { %2452 = vmatprep.subr.bf16.mxu0 %v10073_v43 }
 0x104   :  { %2453 = vmatpush1.bf16.msra.mxu0 %v10071_v46 }
 0x105   :  { %2454 = vmatprep.subr.bf16.mxu0 %v10079_v49 }
 0x108   :  { %2455 = vmatpush1.bf16.msra.mxu0 %v10077_v52 }
 0x109   :  { %2456 = vmatprep.subr.bf16.mxu0 %v10085_v57 }
 0x10c   :  { %2457 = vmatpush1.bf16.msra.mxu0 %v10083_v62 }
 0x10d   :  { %2458 = vmatprep.subr.bf16.mxu0 %v10091_v9  ;;  %v11630_v9 = vsub.s32 2, %v11565_v38 }
 0x10f   :  { %12849 = vst [vmem:[#allocation27_spill] sm:$0xff] %v11630_v9 }
 0x110   :  { %2459 = vmatpush1.bf16.msra.mxu0 %v10089_v12  ;;  %v812_v12 = vunpack.c.l.s4 %v11373_v11 }
 0x111   :  { %2460 = vmatprep.subr.bf16.mxu0 %v10097_v19 }
 0x112   :  { %v813_v19 = vunpack.c.0.s8 %v812_v12 }
 0x114   :  { %2461 = vmatpush1.bf16.msra.mxu0 %v10095_v24 }
 0x115   :  { %2462 = vmatprep.subr.bf16.mxu0 %v10103_v39 }
 0x118   :  { %2463 = vmatpush1.bf16.msra.mxu0 %v10101_v34 }
 0x18a   :  { %v581_v54 = vpop.f32.mrb[0].mxu0 }
 0x18b   :  { %v11583_v55 = vpop.f32.mrb[0].mxu1  ;;  %v582_v58 = vadd.f32 %v581_v54, %v11577_v50  ;;  %v11586_v59 = vpop.f32.mrb[1].mxu0  ;;  %v10106_v54 = vld [vmem:[#allocation8 + $0x504] ss:$16 sps:$4 sm:$0xff]  }
 0x18c   :  { %v646_v60 = vpop.f32.mrb[1].mxu1  ;;  %v585_v0 = vpop.f32.mrb[2].mxu0  ;;  %2389 = vmatprep.subr.bf16.mxu1 %v10106_v54 }
 0x18d   :  { %v647_v63 = vadd.f32 %v646_v60, %v11581_v53  ;;  %v11589_v1 = vpop.f32.mrb[2].mxu1  ;;  %v736_v2 = vmax.f32 %v582_v58, 0.0  ;;  %v586_v3 = vadd.f32 %v585_v0, %v11577_v50  ;;  %v11592_v4 = vpop.f32.mrb[3].mxu0  ;;  %v10109_v60 = vld [vmem:[#allocation8 + $0x50c] ss:$16 sps:$4 sm:$0xff]  }
 0x18e   :  { %v650_v5 = vpop.f32.mrb[3].mxu1  ;;  %2475 = vmatprep.subr.bf16.mxu0 %v10109_v60 }
 0x18f   :  { %v739_v6 = vmax.f32 %v647_v63, 0.0  ;;  %v651_v7 = vadd.f32 %v650_v5, %v11581_v53  ;;  %v742_v10 = vmax.f32 %v586_v3, 0.0 }
 0x191   :  { %v11595_v13 = vmax.f32 %v736_v2, %v739_v6  ;;  %v745_v14 = vmax.f32 %v651_v7, 0.0 }
 0x192   :  { %v591_v16 = vpop.f32.mrb[4].mxu0 }
 0x193   :  { %v11597_v15 = vmax.f32 %v742_v10, %v745_v14  ;;  %v11599_v17 = vpop.f32.mrb[4].mxu1  ;;  %v592_v20 = vadd.f32 %v591_v16, %v11577_v50  ;;  %v11602_v21 = vpop.f32.mrb[5].mxu0  ;;  %v11633_v10 = vsub.s32 1, %v11565_v38  ;;  %v208_v14 = vrot.slane %v11567_v41, %v11630_v9 }
 0x194   :  { %v656_v22 = vpop.f32.mrb[5].mxu1  ;;  %v595_v26 = vpop.f32.mrb[6].mxu0 }
 0x195   :  { %v657_v25 = vadd.f32 %v656_v22, %v11581_v53  ;;  %v11605_v27 = vpop.f32.mrb[6].mxu1  ;;  %v748_v30 = vmax.f32 %v592_v20, 0.0  ;;  %v596_v31 = vadd.f32 %v595_v26, %v11577_v50  ;;  %v11608_v32 = vpop.f32.mrb[7].mxu0  ;;  %12850 = vst [vmem:[#allocation28_spill] sm:$0xff] %v11633_v10  ;;  %v204_v16 = vrot.slane %v11567_v41, %v11633_v10 }
 0x196   :  { %v660_v33 = vpop.f32.mrb[7].mxu1  ;;  %v645_v22 = vadd.f32 %v11583_v55, %v208_v14  ;;  %v649_v24 = vadd.f32 %v11589_v1, %v208_v14  ;;  %v11655_v28 = vadd.f32 %v11599_v17, %v208_v14 }
 0x197   :  { %v751_v36 = vmax.f32 %v657_v25, 0.0  ;;  %v661_v37 = vadd.f32 %v660_v33, %v11581_v53  ;;  %v754_v40 = vmax.f32 %v596_v31, 0.0  ;;  %v584_v23 = vadd.f32 %v11586_v59, %v204_v16 }
 0x198   :  { %v588_v25 = vadd.f32 %v11592_v4, %v204_v16  ;;  %v11659_v31 = vadd.f32 %v11602_v21, %v204_v16  ;;  %v738_v33 = vmax.f32 %v645_v22, 0.0  ;;  %v744_v17 = vmax.f32 %v649_v24, 0.0 }
 0x199   :  { %v11611_v42 = vmax.f32 %v748_v30, %v751_v36  ;;  %v757_v43 = vmax.f32 %v661_v37, 0.0  ;;  %v737_v1 = vmax.f32 %v584_v23, 0.0  ;;  %v11673_v54 = vadd.f32 %v11608_v32, %v204_v16 }
 0x19a   :  { %v601_v46 = vpop.f32.mrb[8].mxu0  ;;  %v743_v37 = vmax.f32 %v588_v25, 0.0 }
 0x19b   :  { %v11613_v45 = vmax.f32 %v754_v40, %v757_v43  ;;  %v664_v48 = vpop.f32.mrb[8].mxu1  ;;  %v602_v49 = vadd.f32 %v601_v46, %v11577_v50  ;;  %v11616_v51 = vpop.f32.mrb[9].mxu0  ;;  %v11669_v43 = vadd.f32 %v11605_v27, %v208_v14 }
 0x19c   :  { %v666_v52 = vpop.f32.mrb[9].mxu1  ;;  %v605_v57 = vpop.f32.mrb[10].mxu0  ;;  %v11675_v60 = vadd.f32 %v664_v48, %v208_v14 }
 0x19d   :  { %v667_v56 = vadd.f32 %v666_v52, %v11581_v53  ;;  %v11619_v58 = vpop.f32.mrb[10].mxu1  ;;  %v760_v61 = vmax.f32 %v602_v49, 0.0  ;;  %v606_v62 = vadd.f32 %v605_v57, %v11577_v50  ;;  %v11622_v63 = vpop.f32.mrb[11].mxu0  ;;  %v11636_v50 = vsub.s32 4, %v11565_v38 }
 0x19e   :  { %v670_v0 = vpop.f32.mrb[11].mxu1 }
 0x19f   :  { %v763_v2 = vmax.f32 %v667_v56, 0.0  ;;  %v671_v3 = vadd.f32 %v670_v0, %v11581_v53  ;;  %v766_v5 = vmax.f32 %v606_v62, 0.0  ;;  %12851 = vst [vmem:[#allocation29_spill] sm:$0xff] %v11636_v50  ;;  %v219_v53 = vsub.s32 5, %v11565_v38 }
 0x1a0   :  { %v11645_v18 = vrot.slane %v11567_v41, %v11636_v50 }
 0x1a1   :  { %v11625_v6 = vmax.f32 %v760_v61, %v763_v2  ;;  %v769_v7 = vmax.f32 %v671_v3, 0.0  ;;  %v11648_v20 = vrot.slane %v11567_v41, %v219_v53  ;;  %v11662_v41 = vsub.s32 %v813_v19, %v11565_v38 }
 0x1a2   :  { %v11680_v2 = vadd.f32 %v11616_v51, %v204_v16 }
 0x1a3   :  { %v11627_v8 = vmax.f32 %v766_v5, %v769_v7  ;;  %12852 = vst [vmem:[#allocation30_spill] sm:$0xff] %v11662_v41 }
 0x1ae   :  { %v707_v26 = vpop.f32.mrb[12].mxu0 }
 0x1af   :  { %v708_v29 = vadd.f32 %v707_v26, %v11645_v18  ;;  %v709_v30 = vpop.f32.mrb[13].mxu0 }
 0x1b0   :  { %v710_v55 = vadd.f32 %v709_v30, %v11648_v20  ;;  %v711_v59 = vpop.f32.mrb[14].mxu0 }
 0x1b1   :  { %v740_v34 = vmax.f32 %v708_v29, 0.0  ;;  %v712_v4 = vadd.f32 %v711_v59, %v11645_v18  ;;  %v713_v36 = vpop.f32.mrb[15].mxu0 }
 0x1b2   :  { %v741_v39 = vmax.f32 %v710_v55, 0.0  ;;  %v714_v40 = vadd.f32 %v713_v36, %v11648_v20 }
 0x1b3   :  { %v773_v46 = vmax.f32 %v737_v1, %v740_v34  ;;  %v746_v49 = vmax.f32 %v712_v4, 0.0 }
 0x1b4   :  { %v774_v56 = vmax.f32 %v738_v33, %v741_v39  ;;  %v747_v57 = vmax.f32 %v714_v40, 0.0 }
 0x1b5   :  { %v808_v61 = vcombine.low %v11595_v13, %v773_v46  ;;  %v809_v62 = vcombine.high %v11595_v13, %v773_v46  ;;  %v776_v0 = vmax.f32 %v743_v37, %v746_v49  ;;  %v11690_v13 = vadd.f32 %v11619_v58, %v208_v14 }
 0x1b6   :  { %v810_v27 = vcombine.high %v774_v56, %v774_v56  ;;  %v831_v3 = vrot.slane %v774_v56, %v11662_v41  ;;  %v777_v5 = vmax.f32 %v744_v17, %v747_v57  ;;  %v717_v7 = vpop.f32.mrb[16].mxu0 }
 0x1b7   :  { %v817_v32 = vrot.slane %v808_v61, %v11662_v41  ;;  %v824_v11 = vrot.slane %v809_v62, %v11662_v41  ;;  %v843_v48 = vcombine.low %v11597_v15, %v776_v0  ;;  %v844_v12 = vcombine.high %v11597_v15, %v776_v0  ;;  %v11687_v53 = vpop.f32.mrb[17].mxu0 }
 0x1b8   :  { %v838_v51 = vrot.slane %v810_v27, %v11662_v41  ;;  %v845_v19 = vcombine.high %v777_v5, %v777_v5  ;;  %v866_v22 = vrot.slane %v777_v5, %v11662_v41  ;;  %v11694_v23 = vpop.f32.mrb[18].mxu0  ;;  %v11701_v15 = vadd.f32 %v11622_v63, %v204_v16 }
 0x1b9   :  { %v839_v24 = vcombine.low %v817_v32, %v831_v3  ;;  %v840_v25 = vcombine.high %v817_v32, %v831_v3  ;;  %v852_v26 = vrot.slane %v843_v48, %v11662_v41  ;;  %v859_v29 = vrot.slane %v844_v12, %v11662_v41  ;;  %v11698_v30 = vpop.f32.mrb[19].mxu0 }
 0x1ba   :  { %v841_v58 = vcombine.low %v824_v11, %v838_v51  ;;  %v842_v14 = vcombine.high %v824_v11, %v838_v51  ;;  %v873_v55 = vrot.slane %v845_v19, %v11662_v41  ;;  %v11714_v40 = vadd.f32 %v717_v7, %v11645_v18 }
 0x1bb   :  { %v8942_v59 = vrot.slane %v839_v24, 9  ;;  %v8943_v33 = vrot.slane %v840_v25, 9  ;;  %v11704_v1 = vcombine.low %v852_v26, %v866_v22  ;;  %v11706_v34 = vcombine.high %v852_v26, %v866_v22 }
 0x1bc   :  { %v8944_v4 = vrot.slane %v841_v58, 9  ;;  %v8945_v36 = vrot.slane %v842_v14, 9  ;;  %v11708_v17 = vcombine.low %v859_v29, %v873_v55  ;;  %v11710_v37 = vcombine.high %v859_v29, %v873_v55 }
 0x1bd   :  { %v1114_v63 = vmax.f32 %v839_v24, %v8942_v59  ;;  %v1115_v16 = vmax.f32 %v840_v25, %v8943_v33  ;;  %v8947_v35 = vrot.slane %v11706_v34, 9 }
 0x1be   :  { %v1116_v56 = vmax.f32 %v841_v58, %v8944_v4  ;;  %v1117_v57 = vmax.f32 %v842_v14, %v8945_v36  ;;  %v11718_v61 = vpop.f32.mrb[20].mxu0  ;;  %v8946_v14 = vrot.slane %v11704_v1, 9 }
 0x1bf   :  { %v1169_v3 = vrot.slane %v1115_v16, %v11570_v44  ;;  %v11724_v5 = vpop.f32.mrb[21].mxu0  ;;  %v1173_v7 = vrot.slane %v1115_v16, %v11630_v9  ;;  %v1177_v32 = vrot.slane %v1115_v16, %v11636_v50  ;;  %v1157_v51 = vrot.slane %v1114_v63, %v11570_v44 }
 0x1c0   :  { %v1181_v11 = vrot.slane %v1116_v56, %v11570_v44  ;;  %v1185_v48 = vrot.slane %v1116_v56, %v11630_v9  ;;  %v11730_v12 = vpop.f32.mrb[22].mxu0  ;;  %v1189_v19 = vrot.slane %v1116_v56, %v11636_v50  ;;  %v1193_v22 = vrot.slane %v1117_v57, %v11570_v44 }
 0x1c1   :  { %v11736_v25 = vpop.f32.mrb[23].mxu0  ;;  %v1165_v26 = vrot.slane %v1114_v63, %v11636_v50  ;;  %v1197_v29 = vrot.slane %v1117_v57, %v11630_v9  ;;  %v1397_v58 = vpack.c.bf16 %v1169_v3, %v1169_v3  ;;  %v1161_v55 = vrot.slane %v1114_v63, %v11630_v9 }
 0x1c2   :  { %v1201_v59 = vrot.slane %v1117_v57, %v11636_v50  ;;  %v1399_v33 = vpack.c.bf16 %v1177_v32, %v1177_v32  ;;  %v1400_v4 = vpack.c.bf16 %v1181_v11, %v1181_v11  ;;  %v1398_v36 = vpack.c.bf16 %v1173_v7, %v1173_v7 }
 0x1c3   :  { %v1401_v16 = vpack.c.bf16 %v1185_v48, %v1185_v48  ;;  %v1402_v56 = vpack.c.bf16 %v1189_v19, %v1189_v19  ;;  %v1394_v0 = vpack.c.bf16 %v1157_v51, %v1157_v51  ;;  %v1403_v27 = vpack.c.bf16 %v1193_v22, %v1193_v22 }
 0x1c4   :  { %v1721_v49 = vunpack.c.l.b16 %v1397_v58  ;;  %v11744_v62 = vunpack.c.l.b16 %v1400_v4  ;;  %v1396_v39 = vpack.c.bf16 %v1165_v26, %v1165_v26  ;;  %v1404_v3 = vpack.c.bf16 %v1197_v29, %v1197_v29 }
 0x1c5   :  { %v1723_v46 = vunpack.c.l.b16 %v1399_v33  ;;  %v11746_v21 = vunpack.c.l.b16 %v1402_v56  ;;  %v1395_v63 = vpack.c.bf16 %v1161_v55, %v1161_v55  ;;  %v1405_v52 = vpack.c.bf16 %v1201_v59, %v1201_v59 }
 0x1c6   :  { %12853 = vst [vmem:[#allocation31_spill] sm:$0xff] %v11744_v62  ;;  %v1769_v57 = vrot.slane %v11744_v62, 7  ;;  %v8948_v7 = vrot.slane %v11708_v17, 9  ;;  %v11750_v32 = vunpack.c.l.b16 %v1398_v36  ;;  %v11752_v11 = vunpack.c.l.b16 %v1401_v16 }
 0x1c7   :  { %12854 = vst [vmem:[#allocation32_spill] sm:$0xff] %v11746_v21  ;;  %v1804_v48 = vrot.slane %v11746_v21, 7  ;;  %v8949_v51 = vrot.slane %v11710_v37, 9  ;;  %v11756_v19 = vunpack.c.l.b16 %v1403_v27  ;;  %v2524_v26 = vunpack.c.l.b16 %v1394_v0 }
 0x1c8   :  { %v1771_v22 = vsel %vm1770_vm2, %v1769_v57, %v1721_v49  ;;  %v2530_v29 = vrot.slane %v1721_v49, 7  ;;  %v11759_v58 = vunpack.c.l.b16 %v1404_v3  ;;  %v2526_v59 = vunpack.c.l.b16 %v1396_v39 }
 0x1c9   :  { %12855 = vst [vmem:[#allocation33_spill] sm:$0xff] %v11756_v19  ;;  %v11762_v55 = vsel %vm1770_vm2, %v1804_v48, %v1723_v46  ;;  %v2558_v33 = vrot.slane %v1723_v46, 7  ;;  %v11764_v4 = vunpack.c.l.b16 %v1405_v52  ;;  %v11766_v36 = vunpack.c.l.b16 %v1395_v63 }
 0x1ca   :  { %12856 = vst [vmem:[#allocation34_spill] sm:$0xff] %v11759_v58  ;;  %v11769_v16 = vsel %vm1770_vm2, %v2530_v29, %v2524_v26  ;;  %v1118_v27 = vmax.f32 %v11704_v1, %v8946_v14  ;;  %v1119_v49 = vmax.f32 %v11706_v34, %v8947_v35  ;;  %v1120_v0 = vmax.f32 %v11708_v17, %v8948_v7 }
 0x1cb   :  { %12857 = vst [vmem:[#allocation35_spill] sm:$0xff] %v11764_v4  ;;  %12858 = vst [vmem:[#allocation36_spill] sm:$0xff] %v11769_v16  ;;  %v11773_v56 = vsel %vm1770_vm2, %v2558_v33, %v2526_v59  ;;  %v1121_v3 = vmax.f32 %v11710_v37, %v8949_v51  ;;  %v1772_v39 = vrot.slane %v11756_v19, 6  ;;  %v3419_v34 = vrot.slane %v11756_v19, 7 }
 0x1cc   :  { %12859 = vst [vmem:[#allocation37_spill] sm:$0xff] %v11773_v56  ;;  %v1205_v46 = vrot.slane %v1118_v27, %v11570_v44  ;;  %v1209_v63 = vrot.slane %v1118_v27, %v11630_v9  ;;  %v1213_v14 = vrot.slane %v1118_v27, %v11636_v50  ;;  %v1217_v35 = vrot.slane %v1119_v49, %v11570_v44 }
 0x1cd   :  { %v3447_v17 = vrot.slane %v11764_v4, 7  ;;  %v1221_v37 = vrot.slane %v1119_v49, %v11630_v9  ;;  %v11790_v7 = vrot.slane %v1119_v49, %v11636_v50  ;;  %v11793_v48 = vrot.slane %v1120_v0, %v11570_v44 }
 0x1ce   :  { %v11796_v51 = vrot.slane %v1120_v0, %v11630_v9  ;;  %v11799_v26 = vrot.slane %v1120_v0, %v11636_v50  ;;  %v11802_v29 = vrot.slane %v1121_v3, %v11570_v44  ;;  %v11805_v59 = vrot.slane %v1121_v3, %v11630_v9 }
 0x1cf   :  { %v11808_v33 = vrot.slane %v1121_v3, %v11636_v50  ;;  %v1406_v27 = vpack.c.bf16 %v1205_v46, %v1205_v46  ;;  %v1407_v49 = vpack.c.bf16 %v1209_v63, %v1209_v63  ;;  %v11811_v57 = vsel %vm1773_vm3, %v1772_v39, %v1771_v22 }
 0x1d0   :  { %v1408_v52 = vpack.c.bf16 %v1213_v14, %v1213_v14  ;;  %v1409_v24 = vpack.c.bf16 %v1217_v35, %v1217_v35  ;;  %v11816_v0 = vsel %vm1770_vm2, %v3419_v34, %v11744_v62  ;;  %v11820_v38 = vsel %vm1770_vm2, %v3447_v17, %v11746_v21 }
 0x1d1   :  { %12860 = vst [vmem:[#allocation38_spill] sm:$0xff] %v11816_v0  ;;  %12861 = vst [vmem:[#allocation39_spill] sm:$0xff] %v11820_v38  ;;  %v1410_v47 = vpack.c.bf16 %v1221_v37, %v1221_v37  ;;  %v1411_v3 = vpack.c.bf16 %v11790_v7, %v11790_v7  ;;  %v1412_v22 = vpack.c.bf16 %v11793_v48, %v11793_v48  ;;  %v11836_v34 = vunpack.c.l.b16 %v1406_v27 }
 0x1d2   :  { %v1413_v39 = vpack.c.bf16 %v11796_v51, %v11796_v51  ;;  %v1414_v46 = vpack.c.bf16 %v11799_v26, %v11799_v26  ;;  %v11838_v17 = vunpack.c.l.b16 %v1407_v49  ;;  %v11840_v37 = vunpack.c.l.b16 %v1408_v52 }
 0x1d3   :  { %12862 = vst [vmem:[#allocation40_spill] sm:$0xff] %v11836_v34  ;;  %v11842_v7 = vunpack.c.l.b16 %v1409_v24  ;;  %v12865_v48 = vmax.f32 %v11714_v40, 0.0  ;;  %v12866_v51 = vmax.f32 %v11659_v31, 0.0  ;;  %v720_v1 = vadd.f32 %v11687_v53, %v11648_v20 }
 0x1d4   :  { %12863 = vst [vmem:[#allocation41_spill] sm:$0xff] %v11838_v17  ;;  %12864 = vst [vmem:[#allocation42_spill] sm:$0xff] %v11840_v37  ;;  %v722_v14 = vadd.f32 %v11694_v23, %v11645_v18  ;;  %v724_v27 = vadd.f32 %v11698_v30, %v11648_v20  ;;  %v728_v52 = vadd.f32 %v11718_v61, %v11645_v18  ;;  %v11862_v63 = vunpack.c.l.b16 %v1410_v47 }
 0x1d5   :  { %v779_v26 = vmax.f32 %v12866_v51, %v12865_v48  ;;  %v730_v24 = vadd.f32 %v11724_v5, %v11648_v20  ;;  %v753_v49 = vmax.f32 %v720_v1, 0.0  ;;  %v732_v53 = vadd.f32 %v11730_v12, %v11645_v18 }
 0x1d6   :  { %v758_v48 = vmax.f32 %v722_v14, 0.0  ;;  %v759_v51 = vmax.f32 %v724_v27, 0.0  ;;  %v764_v23 = vmax.f32 %v728_v52, 0.0  ;;  %v12867_v61 = vmax.f32 %v11655_v28, 0.0 }
 0x1d7   :  { %v878_v40 = vcombine.low %v11611_v42, %v779_v26  ;;  %v879_v31 = vcombine.high %v11611_v42, %v779_v26  ;;  %v765_v35 = vmax.f32 %v730_v24, 0.0  ;;  %v770_v5 = vmax.f32 %v732_v53, 0.0 }
 0x1d8   :  { %v780_v10 = vmax.f32 %v12867_v61, %v753_v49  ;;  %v12868_v38 = vmax.f32 %v11673_v54, 0.0  ;;  %v12869_v42 = vmax.f32 %v11669_v43, 0.0  ;;  %v12870_v18 = vmax.f32 %v11680_v2, 0.0 }
 0x1d9   :  { %v887_v30 = vrot.slane %v878_v40, %v11662_v41  ;;  %v12871_v14 = vmax.f32 %v11675_v60, 0.0  ;;  %v894_v26 = vrot.slane %v879_v31, %v11662_v41  ;;  %v12872_v52 = vmax.f32 %v11701_v15, 0.0 }
 0x1da   :  { %v782_v0 = vmax.f32 %v12868_v38, %v758_v48  ;;  %v783_v1 = vmax.f32 %v12869_v42, %v759_v51  ;;  %v11873_v12 = vmax.f32 %v12870_v18, %v764_v23  ;;  %v880_v27 = vcombine.high %v780_v10, %v780_v10 }
 0x1db   :  { %v11877_v47 = vmax.f32 %v12871_v14, %v765_v35  ;;  %v901_v28 = vrot.slane %v780_v10, %v11662_v41  ;;  %v11883_v54 = vmax.f32 %v12872_v52, %v770_v5  ;;  %v11896_v42 = vunpack.c.l.b16 %v1411_v3 }
 0x1dc   :  { %v913_v38 = vcombine.low %v11613_v45, %v782_v0  ;;  %v914_v43 = vcombine.high %v11613_v45, %v782_v0  ;;  %v915_v2 = vcombine.high %v783_v1, %v783_v1  ;;  %v936_v24 = vrot.slane %v783_v1, %v11662_v41 }
 0x1dd   :  { %v908_v60 = vrot.slane %v880_v27, %v11662_v41  ;;  %v909_v35 = vcombine.low %v887_v30, %v901_v28  ;;  %v910_v40 = vcombine.high %v887_v30, %v901_v28  ;;  %v11898_v27 = vunpack.c.l.b16 %v1412_v22 }
 0x1de   :  { %v922_v10 = vrot.slane %v913_v38, %v11662_v41  ;;  %v929_v15 = vrot.slane %v914_v43, %v11662_v41  ;;  %v943_v49 = vrot.slane %v915_v2, %v11662_v41  ;;  %v11900_v43 = vunpack.c.l.b16 %v1413_v39 }
 0x1df   :  { %v911_v45 = vcombine.low %v894_v26, %v908_v60  ;;  %v912_v0 = vcombine.high %v894_v26, %v908_v60  ;;  %v8950_v48 = vrot.slane %v909_v35, 9  ;;  %v8951_v51 = vrot.slane %v910_v40, 9 }
 0x1e0   :  { %v944_v23 = vcombine.low %v922_v10, %v936_v24  ;;  %v945_v61 = vcombine.high %v922_v10, %v936_v24  ;;  %v946_v5 = vcombine.low %v929_v15, %v943_v49  ;;  %v947_v30 = vcombine.high %v929_v15, %v943_v49 }
 0x1e1   :  { %v8952_v1 = vrot.slane %v911_v45, 9  ;;  %v1122_v18 = vmax.f32 %v909_v35, %v8950_v48  ;;  %v1123_v14 = vmax.f32 %v910_v40, %v8951_v51  ;;  %v8953_v28 = vrot.slane %v912_v0, 9 }
 0x1e2   :  { %v8954_v52 = vrot.slane %v944_v23, 9  ;;  %v8955_v38 = vrot.slane %v945_v61, 9  ;;  %v11902_v2 = vunpack.c.l.b16 %v1414_v46  ;;  %v12874_v3 = vpack.c.bf16 %v11802_v29, %v11802_v29 }
 0x1e3   :  { %v1543_v26 = vrot.slane %v1122_v18, %v11570_v44  ;;  %v1547_v24 = vrot.slane %v1122_v18, %v11630_v9  ;;  %v11911_v35 = vmax.f32 %v911_v45, %v8952_v1  ;;  %v1551_v22 = vrot.slane %v1122_v18, %v11636_v50 }
 0x1e4   :  { %12873 = vst [vmem:[#allocation43_spill] sm:$0xff] %v11902_v2  ;;  %v11909_v60 = vunpack.c.l.b16 %v12874_v3  ;;  %v8956_v40 = vrot.slane %v946_v5, 9  ;;  %v3277_v10 = vrot.slane %v1123_v14, %v11570_v44  ;;  %v11916_v39 = vrot.slane %v1123_v14, %v11630_v9 }
 0x1e5   :  { %12875 = vst [vmem:[#allocation44_spill] sm:$0xff] %v11911_v35  ;;  %v3285_v46 = vrot.slane %v1123_v14, %v11636_v50  ;;  %v8957_v15 = vrot.slane %v947_v30, 9  ;;  %v12877_v49 = vpack.c.bf16 %v11805_v59, %v11805_v59  ;;  %v12878_v29 = vpack.c.bf16 %v11808_v33, %v11808_v33 }
 0x1e6   :  { %12876 = vst [vmem:[#allocation45_spill] sm:$0xff] %v11916_v39  ;;  %v11929_v51 = vmax.f32 %v912_v0, %v8953_v28  ;;  %v11933_v1 = vadd.f32 %v11736_v25, %v11648_v20  ;;  %v1570_v18 = vpack.c.bf16 %v1543_v26, %v1543_v26  ;;  %v1571_v3 = vpack.c.bf16 %v1547_v24, %v1547_v24 }
 0x1e7   :  { %v11922_v48 = vunpack.c.l.b16 %v12877_v49  ;;  %v11927_v45 = vunpack.c.l.b16 %v12878_v29  ;;  %v1126_v14 = vmax.f32 %v944_v23, %v8954_v52  ;;  %v1127_v53 = vmax.f32 %v945_v61, %v8955_v38 }
 0x1e8   :  { %12880 = vst [vmem:[#allocation47_spill] sm:$0xff] %v11929_v51  ;;  %v1572_v31 = vpack.c.bf16 %v1551_v22, %v1551_v22  ;;  %v11937_v59 = vrot.slane %v11911_v35, %v11570_v44  ;;  %v11941_v33 = vrot.slane %v11911_v35, %v11636_v50  ;;  %v1128_v49 = vmax.f32 %v946_v5, %v8956_v40 }
 0x1e9   :  { %12879 = vst [vmem:[#allocation46_spill] sm:$0xff] %v11927_v45  ;;  %v3304_v0 = vpack.c.bf16 %v3277_v10, %v3277_v10  ;;  %v3306_v20 = vpack.c.bf16 %v3285_v46, %v3285_v46  ;;  %v1129_v25 = vmax.f32 %v947_v30, %v8957_v15  ;;  %v1253_v26 = vrot.slane %v1126_v14, %v11570_v44 }
 0x1ea   :  { %12881 = vst [vmem:[#allocation48_spill] sm:$0xff] %v11937_v59  ;;  %12882 = vst [vmem:[#allocation49_spill] sm:$0xff] %v11941_v33  ;;  %v1265_v23 = vrot.slane %v1127_v53, %v11570_v44  ;;  %v1273_v61 = vrot.slane %v1127_v53, %v11636_v50  ;;  %v1277_v52 = vrot.slane %v1128_v49, %v11570_v44  ;;  %v11953_v40 = vunpack.c.l.b16 %v1570_v18 }
 0x1eb   :  { %v1269_v38 = vrot.slane %v1127_v53, %v11630_v9  ;;  %v1281_v24 = vrot.slane %v1128_v49, %v11630_v9  ;;  %v1285_v5 = vrot.slane %v1128_v49, %v11636_v50  ;;  %v1289_v22 = vrot.slane %v1129_v25, %v11570_v44 }
 0x1ec   :  { %v11955_v10 = vunpack.c.l.b16 %v1571_v3  ;;  %v11957_v30 = vunpack.c.l.b16 %v1572_v31  ;;  %v1261_v46 = vrot.slane %v1126_v14, %v11636_v50  ;;  %v1257_v15 = vrot.slane %v1126_v14, %v11630_v9 }
 0x1ed   :  { %v1421_v29 = vpack.c.bf16 %v1265_v23, %v1265_v23  ;;  %v1423_v28 = vpack.c.bf16 %v1273_v61, %v1273_v61  ;;  %v1424_v51 = vpack.c.bf16 %v1277_v52, %v1277_v52  ;;  %v1293_v53 = vrot.slane %v1129_v25, %v11630_v9 }
 0x1ee   :  { %12883 = vst [vmem:[#allocation50_spill] sm:$0xff] %v11957_v30  ;;  %v1425_v33 = vpack.c.bf16 %v1281_v24, %v1281_v24  ;;  %v1426_v59 = vpack.c.bf16 %v1285_v5, %v1285_v5  ;;  %v1427_v49 = vpack.c.bf16 %v1289_v22, %v1289_v22  ;;  %v1297_v35 = vrot.slane %v1129_v25, %v11636_v50 }
 0x1ef   :  { %v1418_v18 = vpack.c.bf16 %v1253_v26, %v1253_v26  ;;  %v1422_v39 = vpack.c.bf16 %v1269_v38, %v1269_v38  ;;  %v1745_v3 = vunpack.c.l.b16 %v1421_v29  ;;  %v1420_v21 = vpack.c.bf16 %v1261_v46, %v1261_v46 }
 0x1f0   :  { %v1747_v31 = vunpack.c.l.b16 %v1423_v28  ;;  %v11963_v56 = vunpack.c.l.b16 %v1424_v51  ;;  %v11965_v19 = vunpack.c.l.b16 %v1426_v59  ;;  %v11967_v14 = vunpack.c.l.b16 %v3304_v0 }
 0x1f1   :  { %v11969_v23 = vunpack.c.l.b16 %v3306_v20  ;;  %v11971_v61 = vunpack.c.l.b16 %v1425_v33  ;;  %v11973_v52 = vunpack.c.l.b16 %v1427_v49  ;;  %v1419_v24 = vpack.c.bf16 %v1257_v15, %v1257_v15 }
 0x1f2   :  { %12884 = vst [vmem:[#allocation51_spill] sm:$0xff] %v11963_v56  ;;  %12885 = vst [vmem:[#allocation52_spill] sm:$0xff] %v11965_v19  ;;  %v1428_v5 = vpack.c.bf16 %v1293_v53, %v1293_v53  ;;  %v1818_v25 = vrot.slane %v11963_v56, 7  ;;  %v1846_v26 = vrot.slane %v11965_v19, 7  ;;  %v1429_v38 = vpack.c.bf16 %v1297_v35, %v1297_v35 }
 0x1f3   :  { %12886 = vst [vmem:[#allocation53_spill] sm:$0xff] %v11967_v14  ;;  %12887 = vst [vmem:[#allocation54_spill] sm:$0xff] %v11969_v23  ;;  %v11977_v28 = vunpack.c.l.b16 %v1422_v39  ;;  %v2527_v51 = vunpack.c.l.b16 %v1418_v18  ;;  %v2572_v59 = vrot.slane %v1745_v3, 7  ;;  %v2529_v33 = vunpack.c.l.b16 %v1420_v21 }
 0x1f4   :  { %12888 = vst [vmem:[#allocation55_spill] sm:$0xff] %v11973_v52  ;;  %v1819_v0 = vsel %vm1770_vm2, %v1818_v25, %v1745_v3  ;;  %v11981_v20 = vsel %vm1770_vm2, %v1846_v26, %v1747_v31  ;;  %v2600_v22 = vrot.slane %v1747_v31, 7  ;;  %v1820_v46 = vrot.slane %v11973_v52, 6 }
 0x1f5   :  { %v11986_v29 = vsel %vm1770_vm2, %v2572_v59, %v2527_v51  ;;  %v12891_v53 = vcombine.low %v11625_v6, %v11873_v12  ;;  %v12892_v21 = vcombine.high %v11625_v6, %v11873_v12  ;;  %v950_v3 = vcombine.high %v11877_v47, %v11877_v47 }
 0x1f6   :  { %12889 = vst [vmem:[#allocation56_spill] sm:$0xff] %v11986_v29  ;;  %v11990_v39 = vsel %vm1770_vm2, %v2600_v22, %v2529_v33  ;;  %v12002_v31 = vunpack.c.l.b16 %v1428_v5  ;;  %v12004_v25 = vunpack.c.l.b16 %v1429_v38  ;;  %v971_v26 = vrot.slane %v11877_v47, %v11662_v41 }
 0x1f7   :  { %12890 = vst [vmem:[#allocation57_spill] sm:$0xff] %v11990_v39  ;;  %v957_v49 = vrot.slane %v12891_v53, %v11662_v41  ;;  %v964_v18 = vrot.slane %v12892_v21, %v11662_v41  ;;  %v983_v51 = vcombine.low %v11627_v8, %v11883_v54  ;;  %v978_v33 = vrot.slane %v950_v3, %v11662_v41 }
 0x1f8   :  { %12893 = vst [vmem:[#allocation58_spill] sm:$0xff] %v12004_v25  ;;  %v984_v6 = vcombine.high %v11627_v8, %v11883_v54  ;;  %v771_v12 = vmax.f32 %v11933_v1, 0.0  ;;  %v3461_v38 = vrot.slane %v11973_v52, 7  ;;  %v12894_v59 = vmax.f32 %v11690_v13, 0.0 }
 0x1f9   :  { %v979_v22 = vcombine.low %v957_v49, %v971_v26  ;;  %v980_v53 = vcombine.high %v957_v49, %v971_v26  ;;  %v981_v47 = vcombine.low %v964_v18, %v978_v33  ;;  %v982_v21 = vcombine.high %v964_v18, %v978_v33 }
 0x1fa   :  { %v992_v35 = vrot.slane %v983_v51, %v11662_v41  ;;  %v789_v15 = vmax.f32 %v12894_v59, %v771_v12  ;;  %v3489_v3 = vrot.slane %v12004_v25, 7  ;;  %v1792_v54 = vrot.slane %v11759_v58, 6 }
 0x1fb   :  { %v8958_v23 = vrot.slane %v979_v22, 9  ;;  %v8959_v8 = vrot.slane %v980_v53, 9  ;;  %v12022_v1 = vunpack.c.l.b16 %v1419_v24  ;;  %v8960_v5 = vrot.slane %v981_v47, 9 }
 0x1fc   :  { %v8961_v14 = vrot.slane %v982_v21, 9  ;;  %v1006_v49 = vrot.slane %v789_v15, %v11662_v41  ;;  %v12026_v26 = vsel %vm1773_vm3, %v1820_v46, %v1819_v0  ;;  %v12896_v13 = vrot.slane %v11752_v11, 7 }
 0x1fd   :  { %12895 = vst [vmem:[#allocation59_spill] sm:$0xff] %v12022_v1  ;;  %v1130_v18 = vmax.f32 %v979_v22, %v8958_v23  ;;  %v1131_v51 = vmax.f32 %v980_v53, %v8959_v8  ;;  %v12034_v33 = vsel %vm1770_vm2, %v3461_v38, %v11963_v56  ;;  %v1132_v24 = vmax.f32 %v981_v47, %v8960_v5 }
 0x1fe   :  { %v1791_v59 = vsel %vm1770_vm2, %v12896_v13, %v11750_v32  ;;  %12897 = vst [vmem:[#allocation60_spill] sm:$0xff] %v12034_v33  ;;  %v1133_v12 = vmax.f32 %v982_v21, %v8961_v14  ;;  %v1014_v39 = vcombine.low %v992_v35, %v1006_v49  ;;  %v12042_v22 = vsel %vm1770_vm2, %v3489_v3, %v11965_v19 }
 0x1ff   :  { %v1301_v52 = vrot.slane %v1130_v18, %v11570_v44  ;;  %v1305_v0 = vrot.slane %v1130_v18, %v11630_v9  ;;  %v1309_v23 = vrot.slane %v1130_v18, %v11636_v50  ;;  %v1313_v46 = vrot.slane %v1131_v51, %v11570_v44  ;;  %12898 = vst [vmem:[#allocation61_spill] sm:$0xff] %v12042_v22 }
 0x200   :  { %v985_v53 = vcombine.high %v789_v15, %v789_v15  ;;  %v1793_v38 = vsel %vm1773_vm3, %v1792_v54, %v1791_v59  ;;  %v1794_v5 = vrot.slane %v11838_v17, 5  ;;  %v1317_v14 = vrot.slane %v1131_v51, %v11630_v9 }
 0x201   :  { %v1321_v47 = vrot.slane %v1131_v51, %v11636_v50  ;;  %v1325_v21 = vrot.slane %v1132_v24, %v11570_v44  ;;  %v1329_v8 = vrot.slane %v1132_v24, %v11630_v9  ;;  %v1333_v18 = vrot.slane %v1132_v24, %v11636_v50 }
 0x202   :  { %v1337_v13 = vrot.slane %v1133_v12, %v11570_v44  ;;  %v1341_v3 = vrot.slane %v1133_v12, %v11630_v9  ;;  %v1345_v15 = vrot.slane %v1133_v12, %v11636_v50  ;;  %v1430_v54 = vpack.c.bf16 %v1301_v52, %v1301_v52 }
 0x203   :  { %v1431_v59 = vpack.c.bf16 %v1305_v0, %v1305_v0  ;;  %v1432_v22 = vpack.c.bf16 %v1309_v23, %v1309_v23  ;;  %v1433_v33 = vpack.c.bf16 %v1313_v46, %v1313_v46  ;;  %v999_v19 = vrot.slane %v984_v6, %v11662_v41 }
 0x204   :  { %v1013_v51 = vrot.slane %v985_v53, %v11662_v41  ;;  %v1795_v56 = vsel %vm1776_vm4, %v1794_v5, %v1793_v38  ;;  %v1796_v29 = vrot.slane %v11862_v63, 4  ;;  %v1434_v62 = vpack.c.bf16 %v1317_v14, %v1317_v14 }
 0x205   :  { %v1435_v24 = vpack.c.bf16 %v1321_v47, %v1321_v47  ;;  %v1436_v16 = vpack.c.bf16 %v1325_v21, %v1325_v21  ;;  %v1437_v1 = vpack.c.bf16 %v1329_v8, %v1329_v8  ;;  %v1438_v17 = vpack.c.bf16 %v1333_v18, %v1333_v18 }
 0x206   :  { %v1439_v58 = vpack.c.bf16 %v1337_v13, %v1337_v13  ;;  %v1440_v12 = vpack.c.bf16 %v1341_v3, %v1341_v3  ;;  %v1441_v52 = vpack.c.bf16 %v1345_v15, %v1345_v15  ;;  %v12058_v0 = vunpack.c.l.b16 %v1430_v54 }
 0x207   :  { %v12060_v23 = vunpack.c.l.b16 %v1431_v59  ;;  %v12062_v6 = vunpack.c.l.b16 %v1432_v22  ;;  %v12064_v46 = vunpack.c.l.b16 %v1433_v33  ;;  %v1015_v53 = vcombine.high %v992_v35, %v1006_v49 }
 0x208   :  { %v1016_v38 = vcombine.low %v999_v19, %v1013_v51  ;;  %v1017_v5 = vcombine.high %v999_v19, %v1013_v51  ;;  %v8962_v14 = vrot.slane %v1014_v39, 9  ;;  %v12066_v47 = vunpack.c.l.b16 %v1434_v62 }
 0x209   :  { %12899 = vst [vmem:[#allocation62_spill] sm:$0xff] %v12062_v6  ;;  %v12068_v21 = vunpack.c.l.b16 %v1435_v24  ;;  %v12070_v8 = vunpack.c.l.b16 %v1436_v16  ;;  %v1797_v18 = vsel %vm1779_vm5, %v1796_v29, %v1795_v56  ;;  %v12073_v13 = vunpack.c.l.b16 %v1437_v1 }
 0x20a   :  { %v8963_v3 = vrot.slane %v1015_v53, 9  ;;  %v1134_v15 = vmax.f32 %v1014_v39, %v8962_v14  ;;  %v1798_v33 = vrot.slane %v11900_v43, 3  ;;  %v12076_v22 = vunpack.c.l.b16 %v1438_v17 }
 0x20b   :  { %12900 = vst [vmem:[#allocation63_spill] sm:$0xff] %v12068_v21  ;;  %v12078_v35 = vunpack.c.l.b16 %v1439_v58  ;;  %v8964_v19 = vrot.slane %v1016_v38, 9  ;;  %v8965_v62 = vrot.slane %v1017_v5, 9  ;;  %v1834_v56 = vrot.slane %v12002_v31, 6 }
 0x20c   :  { %v12080_v49 = vmax.f32 %v1015_v53, %v8963_v3  ;;  %v1555_v16 = vrot.slane %v1134_v15, %v11570_v44  ;;  %v1799_v54 = vsel %vm1782_vm6, %v1798_v33, %v1797_v18  ;;  %v1559_v29 = vrot.slane %v1134_v15, %v11630_v9 }
 0x20d   :  { %v1563_v39 = vrot.slane %v1134_v15, %v11636_v50  ;;  %v12901_v17 = vrot.slane %v11971_v61, 7  ;;  %v1836_v1 = vrot.slane %v12060_v23, 5  ;;  %v12092_v59 = vunpack.c.l.b16 %v1440_v12 }
 0x20e   :  { %v1573_v51 = vpack.c.bf16 %v1555_v16, %v1555_v16  ;;  %v12096_v24 = vrot.slane %v12080_v49, %v11630_v9  ;;  %v1800_v53 = vrot.slane %v11922_v48, 2  ;;  %v12099_v14 = vunpack.c.l.b16 %v1441_v52 }
 0x20f   :  { %v1833_v58 = vsel %vm1770_vm2, %v12901_v17, %v11977_v28  ;;  %v1574_v18 = vpack.c.bf16 %v1559_v29, %v1559_v29  ;;  %v1575_v3 = vpack.c.bf16 %v1563_v39, %v1563_v39  ;;  %v1802_v15 = vrot.slane %v11955_v10, 1 }
 0x210   :  { %v12102_v33 = vmax.f32 %v1016_v38, %v8964_v19  ;;  %v12104_v17 = vmax.f32 %v1017_v5, %v8965_v62  ;;  %v1801_v12 = vsel %vm1785_vm7, %v1800_v53, %v1799_v54  ;;  %v1835_v16 = vsel %vm1773_vm3, %v1834_v56, %v1833_v58 }
 0x211   :  { %v12108_v41 = vunpack.c.l.b16 %v1573_v51  ;;  %v12110_v9 = vunpack.c.l.b16 %v1574_v18  ;;  %v12114_v52 = vrot.slane %v12080_v49, %v11570_v44  ;;  %v1837_v29 = vsel %vm1776_vm4, %v1836_v1, %v1835_v16 }
 0x212   :  { %12902 = vst [vmem:[#allocation64_spill] sm:$0xff] %v12102_v33  ;;  %12903 = vst [vmem:[#allocation65_spill] sm:$0xff] %v12104_v17  ;;  %v12117_v39 = vunpack.c.l.b16 %v1575_v3  ;;  %v1838_v5 = vrot.slane %v12066_v47, 4  ;;  %v1840_v19 = vrot.slane %v12073_v13, 3  ;;  %v1803_v62 = vsel %vm1788_vm8, %v1802_v15, %v1801_v12 }
 0x213   :  { %12904 = vst [vmem:[#allocation66_spill] sm:$0xff] %v12108_v41  ;;  %v1842_v54 = vrot.slane %v12092_v59, 2  ;;  %v1844_v56 = vrot.slane %v12110_v9, 1  ;;  %v1775_v58 = vrot.slane %v11836_v34, 5  ;;  %v1778_v1 = vrot.slane %v11842_v7, 4 }
 0x214   :  { %12905 = vst [vmem:[#allocation67_spill] sm:$0xff] %v12117_v39  ;;  %v1839_v51 = vsel %vm1779_vm5, %v1838_v5, %v1837_v29  ;;  %v1781_v53 = vrot.slane %v11898_v27, 3  ;;  %v1784_v18 = vrot.slane %v11909_v60, 2  ;;  %v1822_v15 = vrot.slane %v12058_v0, 5 }
 0x215   :  { %v1841_v3 = vsel %vm1782_vm6, %v1840_v19, %v1839_v51  ;;  %v1777_v16 = vsel %vm1776_vm4, %v1775_v58, %v11811_v57  ;;  %v1824_v12 = vrot.slane %v12064_v46, 4  ;;  %v1787_v29 = vrot.slane %v11953_v40, 1 }
 0x216   :  { %v1843_v38 = vsel %vm1785_vm7, %v1842_v54, %v1841_v3  ;;  %v1780_v17 = vsel %vm1779_vm5, %v1778_v1, %v1777_v16  ;;  %v1826_v5 = vrot.slane %v12070_v8, 3  ;;  %v1823_v19 = vsel %vm1776_vm4, %v1822_v15, %v12026_v26 }
 0x217   :  { %v1845_v44 = vsel %vm1788_vm8, %v1844_v56, %v1843_v38  ;;  %v1783_v33 = vsel %vm1782_vm6, %v1781_v53, %v1780_v17  ;;  %v1828_v57 = vrot.slane %v12078_v35, 2  ;;  %v1825_v54 = vsel %vm1779_vm5, %v1824_v12, %v1823_v19  ;;  %v10107_v56 = vld [vmem:[#allocation8 + $0x508] ss:$16 sps:$4 sm:$0xff]   ;;  %v10112_v19 = vld [vmem:[#allocation8 + $0x524] ss:$16 sps:$4 sm:$0xff]  }
 0x218   :  { %v1861_v58 = vpack.c.b16 %v1845_v44, %v1803_v62  ;;  %v1786_v51 = vsel %vm1785_vm7, %v1784_v18, %v1783_v33  ;;  %v1830_v1 = vrot.slane %v12108_v41, 1  ;;  %v1827_v3 = vsel %vm1782_vm6, %v1826_v5, %v1825_v54  ;;  %v10104_v62 = vld [vmem:[#allocation8 + $0x500] ss:$16 sps:$4 sm:$0xff]  }
 0x219   :  { %v1806_v16 = vrot.slane %v11764_v4, 6  ;;  %v1808_v38 = vrot.slane %v11840_v37, 5  ;;  %v1789_v17 = vsel %vm1788_vm8, %v1787_v29, %v1786_v51  ;;  %v1829_v26 = vsel %vm1785_vm7, %v1828_v57, %v1827_v3  ;;  %v10115_v29 = vld [vmem:[#allocation8 + $0x52c] ss:$16 sps:$4 sm:$0xff]   ;;  %v10128_v41 = vld [vmem:[#allocation8 + $0x580] ss:$16 sps:$4 sm:$0xff]  }
 0x21a   :  { %2378 = vmatprep.mubr.bf16.mxu1 %v1861_v58  ;;  %2464 = vmatprep.mubr.bf16.mxu0 %v1861_v58  ;;  %v1810_v44 = vrot.slane %v11896_v42, 4  ;;  %v1812_v33 = vrot.slane %v11902_v2, 3  ;;  %v1831_v53 = vsel %vm1788_vm8, %v1830_v1, %v1829_v26  ;;  %v1816_v15 = vrot.slane %v11957_v30, 1 }
 0x21b   :  { %v1807_v18 = vsel %vm1773_vm3, %v1806_v16, %v11762_v55  ;;  %v1848_v12 = vrot.slane %v12004_v25, 6  ;;  %v1860_v5 = vpack.c.b16 %v1831_v53, %v1789_v17  ;;  %v1850_v58 = vrot.slane %v12062_v6, 5  ;;  %v10110_v53 = vld [vmem:[#allocation8 + $0x520] ss:$16 sps:$4 sm:$0xff]  }
 0x21c   :  { %v1809_v57 = vsel %vm1776_vm4, %v1808_v38, %v1807_v18  ;;  %v1852_v51 = vrot.slane %v12068_v21, 4  ;;  %v1814_v1 = vrot.slane %v11927_v45, 2  ;;  %v1854_v3 = vrot.slane %v12076_v22, 3  ;;  %v10113_v18 = vld [vmem:[#allocation8 + $0x528] ss:$16 sps:$4 sm:$0xff]  }
 0x21d   :  { %v1811_v54 = vsel %vm1779_vm5, %v1810_v44, %v1809_v57  ;;  %v1849_v55 = vsel %vm1773_vm3, %v1848_v12, %v11981_v20  ;;  %2379 = vmatmul.mubr.bf16.vlgmr.msra.gmra.mrb[12].mxu1 %v1860_v5  ;;  %2465 = vmatmul.mubr.bf16.vlgmr.msra.gmra.mrb[24].mxu0 %v1860_v5  ;;  %v1856_v38 = vrot.slane %v12099_v14, 2  ;;  %v12906_v26 = vrot.slane %v11750_v32, 7 }
 0x21e   :  { %v1813_v16 = vsel %vm1782_vm6, %v1812_v33, %v1811_v54  ;;  %v1851_v17 = vsel %vm1776_vm4, %v1850_v58, %v1849_v55  ;;  %2390 = vmatpush1.bf16.msra.mxu1 %v10104_v62  ;;  %2476 = vmatpush1.bf16.msra.mxu0 %v10107_v56  ;;  %v2546_v5 = vrot.slane %v11752_v11, 6  ;;  %v12907_v33 = vld [vmem:[#allocation34_spill] sm:$0xff]  ;;  %v10118_v58 = vld [vmem:[#allocation8 + $0x544] ss:$16 sps:$4 sm:$0xff]   ;;  %v1858_v62 = vrot.slane %v12117_v39, 1 }
 0x21f   :  { %v2545_v44 = vsel %vm1770_vm2, %v12906_v26, %v11766_v36  ;;  %v1815_v20 = vsel %vm1785_vm7, %v1814_v1, %v1813_v16  ;;  %v1853_v12 = vsel %vm1779_vm5, %v1852_v51, %v1851_v17  ;;  %v2548_v57 = vrot.slane %v12907_v33, 5  ;;  %2391 = vmatprep.subr.bf16.mxu1 %v10112_v19  ;;  %2477 = vmatprep.subr.bf16.mxu0 %v10115_v29  ;;  %v10121_v54 = vld [vmem:[#allocation8 + $0x54c] ss:$16 sps:$4 sm:$0xff]   ;;  %v12908_v56 = vld [vmem:[#allocation41_spill] sm:$0xff]  ;;  %v12909_v16 = vld [vmem:[#allocation59_spill] sm:$0xff] }
 0x220   :  { %v1817_v32 = vsel %vm1788_vm8, %v1816_v15, %v1815_v20  ;;  %v1855_v36 = vsel %vm1782_vm6, %v1854_v3, %v1853_v12  ;;  %v2550_v55 = vrot.slane %v12908_v56, 4  ;;  %v12816_v26 = vmov 0  }
 0x221   :  { %2421 = vmatprep.mubr.bf16.mxu1 %v12816_v26  ;;  %2507 = vmatprep.mubr.bf16.mxu0 %v12816_v26  ;;  %v1857_v51 = vsel %vm1785_vm7, %v1856_v38, %v1855_v36  ;;  %v2547_v19 = vsel %vm1773_vm3, %v2546_v5, %v2545_v44  ;;  %v2552_v29 = vrot.slane %v11862_v63, 3  ;;  %v2554_v1 = vrot.slane %v11900_v43, 2  ;;  %v10116_v38 = vld [vmem:[#allocation8 + $0x540] ss:$16 sps:$4 sm:$0xff]   ;;  %v10119_v36 = vld [vmem:[#allocation8 + $0x548] ss:$16 sps:$4 sm:$0xff]  }
 0x222   :  { %v1859_v15 = vsel %vm1788_vm8, %v1858_v62, %v1857_v51  ;;  %v2549_v3 = vsel %vm1776_vm4, %v2548_v57, %v2547_v19  ;;  %v12910_v17 = vrot.slane %v11977_v28, 7  ;;  %v2588_v12 = vrot.slane %v11971_v61, 6  ;;  %2392 = vmatpush1.bf16.msra.mxu1 %v10110_v53  ;;  %2478 = vmatpush1.bf16.msra.mxu0 %v10113_v18  ;;  %v10124_v57 = vld [vmem:[#allocation8 + $0x564] ss:$16 sps:$4 sm:$0xff]   ;;  %v10127_v28 = vld [vmem:[#allocation8 + $0x56c] ss:$16 sps:$4 sm:$0xff]  }
 0x223   :  { %v12196_v44 = vpack.c.b16 %v1859_v15, %v1817_v32  ;;  %v2551_v5 = vsel %vm1779_vm5, %v2550_v55, %v2549_v3  ;;  %v2590_v26 = vrot.slane %v12002_v31, 5  ;;  %v2592_v62 = vrot.slane %v12060_v23, 4  ;;  %2393 = vmatprep.subr.bf16.mxu1 %v10118_v58  ;;  %2479 = vmatprep.subr.bf16.mxu0 %v10121_v54  ;;  %v12912_v3 = vld [vmem:[#allocation36_spill] sm:$0xff] }
 0x224   :  { %v2587_v20 = vsel %vm1770_vm2, %v12910_v17, %v12909_v16  ;;  %v2553_v51 = vsel %vm1782_vm6, %v2552_v29, %v2551_v5  ;;  %v2594_v53 = vrot.slane %v12066_v47, 3  ;;  %v2596_v18 = vrot.slane %v12073_v13, 2  ;;  %v12913_v16 = vld [vmem:[#allocation31_spill] sm:$0xff] }
 0x225   :  { %12911 = vst [vmem:[#allocation34_spill] sm:$0xff] %v12196_v44  ;;  %v2589_v19 = vsel %vm1773_vm3, %v2588_v12, %v2587_v20  ;;  %v2555_v32 = vsel %vm1785_vm7, %v2554_v1, %v2553_v51  ;;  %v2556_v55 = vrot.slane %v11922_v48, 1  ;;  %v12914_v58 = vrot.slane %v12913_v16, 6  ;;  %v12915_v20 = vld [vmem:[#allocation33_spill] sm:$0xff]  ;;  %v10122_v1 = vld [vmem:[#allocation8 + $0x560] ss:$16 sps:$4 sm:$0xff]  }
 0x226   :  { %v2591_v15 = vsel %vm1776_vm4, %v2590_v26, %v2589_v19  ;;  %v2598_v29 = vrot.slane %v12092_v59, 1  ;;  %v2534_v12 = vrot.slane %v12915_v20, 5  ;;  %v2536_v5 = vrot.slane %v11836_v34, 4  ;;  %2394 = vmatpush1.bf16.msra.mxu1 %v10116_v38  ;;  %2480 = vmatpush1.bf16.msra.mxu0 %v10119_v36  ;;  %v10125_v51 = vld [vmem:[#allocation8 + $0x568] ss:$16 sps:$4 sm:$0xff]   ;;  %v12916_v38 = vld [vmem:[#allocation56_spill] sm:$0xff] }
 0x227   :  { %v2533_v54 = vsel %vm1773_vm3, %v12914_v58, %v12912_v3  ;;  %v2593_v17 = vsel %vm1779_vm5, %v2592_v62, %v2591_v15  ;;  %v2557_v39 = vsel %vm1788_vm8, %v2556_v55, %v2555_v32  ;;  %v2538_v19 = vrot.slane %v11842_v7, 3  ;;  %2395 = vmatprep.subr.bf16.mxu1 %v10124_v57  ;;  %2481 = vmatprep.subr.bf16.mxu0 %v10127_v28  ;;  %v10130_v62 = vld [vmem:[#allocation8 + $0x584] ss:$16 sps:$4 sm:$0xff]   ;;  %v10133_v15 = vld [vmem:[#allocation8 + $0x58c] ss:$16 sps:$4 sm:$0xff]  }
 0x228   :  { %v2595_v26 = vsel %vm1782_vm6, %v2594_v53, %v2593_v17  ;;  %v2540_v3 = vrot.slane %v11898_v27, 2  ;;  %v2535_v58 = vsel %vm1776_vm4, %v2534_v12, %v2533_v54  ;;  %v12917_v36 = vld [vmem:[#allocation51_spill] sm:$0xff]  ;;  %v2578_v57 = vrot.slane %v12058_v0, 4 }
 0x229   :  { %v2597_v16 = vsel %vm1785_vm7, %v2596_v18, %v2595_v26  ;;  %v12918_v20 = vrot.slane %v12917_v36, 6  ;;  %v12919_v32 = vld [vmem:[#allocation55_spill] sm:$0xff]  ;;  %v2537_v17 = vsel %vm1779_vm5, %v2536_v5, %v2535_v58  ;;  %v2580_v28 = vrot.slane %v12064_v46, 3  ;;  %v12920_v58 = vld [vmem:[#allocation37_spill] sm:$0xff] }
 0x22a   :  { %v2576_v55 = vrot.slane %v12919_v32, 5  ;;  %v2599_v53 = vsel %vm1788_vm8, %v2598_v29, %v2597_v16  ;;  %v2539_v18 = vsel %vm1782_vm6, %v2538_v19, %v2537_v17  ;;  %v2582_v12 = vrot.slane %v12070_v8, 2  ;;  %2396 = vmatpush1.bf16.msra.mxu1 %v10122_v1  ;;  %2482 = vmatpush1.bf16.msra.mxu0 %v10125_v51  ;;  %v10136_v26 = vld [vmem:[#allocation8 + $0x5a4] ss:$16 sps:$4 sm:$0xff]  }
 0x22b   :  { %v2575_v30 = vsel %vm1773_vm3, %v12918_v20, %v12916_v38  ;;  %v12231_v44 = vpack.c.b16 %v2599_v53, %v2557_v39  ;;  %v10131_v20 = vld [vmem:[#allocation8 + $0x588] ss:$16 sps:$4 sm:$0xff]   ;;  %v2541_v29 = vsel %vm1785_vm7, %v2540_v3, %v2539_v18  ;;  %v2542_v5 = vrot.slane %v11909_v60, 1  ;;  %v12921_v38 = vld [vmem:[#allocation32_spill] sm:$0xff]  ;;  %2397 = vmatprep.subr.bf16.mxu1 %v10130_v62  ;;  %2483 = vmatprep.subr.bf16.mxu0 %v10133_v15 }
 0x22c   :  { %v2577_v54 = vsel %vm1776_vm4, %v2576_v55, %v2575_v30  ;;  %v12922_v39 = vrot.slane %v12921_v38, 6  ;;  %v10139_v30 = vld [vmem:[#allocation8 + $0x5ac] ss:$16 sps:$4 sm:$0xff]   ;;  %v2584_v1 = vrot.slane %v12078_v35, 1  ;;  %v2562_v51 = vrot.slane %v11764_v4, 5  ;;  %v12923_v18 = vld [vmem:[#allocation57_spill] sm:$0xff] }
 0x22d   :  { %v2579_v16 = vsel %vm1779_vm5, %v2578_v57, %v2577_v54  ;;  %v2564_v3 = vrot.slane %v11840_v37, 4  ;;  %v2543_v55 = vsel %vm1788_vm8, %v2542_v5, %v2541_v29  ;;  %v2566_v17 = vrot.slane %v11896_v42, 3  ;;  %v10134_v29 = vld [vmem:[#allocation8 + $0x5a0] ss:$16 sps:$4 sm:$0xff]   ;;  %v10137_v5 = vld [vmem:[#allocation8 + $0x5a8] ss:$16 sps:$4 sm:$0xff]  }
 0x22e   :  { %v2561_v36 = vsel %vm1773_vm3, %v12922_v39, %v12920_v58  ;;  %v2581_v19 = vsel %vm1782_vm6, %v2580_v28, %v2579_v16  ;;  %v2568_v57 = vrot.slane %v11902_v2, 2  ;;  %v12924_v28 = vld [vmem:[#allocation52_spill] sm:$0xff]  ;;  %v2604_v58 = vrot.slane %v12004_v25, 5  ;;  %2398 = vmatpush1.bf16.msra.mxu1 %v10128_v41  ;;  %2484 = vmatpush1.bf16.msra.mxu0 %v10131_v20  ;;  %v12943_v4 = vld [vmem:[#allocation54_spill] sm:$0xff] }
 0x22f   :  { %v2583_v53 = vsel %vm1785_vm7, %v2582_v12, %v2581_v19  ;;  %v2563_v15 = vsel %vm1776_vm4, %v2562_v51, %v2561_v36  ;;  %v12925_v54 = vrot.slane %v12924_v28, 6  ;;  %v2606_v39 = vrot.slane %v12062_v6, 4  ;;  %2399 = vmatprep.subr.bf16.mxu1 %v10136_v26  ;;  %2485 = vmatprep.subr.bf16.mxu0 %v10139_v30  ;;  %v10145_v51 = vld [vmem:[#allocation8 + $0x5cc] ss:$16 sps:$4 sm:$0xff]   ;;  %v12927_v26 = vld [vmem:[#allocation45_spill] sm:$0xff] }
 0x230   :  { %v2585_v62 = vsel %vm1788_vm8, %v2584_v1, %v2583_v53  ;;  %v2565_v38 = vsel %vm1779_vm5, %v2564_v3, %v2563_v15  ;;  %v2608_v19 = vrot.slane %v12068_v21, 3  ;;  %v12265_v36 = vrot.slane %v12080_v49, %v11636_v50  ;;  %v10142_v1 = vld [vmem:[#allocation8 + $0x5c4] ss:$16 sps:$4 sm:$0xff]  }
 0x231   :  { %v2603_v16 = vsel %vm1773_vm3, %v12925_v54, %v12923_v18  ;;  %v12258_v12 = vpack.c.b16 %v2585_v62, %v2543_v55  ;;  %v2567_v41 = vsel %vm1782_vm6, %v2566_v17, %v2565_v38  ;;  %v2610_v55 = vrot.slane %v12076_v22, 2  ;;  %v10143_v54 = vld [vmem:[#allocation8 + $0x5c8] ss:$16 sps:$4 sm:$0xff]  }
 0x232   :  { %v2605_v20 = vsel %vm1776_vm4, %v2604_v58, %v2603_v16  ;;  %v2569_v3 = vsel %vm1785_vm7, %v2568_v57, %v2567_v41  ;;  %v2570_v53 = vrot.slane %v11927_v45, 1  ;;  %v2612_v15 = vrot.slane %v12099_v14, 1  ;;  %2400 = vmatpush1.bf16.msra.mxu1 %v10134_v29  ;;  %2486 = vmatpush1.bf16.msra.mxu0 %v10137_v5  ;;  %v10140_v57 = vld [vmem:[#allocation8 + $0x5c0] ss:$16 sps:$4 sm:$0xff]   ;;  %v10148_v41 = vld [vmem:[#allocation8 + $0x5e4] ss:$16 sps:$4 sm:$0xff]  }
 0x233   :  { %12926 = vst [vmem:[#allocation41_spill] sm:$0xff] %v12258_v12  ;;  %v2607_v62 = vsel %vm1779_vm5, %v2606_v39, %v2605_v20  ;;  %v12928_v30 = vpack.c.bf16 %v12927_v26, %v12927_v26  ;;  %v3433_v17 = vrot.slane %v12907_v33, 7  ;;  %v3435_v28 = vrot.slane %v12908_v56, 6  ;;  %2401 = vmatprep.subr.bf16.mxu1 %v10142_v1  ;;  %2487 = vmatprep.subr.bf16.mxu0 %v10145_v51  ;;  %v10151_v20 = vld [vmem:[#allocation8 + $0x5ec] ss:$16 sps:$4 sm:$0xff]  }
 0x234   :  { %v2609_v49 = vsel %vm1782_vm6, %v2608_v19, %v2607_v62  ;;  %v12929_v58 = vpack.c.bf16 %v12096_v24, %v12096_v24  ;;  %v3437_v39 = vrot.slane %v11862_v63, 5  ;;  %v3439_v19 = vrot.slane %v11900_v43, 4 }
 0x235   :  { %v12278_v18 = vunpack.c.l.b16 %v12928_v30  ;;  %v2611_v16 = vsel %vm1785_vm7, %v2610_v55, %v2609_v49  ;;  %v2571_v29 = vsel %vm1788_vm8, %v2570_v53, %v2569_v3  ;;  %v3434_v55 = vsel %vm1770_vm2, %v3433_v17, %v11752_v11  ;;  %v10149_v17 = vld [vmem:[#allocation8 + $0x5e8] ss:$16 sps:$4 sm:$0xff]  }
 0x236   :  { %v12286_v38 = vunpack.c.l.b16 %v12929_v58  ;;  %v2613_v5 = vsel %vm1788_vm8, %v2612_v15, %v2611_v16  ;;  %v3443_v62 = vrot.slane %v11955_v10, 2  ;;  %v3436_v49 = vsel %vm1773_vm3, %v3435_v28, %v3434_v55  ;;  %2402 = vmatpush1.bf16.msra.mxu1 %v10140_v57  ;;  %2488 = vmatpush1.bf16.msra.mxu0 %v10143_v54  ;;  %v10146_v15 = vld [vmem:[#allocation8 + $0x5e0] ss:$16 sps:$4 sm:$0xff]  }
 0x237   :  { %v12295_v24 = vpack.c.b16 %v2613_v5, %v2571_v29  ;;  %v3475_v26 = vrot.slane %v12002_v31, 7  ;;  %v3477_v1 = vrot.slane %v12060_v23, 6  ;;  %v3438_v51 = vsel %vm1776_vm4, %v3437_v39, %v3436_v49  ;;  %2403 = vmatprep.subr.bf16.mxu1 %v10148_v41  ;;  %2489 = vmatprep.subr.bf16.mxu0 %v10151_v20  ;;  %v10154_v29 = vld [vmem:[#allocation8 + $0x4] ss:$16 sps:$4 sm:$0xff]   ;;  %v10157_v5 = vld [vmem:[#allocation8 + $0xc] ss:$16 sps:$4 sm:$0xff]  }
 0x238   :  { %v3441_v30 = vrot.slane %v11922_v48, 3  ;;  %v3479_v3 = vrot.slane %v12066_v47, 5  ;;  %v3481_v53 = vrot.slane %v12073_v13, 4  ;;  %v3307_v11 = vpack.c.bf16 %v12114_v52, %v12114_v52 }
 0x239   :  { %12930 = vst [vmem:[#allocation59_spill] sm:$0xff] %v12295_v24  ;;  %v3440_v28 = vsel %vm1779_vm5, %v3439_v19, %v3438_v51  ;;  %v3445_v16 = vrot.slane %v12278_v18, 1  ;;  %v3476_v58 = vsel %vm1770_vm2, %v3475_v26, %v11971_v61  ;;  %v3309_v39 = vpack.c.bf16 %v12265_v36, %v12265_v36 }
 0x23a   :  { %v3442_v52 = vsel %vm1782_vm6, %v3441_v30, %v3440_v28  ;;  %v3478_v57 = vsel %vm1773_vm3, %v3477_v1, %v3476_v58  ;;  %v3483_v54 = vrot.slane %v12092_v59, 3  ;;  %v3421_v49 = vrot.slane %v11836_v34, 6  ;;  %2404 = vmatpush1.bf16.msra.mxu1 %v10146_v15  ;;  %2490 = vmatpush1.bf16.msra.mxu0 %v10149_v17  ;;  %v10152_v1 = vld [vmem:[#allocation8] ss:$16 sps:$4 sm:$0xff]   ;;  %v12932_v17 = vld [vmem:[#allocation53_spill] sm:$0xff] }
 0x23b   :  { %v3444_v19 = vsel %vm1785_vm7, %v3443_v62, %v3442_v52  ;;  %v3480_v55 = vsel %vm1776_vm4, %v3479_v3, %v3478_v57  ;;  %v3423_v61 = vrot.slane %v11842_v7, 5  ;;  %v3485_v41 = vrot.slane %v12110_v9, 2  ;;  %v12931_v30 = vld [vmem:[#allocation38_spill] sm:$0xff]  ;;  %3100 = vmatprep.subr.bf16.mxu1 %v10154_v29  ;;  %3186 = vmatprep.subr.bf16.mxu0 %v10157_v5 }
 0x23c   :  { %v3482_v36 = vsel %vm1779_vm5, %v3481_v53, %v3480_v55  ;;  %v3487_v20 = vrot.slane %v12286_v38, 1  ;;  %v3425_v26 = vrot.slane %v11898_v27, 4  ;;  %v3446_v51 = vsel %vm1788_vm8, %v3445_v16, %v3444_v19  ;;  %v10155_v53 = vld [vmem:[#allocation8 + $0x8] ss:$16 sps:$4 sm:$0xff]   ;;  %v10160_v55 = vld [vmem:[#allocation8 + $0x24] ss:$16 sps:$4 sm:$0xff]  }
 0x23d   :  { %v3484_v62 = vsel %vm1782_vm6, %v3483_v54, %v3482_v36  ;;  %v3422_v3 = vsel %vm1773_vm3, %v3421_v49, %v12931_v30  ;;  %v3429_v28 = vrot.slane %v11953_v40, 2  ;;  %v3427_v15 = vrot.slane %v11909_v60, 3  ;;  %v10163_v16 = vld [vmem:[#allocation8 + $0x2c] ss:$16 sps:$4 sm:$0xff]  }
 0x23e   :  { %v3486_v58 = vsel %vm1785_vm7, %v3485_v41, %v3484_v62  ;;  %v3424_v52 = vsel %vm1776_vm4, %v3423_v61, %v3422_v3  ;;  %v3431_v57 = vrot.slane %v12932_v17, 1  ;;  %v3463_v49 = vrot.slane %v12058_v0, 6  ;;  %v12934_v5 = vld [vmem:[#allocation34_spill] sm:$0xff] }
 0x23f   :  { %v3488_v54 = vsel %vm1788_vm8, %v3487_v20, %v3486_v58  ;;  %v3426_v19 = vsel %vm1779_vm5, %v3425_v26, %v3424_v52  ;;  %v3465_v29 = vrot.slane %v12064_v46, 5  ;;  %v12336_v36 = vunpack.c.l.b16 %v3307_v11  ;;  %2422 = vmatmul.mubr.bf16.vlgmr.msra.gmra.mrb[12].mxu1 %v12934_v5  ;;  %2508 = vmatmul.mubr.bf16.vlgmr.msra.gmra.mrb[24].mxu0 %v12934_v5  ;;  %v10158_v20 = vld [vmem:[#allocation8 + $0x20] ss:$16 sps:$4 sm:$0xff]   ;;  %v12937_v58 = vld [vmem:[#allocation27_spill] sm:$0xff] }
 0x240   :  { %v12340_v61 = vpack.c.b16 %v3488_v54, %v3446_v51  ;;  %v3428_v41 = vsel %vm1782_vm6, %v3427_v15, %v3426_v19  ;;  %v3467_v62 = vrot.slane %v12070_v8, 4  ;;  %v12344_v30 = vunpack.c.l.b16 %v3309_v39  ;;  %3101 = vmatpush1.bf16.msra.mxu1 %v10152_v1  ;;  %3132 = vmatprep.mubr.bf16.mxu1 %v12231_v44  ;;  %v12936_v11 = vld [vmem:[#allocation60_spill] sm:$0xff]  ;;  %v10161_v51 = vld [vmem:[#allocation8 + $0x28] ss:$16 sps:$4 sm:$0xff]   ;;  %v10166_v15 = vld [vmem:[#allocation8 + $0x44] ss:$16 sps:$4 sm:$0xff]  }
 0x241   :  { %12933 = vst [vmem:[#allocation36_spill] sm:$0xff] %v12336_v36  ;;  %v3430_v26 = vsel %vm1785_vm7, %v3429_v28, %v3428_v41  ;;  %v3464_v3 = vsel %vm1773_vm3, %v3463_v49, %v12936_v11  ;;  %v12938_v52 = vld [vmem:[#allocation44_spill] sm:$0xff]  ;;  %3187 = vmatpush1.bf16.msra.mxu0 %v10155_v53  ;;  %3218 = vmatprep.mubr.bf16.mxu0 %v12231_v44  ;;  %v3469_v54 = vrot.slane %v12078_v35, 3  ;;  %v12939_v19 = vld [vmem:[#allocation66_spill] sm:$0xff]  ;;  %v3449_v11 = vrot.slane %v11840_v37, 6 }
 0x242   :  { %12935 = vst [vmem:[#allocation31_spill] sm:$0xff] %v12340_v61  ;;  %v12352_v5 = vrot.slane %v12938_v52, %v12937_v58  ;;  %v3432_v39 = vsel %vm1788_vm8, %v3431_v57, %v3430_v26  ;;  %v3466_v1 = vsel %vm1776_vm4, %v3465_v29, %v3464_v3  ;;  %v3471_v28 = vrot.slane %v12939_v19, 2  ;;  %3102 = vmatprep.subr.bf16.mxu1 %v10160_v55  ;;  %v10169_v49 = vld [vmem:[#allocation8 + $0x4c] ss:$16 sps:$4 sm:$0xff]   ;;  %v10164_v55 = vld [vmem:[#allocation8 + $0x40] ss:$16 sps:$4 sm:$0xff]  }
 0x243   :  { %3188 = vmatprep.subr.bf16.mxu0 %v10163_v16  ;;  %v3468_v41 = vsel %vm1779_vm5, %v3467_v62, %v3466_v1  ;;  %v3451_v53 = vrot.slane %v11896_v42, 5  ;;  %v3453_v44 = vrot.slane %v11902_v2, 4  ;;  %v3473_v57 = vrot.slane %v12336_v36, 1  ;;  %v12940_v29 = vld [vmem:[#allocation50_spill] sm:$0xff]  ;;  %v12941_v3 = vld [vmem:[#allocation64_spill] sm:$0xff]  ;;  %v12942_v62 = vld [vmem:[#allocation39_spill] sm:$0xff] }
 0x244   :  { %v3470_v52 = vsel %vm1782_vm6, %v3469_v54, %v3468_v41  ;;  %v3457_v26 = vrot.slane %v12940_v29, 2  ;;  %v4190_v61 = vrot.slane %v12941_v3, %v12937_v58  ;;  %3103 = vmatpush1.bf16.msra.mxu1 %v10158_v20  ;;  %v3450_v1 = vsel %vm1773_vm3, %v3449_v11, %v12942_v62  ;;  %v10167_v54 = vld [vmem:[#allocation8 + $0x48] ss:$16 sps:$4 sm:$0xff]   ;;  %v10172_v41 = vld [vmem:[#allocation8 + $0x64] ss:$16 sps:$4 sm:$0xff]  }
 0x245   :  { %v3472_v16 = vsel %vm1785_vm7, %v3471_v28, %v3470_v52  ;;  %v3491_v24 = vrot.slane %v12062_v6, 6  ;;  %v3493_v12 = vrot.slane %v12068_v21, 5  ;;  %3189 = vmatpush1.bf16.msra.mxu0 %v10161_v51  ;;  %3104 = vmatprep.subr.bf16.mxu1 %v10166_v15  ;;  %v3452_v29 = vsel %vm1776_vm4, %v3451_v53, %v3450_v1  ;;  %v10175_v28 = vld [vmem:[#allocation8 + $0x6c] ss:$16 sps:$4 sm:$0xff]   ;;  %v12945_v62 = vld [vmem:[#allocation61_spill] sm:$0xff] }
 0x246   :  { %v3474_v25 = vsel %vm1788_vm8, %v3473_v57, %v3472_v16  ;;  %v3455_v20 = vrot.slane %v11927_v45, 3  ;;  %v3459_v2 = vrot.slane %v12943_v4, 1  ;;  %3190 = vmatprep.subr.bf16.mxu0 %v10169_v49  ;;  %v3454_v11 = vsel %vm1779_vm5, %v3453_v44, %v3452_v29  ;;  %v12946_v49 = vld [vmem:[#allocation25_spill] sm:$0xff]  ;;  %v12947_v29 = vld [vmem:[#allocation67_spill] sm:$0xff] }
 0x247   :  { %v12377_v52 = vpack.c.b16 %v3474_v25, %v3432_v39  ;;  %v3492_v51 = vsel %vm1773_vm3, %v3491_v24, %v12945_v62  ;;  %v3495_v15 = vrot.slane %v12076_v22, 4  ;;  %v3497_v53 = vrot.slane %v12099_v14, 3  ;;  %v10170_v39 = vld [vmem:[#allocation8 + $0x60] ss:$16 sps:$4 sm:$0xff]  }
 0x248   :  { %v3456_v21 = vsel %vm1782_vm6, %v3455_v20, %v3454_v11  ;;  %v3494_v57 = vsel %vm1776_vm4, %v3493_v12, %v3492_v51  ;;  %v4202_v16 = vpack.c.bf16 %v12352_v5, %v12352_v5  ;;  %v12390_v25 = vrot.slane %v12941_v3, %v12946_v49  ;;  %3105 = vmatpush1.bf16.msra.mxu1 %v10164_v55  ;;  %v10173_v12 = vld [vmem:[#allocation8 + $0x68] ss:$16 sps:$4 sm:$0xff]   ;;  %v10178_v20 = vld [vmem:[#allocation8 + $0x84] ss:$16 sps:$4 sm:$0xff]   ;;  %v10181_v55 = vld [vmem:[#allocation8 + $0x8c] ss:$16 sps:$4 sm:$0xff]  }
 0x249   :  { %12944 = vst [vmem:[#allocation56_spill] sm:$0xff] %v12377_v52  ;;  %v3458_v44 = vsel %vm1785_vm7, %v3457_v26, %v3456_v21  ;;  %v3496_v24 = vsel %vm1779_vm5, %v3495_v15, %v3494_v57  ;;  %v3499_v1 = vrot.slane %v12947_v29, 2  ;;  %3191 = vmatpush1.bf16.msra.mxu0 %v10167_v54  ;;  %3106 = vmatprep.subr.bf16.mxu1 %v10172_v41  ;;  %v3501_v62 = vrot.slane %v12344_v30, 1  ;;  %v12948_v57 = vld [vmem:[#allocation48_spill] sm:$0xff] }
 0x24a   :  { %v3460_v11 = vsel %vm1788_vm8, %v3459_v2, %v3458_v44  ;;  %v3498_v5 = vsel %vm1782_vm6, %v3497_v53, %v3496_v24  ;;  %v4205_v51 = vpack.c.bf16 %v4190_v61, %v4190_v61  ;;  %3192 = vmatprep.subr.bf16.mxu0 %v10175_v28  ;;  %v4330_v21 = vrot.slane %v12908_v56, 7  ;;  %v10176_v28 = vld [vmem:[#allocation8 + $0x80] ss:$16 sps:$4 sm:$0xff]  }
 0x24b   :  { %v3500_v52 = vsel %vm1785_vm7, %v3499_v1, %v3498_v5  ;;  %v4332_v26 = vrot.slane %v11862_v63, 6  ;;  %v4334_v54 = vrot.slane %v11900_v43, 5  ;;  %v12404_v41 = vrot.slane %v12941_v3, %v11636_v50  ;;  %v10179_v3 = vld [vmem:[#allocation8 + $0x88] ss:$16 sps:$4 sm:$0xff]  }
 0x24c   :  { %v3502_v2 = vsel %vm1788_vm8, %v3501_v62, %v3500_v52  ;;  %v12407_v15 = vunpack.c.l.b16 %v4202_v16  ;;  %v4201_v61 = vpack.c.bf16 %v12948_v57, %v12948_v57  ;;  %3107 = vmatpush1.bf16.msra.mxu1 %v10170_v39  ;;  %v4331_v44 = vsel %vm1770_vm2, %v4330_v21, %v12907_v33  ;;  %v10184_v52 = vld [vmem:[#allocation8 + $0xa4] ss:$16 sps:$4 sm:$0xff]   ;;  %v10187_v62 = vld [vmem:[#allocation8 + $0xac] ss:$16 sps:$4 sm:$0xff]  }
 0x24d   :  { %v12411_v53 = vpack.c.b16 %v3502_v2, %v3460_v11  ;;  %v4338_v24 = vrot.slane %v11955_v10, 3  ;;  %v4372_v1 = vrot.slane %v12060_v23, 7  ;;  %3193 = vmatpush1.bf16.msra.mxu0 %v10173_v12  ;;  %3108 = vmatprep.subr.bf16.mxu1 %v10178_v20  ;;  %v12417_v16 = vunpack.c.l.b16 %v4205_v51 }
 0x24e   :  { %v4333_v5 = vsel %vm1773_vm3, %v4332_v26, %v4331_v44  ;;  %v4336_v39 = vrot.slane %v11922_v48, 4  ;;  %v4340_v11 = vrot.slane %v12278_v18, 2  ;;  %3194 = vmatprep.subr.bf16.mxu0 %v10181_v55  ;;  %v4374_v12 = vrot.slane %v12066_v47, 6  ;;  %v10182_v55 = vld [vmem:[#allocation8 + $0xa0] ss:$16 sps:$4 sm:$0xff]  }
 0x24f   :  { %12949 = vst [vmem:[#allocation51_spill] sm:$0xff] %v12411_v53  ;;  %v4335_v33 = vsel %vm1776_vm4, %v4334_v54, %v4333_v5  ;;  %v4373_v21 = vsel %vm1770_vm2, %v4372_v1, %v12002_v31  ;;  %v4376_v20 = vrot.slane %v12073_v13, 5  ;;  %v4342_v2 = vrot.slane %v12407_v15, 1  ;;  %v10185_v44 = vld [vmem:[#allocation8 + $0xa8] ss:$16 sps:$4 sm:$0xff]  }
 0x250   :  { %v4337_v51 = vsel %vm1779_vm5, %v4336_v39, %v4335_v33  ;;  %v4204_v26 = vpack.c.bf16 %v12390_v25, %v12390_v25  ;;  %v12431_v57 = vunpack.c.l.b16 %v4201_v61  ;;  %3109 = vmatpush1.bf16.msra.mxu1 %v10176_v28  ;;  %v4375_v31 = vsel %vm1773_vm3, %v4374_v12, %v4373_v21  ;;  %v12950_v5 = vld [vmem:[#allocation49_spill] sm:$0xff] }
 0x251   :  { %v4339_v54 = vsel %vm1782_vm6, %v4338_v24, %v4337_v51  ;;  %v4378_v1 = vrot.slane %v12092_v59, 4  ;;  %v4203_v53 = vpack.c.bf16 %v12950_v5, %v12950_v5  ;;  %3195 = vmatpush1.bf16.msra.mxu0 %v10179_v3  ;;  %3110 = vmatprep.subr.bf16.mxu1 %v10184_v52  ;;  %v10190_v39 = vld [vmem:[#allocation8 + $0xc4] ss:$16 sps:$4 sm:$0xff]   ;;  %v4377_v33 = vsel %vm1776_vm4, %v4376_v20, %v4375_v31  ;;  %v10193_v24 = vld [vmem:[#allocation8 + $0xcc] ss:$16 sps:$4 sm:$0xff]  }
 0x252   :  { %v4380_v25 = vrot.slane %v12110_v9, 3  ;;  %v4382_v61 = vrot.slane %v12286_v38, 2  ;;  %v4384_v28 = vrot.slane %v12417_v16, 1  ;;  %3196 = vmatprep.subr.bf16.mxu0 %v10187_v62  ;;  %v4341_v21 = vsel %vm1785_vm7, %v4340_v11, %v4339_v54  ;;  %v10188_v62 = vld [vmem:[#allocation8 + $0xc0] ss:$16 sps:$4 sm:$0xff]   ;;  %v12952_v11 = vld [vmem:[#allocation33_spill] sm:$0xff] }
 0x253   :  { %v4379_v12 = vsel %vm1779_vm5, %v4378_v1, %v4377_v33  ;;  %v4316_v51 = vrot.slane %v11836_v34, 7  ;;  %v4318_v3 = vrot.slane %v11842_v7, 6  ;;  %v12447_v5 = vunpack.c.l.b16 %v4204_v26  ;;  %v10191_v26 = vld [vmem:[#allocation8 + $0xc8] ss:$16 sps:$4 sm:$0xff]  }
 0x254   :  { %v4381_v52 = vsel %vm1782_vm6, %v4380_v25, %v4379_v12  ;;  %v4320_v20 = vrot.slane %v11898_v27, 5  ;;  %v4206_v31 = vpack.c.bf16 %v12404_v41, %v12404_v41  ;;  %3111 = vmatpush1.bf16.msra.mxu1 %v10182_v55  ;;  %v4324_v1 = vrot.slane %v11953_v40, 3  ;;  %v10196_v25 = vld [vmem:[#allocation8 + $0xe4] ss:$16 sps:$4 sm:$0xff]  }
 0x255   :  { %12951 = vst [vmem:[#allocation55_spill] sm:$0xff] %v12447_v5  ;;  %v4383_v50 = vsel %vm1785_vm7, %v4382_v61, %v4381_v52  ;;  %v4317_v54 = vsel %vm1770_vm2, %v4316_v51, %v12952_v11  ;;  %v12456_v33 = vunpack.c.l.b16 %v4203_v53  ;;  %3197 = vmatpush1.bf16.msra.mxu0 %v10185_v44  ;;  %3112 = vmatprep.subr.bf16.mxu1 %v10190_v39  ;;  %v4322_v55 = vrot.slane %v11909_v60, 4  ;;  %v10199_v61 = vld [vmem:[#allocation8 + $0xec] ss:$16 sps:$4 sm:$0xff]   ;;  %v12954_v11 = vld [vmem:[#allocation47_spill] sm:$0xff] }
 0x256   :  { %v4343_v12 = vsel %vm1788_vm8, %v4342_v2, %v4341_v21  ;;  %v4385_v34 = vsel %vm1788_vm8, %v4384_v28, %v4383_v50  ;;  %v4319_v41 = vsel %vm1773_vm3, %v4318_v3, %v4317_v54  ;;  %3198 = vmatprep.subr.bf16.mxu0 %v10193_v24  ;;  %v4358_v53 = vrot.slane %v12058_v0, 7  ;;  %v10194_v21 = vld [vmem:[#allocation8 + $0xe0] ss:$16 sps:$4 sm:$0xff]   ;;  %v10197_v24 = vld [vmem:[#allocation8 + $0xe8] ss:$16 sps:$4 sm:$0xff]  }
 0x257   :  { %v12462_v52 = vpack.c.b16 %v4385_v34, %v4343_v12  ;;  %v4321_v51 = vsel %vm1776_vm4, %v4320_v20, %v4319_v41  ;;  %v4360_v44 = vrot.slane %v12064_v46, 6  ;;  %v4326_v2 = vrot.slane %v12932_v17, 2  ;;  %v10202_v12 = vld [vmem:[#allocation8 + $0x104] ss:$16 sps:$4 sm:$0xff]  }
 0x258   :  { %v4323_v39 = vsel %vm1779_vm5, %v4322_v55, %v4321_v51  ;;  %v4328_v50 = vrot.slane %v12431_v57, 1  ;;  %v4362_v28 = vrot.slane %v12070_v8, 5  ;;  %3113 = vmatpush1.bf16.msra.mxu1 %v10188_v62  ;;  %v4359_v3 = vsel %vm1770_vm2, %v4358_v53, %v12919_v32  ;;  %v10205_v51 = vld [vmem:[#allocation8 + $0x10c] ss:$16 sps:$4 sm:$0xff]  }
 0x259   :  { %12953 = vst [vmem:[#allocation37_spill] sm:$0xff] %v12462_v52  ;;  %v4325_v34 = vsel %vm1782_vm6, %v4324_v1, %v4323_v39  ;;  %v12474_v20 = vunpack.c.l.b16 %v4206_v31  ;;  %v12478_v54 = vrot.slane %v12954_v11, %v12937_v58  ;;  %3199 = vmatpush1.bf16.msra.mxu0 %v10191_v26  ;;  %3114 = vmatprep.subr.bf16.mxu1 %v10196_v25  ;;  %v4364_v62 = vrot.slane %v12078_v35, 4  ;;  %v12955_v39 = vld [vmem:[#allocation43_spill] sm:$0xff] }
 0x25a   :  { %v4361_v41 = vsel %vm1773_vm3, %v4360_v44, %v4359_v3  ;;  %v4366_v55 = vrot.slane %v12939_v19, 3  ;;  %v4368_v1 = vrot.slane %v12336_v36, 2  ;;  %3200 = vmatprep.subr.bf16.mxu0 %v10199_v61  ;;  %v4370_v31 = vrot.slane %v12447_v5, 1  ;;  %v10200_v36 = vld [vmem:[#allocation8 + $0x100] ss:$16 sps:$4 sm:$0xff]   ;;  %v12956_v19 = vld [vmem:[#allocation35_spill] sm:$0xff] }
 0x25b   :  { %v4363_v32 = vsel %vm1776_vm4, %v4362_v28, %v4361_v41  ;;  %v4344_v53 = vrot.slane %v11840_v37, 7  ;;  %v4346_v26 = vrot.slane %v11896_v42, 6  ;;  %v4327_v25 = vsel %vm1785_vm7, %v4326_v2, %v4325_v34  ;;  %v12957_v41 = vld [vmem:[#allocation50_spill] sm:$0xff]  ;;  %v10203_v2 = vld [vmem:[#allocation8 + $0x108] ss:$16 sps:$4 sm:$0xff]  }
 0x25c   :  { %v4365_v44 = vsel %vm1779_vm5, %v4364_v62, %v4363_v32  ;;  %v4348_v3 = vrot.slane %v12955_v39, 5  ;;  %v4350_v52 = vrot.slane %v11927_v45, 4  ;;  %3115 = vmatpush1.bf16.msra.mxu1 %v10194_v21  ;;  %v4352_v5 = vrot.slane %v12957_v41, 3  ;;  %v10208_v34 = vld [vmem:[#allocation8 + $0x124] ss:$16 sps:$4 sm:$0xff]  }
 0x25d   :  { %v4367_v61 = vsel %vm1782_vm6, %v4366_v55, %v4365_v44  ;;  %v4345_v28 = vsel %vm1770_vm2, %v4344_v53, %v12956_v19  ;;  %v4354_v37 = vrot.slane %v12943_v4, 2  ;;  %3201 = vmatpush1.bf16.msra.mxu0 %v10197_v24  ;;  %3116 = vmatprep.subr.bf16.mxu1 %v10202_v12  ;;  %v4386_v21 = vrot.slane %v12062_v6, 7  ;;  %v12958_v45 = vld [vmem:[#allocation63_spill] sm:$0xff]  ;;  %v10211_v55 = vld [vmem:[#allocation8 + $0x12c] ss:$16 sps:$4 sm:$0xff]  }
 0x25e   :  { %v4369_v62 = vsel %vm1785_vm7, %v4368_v1, %v4367_v61  ;;  %v4347_v32 = vsel %vm1773_vm3, %v4346_v26, %v4345_v28  ;;  %v4388_v39 = vrot.slane %v12958_v45, 6  ;;  %3202 = vmatprep.subr.bf16.mxu0 %v10205_v51  ;;  %v4329_v19 = vsel %vm1788_vm8, %v4328_v50, %v4327_v25  ;;  %v12959_v61 = vld [vmem:[#allocation58_spill] sm:$0xff]  ;;  %v12960_v25 = vld [vmem:[#allocation65_spill] sm:$0xff] }
 0x25f   :  { %v4371_v53 = vsel %vm1788_vm8, %v4370_v31, %v4369_v62  ;;  %v4349_v44 = vsel %vm1776_vm4, %v4348_v3, %v4347_v32  ;;  %v4390_v24 = vrot.slane %v12076_v22, 5  ;;  %v4356_v26 = vrot.slane %v12456_v33, 1  ;;  %v10206_v51 = vld [vmem:[#allocation8 + $0x120] ss:$16 sps:$4 sm:$0xff]   ;;  %v10209_v62 = vld [vmem:[#allocation8 + $0x128] ss:$16 sps:$4 sm:$0xff]  }
 0x260   :  { %v12505_v12 = vpack.c.b16 %v4371_v53, %v4329_v19  ;;  %v4351_v1 = vsel %vm1779_vm5, %v4350_v52, %v4349_v44  ;;  %v4387_v28 = vsel %vm1770_vm2, %v4386_v21, %v12959_v61  ;;  %3117 = vmatpush1.bf16.msra.mxu1 %v10200_v36  ;;  %v4392_v31 = vrot.slane %v12099_v14, 4  ;;  %v10214_v52 = vld [vmem:[#allocation8 + $0x144] ss:$16 sps:$4 sm:$0xff]  }
 0x261   :  { %v4353_v6 = vsel %vm1782_vm6, %v4352_v5, %v4351_v1  ;;  %v4389_v50 = vsel %vm1773_vm3, %v4388_v39, %v4387_v28  ;;  %v5087_v3 = vrot.slane %v12960_v25, %v12937_v58  ;;  %3203 = vmatpush1.bf16.msra.mxu0 %v10203_v2  ;;  %3118 = vmatprep.subr.bf16.mxu1 %v10208_v34  ;;  %v4394_v36 = vrot.slane %v12947_v29, 3  ;;  %v10217_v39 = vld [vmem:[#allocation8 + $0x14c] ss:$16 sps:$4 sm:$0xff]  }
 0x262   :  { %v4355_v32 = vsel %vm1785_vm7, %v4354_v37, %v4353_v6  ;;  %v4391_v19 = vsel %vm1776_vm4, %v4390_v24, %v4389_v50  ;;  %v5099_v5 = vpack.c.bf16 %v12478_v54, %v12478_v54  ;;  %3204 = vmatprep.subr.bf16.mxu0 %v10211_v55  ;;  %v4396_v53 = vrot.slane %v12344_v30, 2  ;;  %v10212_v54 = vld [vmem:[#allocation8 + $0x140] ss:$16 sps:$4 sm:$0xff]  }
 0x263   :  { %v4393_v21 = vsel %vm1779_vm5, %v4392_v31, %v4391_v19  ;;  %v4398_v2 = vrot.slane %v12474_v20, 1  ;;  %v5227_v34 = vrot.slane %v11862_v63, 7  ;;  %v4357_v44 = vsel %vm1788_vm8, %v4356_v26, %v4355_v32  ;;  %v10215_v63 = vld [vmem:[#allocation8 + $0x148] ss:$16 sps:$4 sm:$0xff]   ;;  %v10220_v26 = vld [vmem:[#allocation8 + $0x164] ss:$16 sps:$4 sm:$0xff]  }
 0x264   :  { %v4395_v37 = vsel %vm1782_vm6, %v4394_v36, %v4393_v21  ;;  %v5229_v6 = vrot.slane %v11900_v43, 6  ;;  %v5231_v24 = vrot.slane %v11922_v48, 5  ;;  %3119 = vmatpush1.bf16.msra.mxu1 %v10206_v51  ;;  %v5208_v1 = vunpack.c.l.b16 %v5099_v5  ;;  %v10223_v48 = vld [vmem:[#allocation8 + $0x16c] ss:$16 sps:$4 sm:$0xff]   ;;  %v10218_v36 = vld [vmem:[#allocation8 + $0x160] ss:$16 sps:$4 sm:$0xff]  }
 0x265   :  { %v4397_v55 = vsel %vm1785_vm7, %v4396_v53, %v4395_v37  ;;  %v5228_v61 = vsel %vm1770_vm2, %v5227_v34, %v12908_v56  ;;  %v5233_v28 = vrot.slane %v11955_v10, 4  ;;  %3205 = vmatpush1.bf16.msra.mxu0 %v10209_v62  ;;  %3120 = vmatprep.subr.bf16.mxu1 %v10214_v52  ;;  %v5102_v31 = vpack.c.bf16 %v5087_v3, %v5087_v3  ;;  %v10226_v53 = vld [vmem:[#allocation8 + $0x184] ss:$16 sps:$4 sm:$0xff]  }
 0x266   :  { %v4399_v50 = vsel %vm1788_vm8, %v4398_v2, %v4397_v55  ;;  %v5230_v43 = vsel %vm1773_vm3, %v5229_v6, %v5228_v61  ;;  %3206 = vmatprep.subr.bf16.mxu0 %v10217_v39  ;;  %v5235_v19 = vrot.slane %v12278_v18, 3  ;;  %v5237_v56 = vrot.slane %v12407_v15, 2  ;;  %v10221_v15 = vld [vmem:[#allocation8 + $0x168] ss:$16 sps:$4 sm:$0xff]  }
 0x267   :  { %v12535_v51 = vpack.c.b16 %v4399_v50, %v4357_v44  ;;  %v5232_v32 = vsel %vm1776_vm4, %v5231_v24, %v5230_v43  ;;  %v5269_v62 = vrot.slane %v12066_v47, 7  ;;  %v5271_v52 = vrot.slane %v12073_v13, 6  ;;  %v10229_v44 = vld [vmem:[#allocation8 + $0x18c] ss:$16 sps:$4 sm:$0xff]  }
 0x268   :  { %v5234_v10 = vsel %vm1779_vm5, %v5233_v28, %v5232_v32  ;;  %v5071_v3 = vrot.slane %v12954_v11, %v12946_v49  ;;  %3121 = vmatpush1.bf16.msra.mxu1 %v10212_v54  ;;  %v5239_v39 = vrot.slane %v5208_v1, 1  ;;  %v5273_v21 = vrot.slane %v12092_v59, 5  ;;  %v10235_v32 = vld [vmem:[#allocation8 + $0x1ac] ss:$16 sps:$4 sm:$0xff]  }
 0x269   :  { %v5236_v5 = vsel %vm1782_vm6, %v5235_v19, %v5234_v10  ;;  %v5275_v18 = vrot.slane %v12110_v9, 4  ;;  %3207 = vmatpush1.bf16.msra.mxu0 %v10215_v63  ;;  %3122 = vmatprep.subr.bf16.mxu1 %v10220_v26  ;;  %v5211_v2 = vunpack.c.l.b16 %v5102_v31  ;;  %v5270_v13 = vsel %vm1770_vm2, %v5269_v62, %v12060_v23  ;;  %v10224_v23 = vld [vmem:[#allocation8 + $0x180] ss:$16 sps:$4 sm:$0xff]  }
 0x26a   :  { %v5238_v47 = vsel %vm1785_vm7, %v5237_v56, %v5236_v5  ;;  %v5083_v34 = vrot.slane %v12960_v25, %v12946_v49  ;;  %3208 = vmatprep.subr.bf16.mxu0 %v10223_v48  ;;  %v5272_v59 = vsel %vm1773_vm3, %v5271_v52, %v5270_v13  ;;  %v5277_v9 = vrot.slane %v12286_v38, 3  ;;  %v10227_v38 = vld [vmem:[#allocation8 + $0x188] ss:$16 sps:$4 sm:$0xff]   ;;  %v12961_v48 = vld [vmem:[#allocation40_spill] sm:$0xff] }
 0x26b   :  { %v5240_v37 = vsel %vm1788_vm8, %v5239_v39, %v5238_v47  ;;  %v5279_v6 = vrot.slane %v12417_v16, 2  ;;  %v5274_v24 = vsel %vm1776_vm4, %v5273_v21, %v5272_v59  ;;  %v5098_v54 = vpack.c.bf16 %v5071_v3, %v5071_v3  ;;  %v10232_v16 = vld [vmem:[#allocation8 + $0x1a4] ss:$16 sps:$4 sm:$0xff]   ;;  %v10230_v3 = vld [vmem:[#allocation8 + $0x1a0] ss:$16 sps:$4 sm:$0xff]  }
 0x26c   :  { %v5101_v55 = vpack.c.bf16 %v5083_v34, %v5083_v34  ;;  %v5213_v1 = vrot.slane %v11842_v7, 7  ;;  %3123 = vmatpush1.bf16.msra.mxu1 %v10218_v36  ;;  %v5276_v61 = vsel %vm1779_vm5, %v5275_v18, %v5274_v24  ;;  %v5215_v28 = vrot.slane %v11898_v27, 6  ;;  %v10241_v47 = vld [vmem:[#allocation8 + $0x1cc] ss:$16 sps:$4 sm:$0xff]  }
 0x26d   :  { %v5217_v63 = vrot.slane %v11909_v60, 5  ;;  %v5219_v26 = vrot.slane %v11953_v40, 4  ;;  %3209 = vmatpush1.bf16.msra.mxu0 %v10221_v15  ;;  %3124 = vmatprep.subr.bf16.mxu1 %v10226_v53  ;;  %v5278_v50 = vsel %vm1782_vm6, %v5277_v9, %v5276_v61  ;;  %v5281_v31 = vrot.slane %v5211_v2, 1  ;;  %v12962_v53 = vld [vmem:[#allocation29_spill] sm:$0xff]  ;;  %v12964_v59 = vld [vmem:[#allocation36_spill] sm:$0xff] }
 0x26e   :  { %v5207_v43 = vunpack.c.l.b16 %v5098_v54  ;;  %v5214_v7 = vsel %vm1770_vm2, %v5213_v1, %v12961_v48  ;;  %3210 = vmatprep.subr.bf16.mxu0 %v10229_v44  ;;  %v5280_v19 = vsel %vm1785_vm7, %v5279_v6, %v5278_v50  ;;  %v5221_v60 = vrot.slane %v12932_v17, 3  ;;  %v10233_v17 = vld [vmem:[#allocation8 + $0x1a8] ss:$16 sps:$4 sm:$0xff]   ;;  %v10244_v61 = vld [vmem:[#allocation8 + $0x1e4] ss:$16 sps:$4 sm:$0xff]   ;;  %v12968_v48 = vld [vmem:[#allocation46_spill] sm:$0xff] }
 0x26f   :  { %v5216_v27 = vsel %vm1773_vm3, %v5215_v28, %v5214_v7  ;;  %v5223_v40 = vrot.slane %v12431_v57, 2  ;;  %v5282_v56 = vsel %vm1788_vm8, %v5281_v31, %v5280_v19  ;;  %v5210_v10 = vunpack.c.l.b16 %v5101_v55  ;;  %v10238_v57 = vld [vmem:[#allocation8 + $0x1c4] ss:$16 sps:$4 sm:$0xff]  }
 0x270   :  { %v5218_v62 = vsel %vm1776_vm4, %v5217_v63, %v5216_v27  ;;  %v5255_v52 = vrot.slane %v12064_v46, 7  ;;  %3125 = vmatpush1.bf16.msra.mxu1 %v10224_v23  ;;  %v12573_v36 = vpack.c.b16 %v5282_v56, %v5240_v37  ;;  %v5257_v39 = vrot.slane %v12070_v8, 6  ;;  %v12965_v6 = vld [vmem:[#allocation55_spill] sm:$0xff] }
 0x271   :  { %v5220_v5 = vsel %vm1779_vm5, %v5219_v26, %v5218_v62  ;;  %v5259_v21 = vrot.slane %v12078_v35, 5  ;;  %3211 = vmatpush1.bf16.msra.mxu0 %v10227_v38  ;;  %3126 = vmatprep.subr.bf16.mxu1 %v10232_v16  ;;  %v5225_v15 = vrot.slane %v5207_v43, 1  ;;  %v5079_v2 = vrot.slane %v12954_v11, %v12962_v53  ;;  %v12963_v35 = vld [vmem:[#allocation66_spill] sm:$0xff]  ;;  %v10239_v23 = vld [vmem:[#allocation8 + $0x1c8] ss:$16 sps:$4 sm:$0xff]  }
 0x272   :  { %v5222_v18 = vsel %vm1782_vm6, %v5221_v60, %v5220_v5  ;;  %v5256_v46 = vsel %vm1770_vm2, %v5255_v52, %v12058_v0  ;;  %3212 = vmatprep.subr.bf16.mxu0 %v10235_v32  ;;  %v5261_v34 = vrot.slane %v12963_v35, 4  ;;  %v5263_v9 = vrot.slane %v12964_v59, 3  ;;  %v10236_v0 = vld [vmem:[#allocation8 + $0x1c0] ss:$16 sps:$4 sm:$0xff]   ;;  %v10247_v26 = vld [vmem:[#allocation8 + $0x1ec] ss:$16 sps:$4 sm:$0xff]  }
 0x273   :  { %v5224_v13 = vsel %vm1785_vm7, %v5223_v40, %v5222_v18  ;;  %v5258_v8 = vsel %vm1773_vm3, %v5257_v39, %v5256_v46  ;;  %v5265_v24 = vrot.slane %v12965_v6, 2  ;;  %v5091_v54 = vrot.slane %v12960_v25, %v12962_v53  ;;  %v12966_v16 = vld [vmem:[#allocation42_spill] sm:$0xff]  ;;  %v12967_v25 = vld [vmem:[#allocation43_spill] sm:$0xff]  ;;  %v12970_v35 = vld [vmem:[#allocation41_spill] sm:$0xff] }
 0x274   :  { %v5226_v44 = vsel %vm1788_vm8, %v5225_v15, %v5224_v13  ;;  %v5260_v37 = vsel %vm1776_vm4, %v5259_v21, %v5258_v8  ;;  %3127 = vmatpush1.bf16.msra.mxu1 %v10230_v3  ;;  %v5100_v55 = vpack.c.bf16 %v5079_v2, %v5079_v2  ;;  %v5241_v1 = vrot.slane %v11896_v42, 7  ;;  %v10242_v32 = vld [vmem:[#allocation8 + $0x1e0] ss:$16 sps:$4 sm:$0xff]   ;;  %v10245_v56 = vld [vmem:[#allocation8 + $0x1e8] ss:$16 sps:$4 sm:$0xff]  }
 0x275   :  { %v5262_v11 = vsel %vm1779_vm5, %v5261_v34, %v5260_v37  ;;  %3213 = vmatpush1.bf16.msra.mxu0 %v10233_v17  ;;  %3128 = vmatprep.subr.bf16.mxu1 %v10238_v57  ;;  %v5267_v63 = vrot.slane %v5210_v10, 1  ;;  %v5243_v43 = vrot.slane %v12967_v25, 6  ;;  %v5245_v42 = vrot.slane %v12968_v48, 5  ;;  %v10250_v10 = vld [vmem:[#allocation8 + $0x204] ss:$16 sps:$4 sm:$0xff]   ;;  %v12969_v46 = vld [vmem:[#allocation62_spill] sm:$0xff] }
 0x276   :  { %v5264_v28 = vsel %vm1782_vm6, %v5263_v9, %v5262_v11  ;;  %3214 = vmatprep.subr.bf16.mxu0 %v10241_v47  ;;  %v5242_v50 = vsel %vm1770_vm2, %v5241_v1, %v12966_v16  ;;  %v5247_v7 = vrot.slane %v12957_v41, 4  ;;  %v5103_v27 = vpack.c.bf16 %v5091_v54, %v5091_v54  ;;  %v10253_v3 = vld [vmem:[#allocation8 + $0x20c] ss:$16 sps:$4 sm:$0xff]   ;;  %v10248_v57 = vld [vmem:[#allocation8 + $0x200] ss:$16 sps:$4 sm:$0xff]  }
 0x277   :  { %v5266_v38 = vsel %vm1785_vm7, %v5265_v24, %v5264_v28  ;;  %v5209_v60 = vunpack.c.l.b16 %v5100_v55  ;;  %v5249_v40 = vrot.slane %v12943_v4, 3  ;;  %v5244_v62 = vsel %vm1773_vm3, %v5243_v43, %v5242_v50  ;;  %v10256_v2 = vld [vmem:[#allocation8 + $0x224] ss:$16 sps:$4 sm:$0xff]   ;;  %v10254_v37 = vld [vmem:[#allocation8 + $0x220] ss:$16 sps:$4 sm:$0xff]  }
 0x278   :  { %v5268_v31 = vsel %vm1788_vm8, %v5267_v63, %v5266_v38  ;;  %3129 = vmatpush1.bf16.msra.mxu1 %v10236_v0  ;;  %v5251_v52 = vrot.slane %v12456_v33, 2  ;;  %v5246_v41 = vsel %vm1776_vm4, %v5245_v42, %v5244_v62  ;;  %v5283_v5 = vrot.slane %v12958_v45, 7  ;;  %v10251_v45 = vld [vmem:[#allocation8 + $0x208] ss:$16 sps:$4 sm:$0xff]   ;;  %v10262_v24 = vld [vmem:[#allocation8 + $0x244] ss:$16 sps:$4 sm:$0xff]  }
 0x279   :  { %v12602_v19 = vpack.c.b16 %v5268_v31, %v5226_v44  ;;  %3215 = vmatpush1.bf16.msra.mxu0 %v10239_v23  ;;  %3130 = vmatprep.subr.bf16.mxu1 %v10244_v61  ;;  %v5285_v39 = vrot.slane %v12076_v22, 6  ;;  %v5248_v21 = vsel %vm1779_vm5, %v5247_v7, %v5246_v41  ;;  %v5287_v4 = vrot.slane %v12099_v14, 5  ;;  %v10259_v14 = vld [vmem:[#allocation8 + $0x22c] ss:$16 sps:$4 sm:$0xff]   ;;  %v10257_v6 = vld [vmem:[#allocation8 + $0x228] ss:$16 sps:$4 sm:$0xff]  }
 0x27a   :  { %3216 = vmatprep.subr.bf16.mxu0 %v10247_v26  ;;  %v5289_v17 = vrot.slane %v12947_v29, 4  ;;  %v5212_v18 = vunpack.c.l.b16 %v5103_v27  ;;  %v5250_v15 = vsel %vm1782_vm6, %v5249_v40, %v5248_v21  ;;  %v5253_v33 = vrot.slane %v5209_v60, 1  ;;  %v10260_v55 = vld [vmem:[#allocation8 + $0x240] ss:$16 sps:$4 sm:$0xff]   ;;  %v10263_v1 = vld [vmem:[#allocation8 + $0x248] ss:$16 sps:$4 sm:$0xff]  }
 0x27b   :  { %v5284_v53 = vsel %vm1770_vm2, %v5283_v5, %v12969_v46  ;;  %v5252_v22 = vsel %vm1785_vm7, %v5251_v52, %v5250_v15  ;;  %v5291_v8 = vrot.slane %v12344_v30, 3  ;;  %v5293_v44 = vrot.slane %v12474_v20, 2  ;;  %v10265_v30 = vld [vmem:[#allocation8 + $0x24c] ss:$16 sps:$4 sm:$0xff]   ;;  %v10268_v23 = vld [vmem:[#allocation8 + $0x264] ss:$16 sps:$4 sm:$0xff]  }
 0x27c   :  { %3131 = vmatpush1.bf16.msra.mxu1 %v10242_v32  ;;  %v5286_v47 = vsel %vm1773_vm3, %v5285_v39, %v5284_v53  ;;  %v5254_v29 = vsel %vm1788_vm8, %v5253_v33, %v5252_v22  ;;  %v5295_v9 = vrot.slane %v5212_v18, 1  ;;  %v12971_v11 = vmov 0   ;;  %v10271_v61 = vld [vmem:[#allocation8 + $0x26c] ss:$16 sps:$4 sm:$0xff]   ;;  %v10266_v28 = vld [vmem:[#allocation8 + $0x260] ss:$16 sps:$4 sm:$0xff]  }
 0x27d   :  { %3217 = vmatpush1.bf16.msra.mxu0 %v10245_v56  ;;  %3143 = vmatprep.subr.bf16.mxu1 %v10250_v10  ;;  %v5288_v13 = vsel %vm1776_vm4, %v5287_v4, %v5286_v47  ;;  %v10269_v63 = vld [vmem:[#allocation8 + $0x268] ss:$16 sps:$4 sm:$0xff]   ;;  %v10274_v26 = vld [vmem:[#allocation8 + $0x284] ss:$16 sps:$4 sm:$0xff]   ;;  %v10277_v38 = vld [vmem:[#allocation8 + $0x28c] ss:$16 sps:$4 sm:$0xff]  }
 0x27e   :  { %3229 = vmatprep.subr.bf16.mxu0 %v10253_v3  ;;  %v5290_v34 = vsel %vm1779_vm5, %v5289_v17, %v5288_v13  ;;  %v10272_v16 = vld [vmem:[#allocation8 + $0x280] ss:$16 sps:$4 sm:$0xff]   ;;  %v10275_v50 = vld [vmem:[#allocation8 + $0x288] ss:$16 sps:$4 sm:$0xff]   ;;  %v10280_v31 = vld [vmem:[#allocation8 + $0x2a4] ss:$16 sps:$4 sm:$0xff]  }
 0x27f   :  { %3133 = vmatmul.mubr.bf16.vlgmr.msra.gmra.mrb[12].mxu1 %v12970_v35  ;;  %v5292_v59 = vsel %vm1782_vm6, %v5291_v8, %v5290_v34  ;;  %v10283_v25 = vld [vmem:[#allocation8 + $0x2ac] ss:$16 sps:$4 sm:$0xff]   ;;  %v10278_v43 = vld [vmem:[#allocation8 + $0x2a0] ss:$16 sps:$4 sm:$0xff]   ;;  %v10281_v48 = vld [vmem:[#allocation8 + $0x2a8] ss:$16 sps:$4 sm:$0xff]  }
 0x280   :  { %3219 = vmatmul.mubr.bf16.vlgmr.msra.gmra.mrb[24].mxu0 %v12970_v35  ;;  %3144 = vmatpush1.bf16.msra.mxu1 %v10248_v57  ;;  %v5294_v0 = vsel %vm1785_vm7, %v5293_v44, %v5292_v59  ;;  %v10286_v42 = vld [vmem:[#allocation8 + $0x2c4] ss:$16 sps:$4 sm:$0xff]   ;;  %v10289_v7 = vld [vmem:[#allocation8 + $0x2cc] ss:$16 sps:$4 sm:$0xff]   ;;  %v10284_v32 = vld [vmem:[#allocation8 + $0x2c0] ss:$16 sps:$4 sm:$0xff]  }
 0x281   :  { %3230 = vmatpush1.bf16.msra.mxu0 %v10251_v45  ;;  %3145 = vmatprep.subr.bf16.mxu1 %v10256_v2  ;;  %v5296_v54 = vsel %vm1788_vm8, %v5295_v9, %v5294_v0  ;;  %v10287_v27 = vld [vmem:[#allocation8 + $0x2c8] ss:$16 sps:$4 sm:$0xff]   ;;  %v10292_v60 = vld [vmem:[#allocation8 + $0x2e4] ss:$16 sps:$4 sm:$0xff]   ;;  %v10295_v40 = vld [vmem:[#allocation8 + $0x2ec] ss:$16 sps:$4 sm:$0xff]  }
 0x282   :  { %3231 = vmatprep.subr.bf16.mxu0 %v10259_v14  ;;  %3175 = vmatprep.mubr.bf16.mxu1 %v12971_v11  ;;  %v12630_v20 = vpack.c.b16 %v5296_v54, %v5254_v29  ;;  %v10290_v56 = vld [vmem:[#allocation8 + $0x2e0] ss:$16 sps:$4 sm:$0xff]   ;;  %v10293_v10 = vld [vmem:[#allocation8 + $0x2e8] ss:$16 sps:$4 sm:$0xff]   ;;  %v10298_v62 = vld [vmem:[#allocation8 + $0x604] ss:$16 sps:$4 sm:$0xff]  }
 0x283   :  { %3261 = vmatprep.mubr.bf16.mxu0 %v12971_v11  ;;  %v10301_v52 = vld [vmem:[#allocation8 + $0x60c] ss:$16 sps:$4 sm:$0xff]   ;;  %v10296_v3 = vld [vmem:[#allocation8 + $0x600] ss:$16 sps:$4 sm:$0xff]   ;;  %v10299_v41 = vld [vmem:[#allocation8 + $0x608] ss:$16 sps:$4 sm:$0xff]  }
 0x284   :  { %3146 = vmatpush1.bf16.msra.mxu1 %v10254_v37  ;;  %v10304_v5 = vld [vmem:[#allocation8 + $0x624] ss:$16 sps:$4 sm:$0xff]   ;;  %v10307_v21 = vld [vmem:[#allocation8 + $0x62c] ss:$16 sps:$4 sm:$0xff]   ;;  %v10302_v4 = vld [vmem:[#allocation8 + $0x620] ss:$16 sps:$4 sm:$0xff]  }
 0x285   :  { %3232 = vmatpush1.bf16.msra.mxu0 %v10257_v6  ;;  %3147 = vmatprep.subr.bf16.mxu1 %v10262_v24  ;;  %v12972_v39 = vld [vmem:[#allocation59_spill] sm:$0xff]  ;;  %v10313_v15 = vld [vmem:[#allocation8 + $0x64c] ss:$16 sps:$4 sm:$0xff]   ;;  %v10308_v33 = vld [vmem:[#allocation8 + $0x640] ss:$16 sps:$4 sm:$0xff]  }
 0x286   :  { %3233 = vmatprep.subr.bf16.mxu0 %v10265_v30  ;;  %v12973_v17 = vld [vmem:[#allocation31_spill] sm:$0xff]  ;;  %v10319_v45 = vld [vmem:[#allocation8 + $0x66c] ss:$16 sps:$4 sm:$0xff]   ;;  %v10314_v2 = vld [vmem:[#allocation8 + $0x660] ss:$16 sps:$4 sm:$0xff]  }
 0x287   :  { %v10305_v57 = vld [vmem:[#allocation8 + $0x628] ss:$16 sps:$4 sm:$0xff]   ;;  %v10310_v18 = vld [vmem:[#allocation8 + $0x644] ss:$16 sps:$4 sm:$0xff]   ;;  %v10325_v14 = vld [vmem:[#allocation8 + $0x68c] ss:$16 sps:$4 sm:$0xff]  }
 0x288   :  { %3148 = vmatpush1.bf16.msra.mxu1 %v10260_v55  ;;  %v10311_v46 = vld [vmem:[#allocation8 + $0x648] ss:$16 sps:$4 sm:$0xff]   ;;  %v10316_v53 = vld [vmem:[#allocation8 + $0x664] ss:$16 sps:$4 sm:$0xff]   ;;  %v10320_v29 = vld [vmem:[#allocation8 + $0x680] ss:$16 sps:$4 sm:$0xff]  }
 0x289   :  { %3234 = vmatpush1.bf16.msra.mxu0 %v10263_v1  ;;  %3149 = vmatprep.subr.bf16.mxu1 %v10268_v23  ;;  %v10317_v22 = vld [vmem:[#allocation8 + $0x668] ss:$16 sps:$4 sm:$0xff]   ;;  %v10322_v47 = vld [vmem:[#allocation8 + $0x684] ss:$16 sps:$4 sm:$0xff]   ;;  %v10331_v35 = vld [vmem:[#allocation8 + $0x6ac] ss:$16 sps:$4 sm:$0xff]  }
 0x28a   :  { %3235 = vmatprep.subr.bf16.mxu0 %v10271_v61  ;;  %v10323_v13 = vld [vmem:[#allocation8 + $0x688] ss:$16 sps:$4 sm:$0xff]   ;;  %v10328_v8 = vld [vmem:[#allocation8 + $0x6a4] ss:$16 sps:$4 sm:$0xff]   ;;  %v10326_v34 = vld [vmem:[#allocation8 + $0x6a0] ss:$16 sps:$4 sm:$0xff]  }
 0x28b   :  { %v10329_v44 = vld [vmem:[#allocation8 + $0x6a8] ss:$16 sps:$4 sm:$0xff]   ;;  %v10334_v37 = vld [vmem:[#allocation8 + $0x6c4] ss:$16 sps:$4 sm:$0xff]   ;;  %v10337_v59 = vld [vmem:[#allocation8 + $0x6cc] ss:$16 sps:$4 sm:$0xff]  }
 0x28c   :  { %3150 = vmatpush1.bf16.msra.mxu1 %v10266_v28  ;;  %v10332_v9 = vld [vmem:[#allocation8 + $0x6c0] ss:$16 sps:$4 sm:$0xff]   ;;  %v10335_v6 = vld [vmem:[#allocation8 + $0x6c8] ss:$16 sps:$4 sm:$0xff]   ;;  %v10340_v24 = vld [vmem:[#allocation8 + $0x6e4] ss:$16 sps:$4 sm:$0xff]  }
 0x28d   :  { %3236 = vmatpush1.bf16.msra.mxu0 %v10269_v63  ;;  %3151 = vmatprep.subr.bf16.mxu1 %v10274_v26  ;;  %v10343_v0 = vld [vmem:[#allocation8 + $0x6ec] ss:$16 sps:$4 sm:$0xff]   ;;  %v10338_v30 = vld [vmem:[#allocation8 + $0x6e0] ss:$16 sps:$4 sm:$0xff]   ;;  %v10341_v54 = vld [vmem:[#allocation8 + $0x6e8] ss:$16 sps:$4 sm:$0xff]  }
 0x28e   :  { %3237 = vmatprep.subr.bf16.mxu0 %v10277_v38  ;;  %v10346_v55 = vld [vmem:[#allocation8 + $0x704] ss:$16 sps:$4 sm:$0xff]   ;;  %v10349_v1 = vld [vmem:[#allocation8 + $0x70c] ss:$16 sps:$4 sm:$0xff]   ;;  %v10344_v23 = vld [vmem:[#allocation8 + $0x700] ss:$16 sps:$4 sm:$0xff]  }
 0x28f   :  { %v10347_v61 = vld [vmem:[#allocation8 + $0x708] ss:$16 sps:$4 sm:$0xff]   ;;  %v10352_v28 = vld [vmem:[#allocation8 + $0x724] ss:$16 sps:$4 sm:$0xff]   ;;  %v10355_v63 = vld [vmem:[#allocation8 + $0x72c] ss:$16 sps:$4 sm:$0xff]  }
 0x290   :  { %3152 = vmatpush1.bf16.msra.mxu1 %v10272_v16  ;;  %v10350_v26 = vld [vmem:[#allocation8 + $0x720] ss:$16 sps:$4 sm:$0xff]   ;;  %v10353_v38 = vld [vmem:[#allocation8 + $0x728] ss:$16 sps:$4 sm:$0xff]   ;;  %v10358_v16 = vld [vmem:[#allocation8 + $0x744] ss:$16 sps:$4 sm:$0xff]  }
 0x291   :  { %3238 = vmatpush1.bf16.msra.mxu0 %v10275_v50  ;;  %3153 = vmatprep.subr.bf16.mxu1 %v10280_v31  ;;  %v10361_v50 = vld [vmem:[#allocation8 + $0x74c] ss:$16 sps:$4 sm:$0xff]   ;;  %v10356_v31 = vld [vmem:[#allocation8 + $0x740] ss:$16 sps:$4 sm:$0xff]  }
 0x292   :  { %3239 = vmatprep.subr.bf16.mxu0 %v10283_v25  ;;  %v10359_v25 = vld [vmem:[#allocation8 + $0x748] ss:$16 sps:$4 sm:$0xff]  }
 0x294   :  { %3154 = vmatpush1.bf16.msra.mxu1 %v10278_v43  ;;  %v10364_v43 = vld [vmem:[#allocation8 + $0x764] ss:$16 sps:$4 sm:$0xff]  }
 0x295   :  { %3240 = vmatpush1.bf16.msra.mxu0 %v10281_v48  ;;  %3155 = vmatprep.subr.bf16.mxu1 %v10286_v42  ;;  %v10367_v48 = vld [vmem:[#allocation8 + $0x76c] ss:$16 sps:$4 sm:$0xff]   ;;  %v10362_v42 = vld [vmem:[#allocation8 + $0x760] ss:$16 sps:$4 sm:$0xff]  }
 0x296   :  { %3241 = vmatprep.subr.bf16.mxu0 %v10289_v7  ;;  %v10365_v7 = vld [vmem:[#allocation8 + $0x768] ss:$16 sps:$4 sm:$0xff]  }
 0x298   :  { %3156 = vmatpush1.bf16.msra.mxu1 %v10284_v32  ;;  %v10370_v32 = vld [vmem:[#allocation8 + $0x784] ss:$16 sps:$4 sm:$0xff]  }
 0x299   :  { %3242 = vmatpush1.bf16.msra.mxu0 %v10287_v27  ;;  %3157 = vmatprep.subr.bf16.mxu1 %v10292_v60  ;;  %v10373_v27 = vld [vmem:[#allocation8 + $0x78c] ss:$16 sps:$4 sm:$0xff]   ;;  %v10368_v60 = vld [vmem:[#allocation8 + $0x780] ss:$16 sps:$4 sm:$0xff]  }
 0x29a   :  { %3243 = vmatprep.subr.bf16.mxu0 %v10295_v40  ;;  %v10371_v40 = vld [vmem:[#allocation8 + $0x788] ss:$16 sps:$4 sm:$0xff]  }
 0x29c   :  { %3158 = vmatpush1.bf16.msra.mxu1 %v10290_v56  ;;  %v10376_v56 = vld [vmem:[#allocation8 + $0x7a4] ss:$16 sps:$4 sm:$0xff]  }
 0x29d   :  { %3244 = vmatpush1.bf16.msra.mxu0 %v10293_v10  ;;  %3989 = vmatprep.subr.bf16.mxu1 %v10298_v62  ;;  %v10379_v10 = vld [vmem:[#allocation8 + $0x7ac] ss:$16 sps:$4 sm:$0xff]   ;;  %v10374_v62 = vld [vmem:[#allocation8 + $0x7a0] ss:$16 sps:$4 sm:$0xff]  }
 0x29e   :  { %4075 = vmatprep.subr.bf16.mxu0 %v10301_v52  ;;  %v10377_v52 = vld [vmem:[#allocation8 + $0x7a8] ss:$16 sps:$4 sm:$0xff]  }
 0x29f   :  { %3176 = vmatmul.mubr.bf16.vlgmr.msra.gmra.mrb[12].mxu1 %v12972_v39 }
 0x2a0   :  { %3262 = vmatmul.mubr.bf16.vlgmr.msra.gmra.mrb[24].mxu0 %v12972_v39  ;;  %3990 = vmatpush1.bf16.msra.mxu1 %v10296_v3  ;;  %v10382_v3 = vld [vmem:[#allocation8 + $0x7c4] ss:$16 sps:$4 sm:$0xff]   ;;  %v10383_v39 = vld [vmem:[#allocation8 + $0x7c8] ss:$16 sps:$4 sm:$0xff]  }
 0x2a1   :  { %4021 = vmatprep.mubr.bf16.mxu1 %v12973_v17  ;;  %4076 = vmatpush1.bf16.msra.mxu0 %v10299_v41  ;;  %v10385_v41 = vld [vmem:[#allocation8 + $0x7cc] ss:$16 sps:$4 sm:$0xff]  }
 0x2a2   :  { %4107 = vmatprep.mubr.bf16.mxu0 %v12973_v17  ;;  %3991 = vmatprep.subr.bf16.mxu1 %v10304_v5  ;;  %v10380_v5 = vld [vmem:[#allocation8 + $0x7c0] ss:$16 sps:$4 sm:$0xff]  }
 0x2a3   :  { %4077 = vmatprep.subr.bf16.mxu0 %v10307_v21  ;;  %v10388_v21 = vld [vmem:[#allocation8 + $0x7e4] ss:$16 sps:$4 sm:$0xff]   ;;  %v10386_v17 = vld [vmem:[#allocation8 + $0x7e0] ss:$16 sps:$4 sm:$0xff]  }
 0x2a4   :  { %3992 = vmatpush1.bf16.msra.mxu1 %v10302_v4  ;;  %v10391_v4 = vld [vmem:[#allocation8 + $0x7ec] ss:$16 sps:$4 sm:$0xff]  }
 0x2a5   :  { %4078 = vmatpush1.bf16.msra.mxu0 %v10305_v57  ;;  %3993 = vmatprep.subr.bf16.mxu1 %v10310_v18  ;;  %v10389_v57 = vld [vmem:[#allocation8 + $0x7e8] ss:$16 sps:$4 sm:$0xff]   ;;  %v10394_v18 = vld [vmem:[#allocation8 + $0x804] ss:$16 sps:$4 sm:$0xff]  }
 0x2a6   :  { %4079 = vmatprep.subr.bf16.mxu0 %v10313_v15  ;;  %v10397_v15 = vld [vmem:[#allocation8 + $0x80c] ss:$16 sps:$4 sm:$0xff]  }
 0x2a8   :  { %3994 = vmatpush1.bf16.msra.mxu1 %v10308_v33  ;;  %v10392_v33 = vld [vmem:[#allocation8 + $0x800] ss:$16 sps:$4 sm:$0xff]  }
 0x2a9   :  { %4080 = vmatpush1.bf16.msra.mxu0 %v10311_v46  ;;  %3995 = vmatprep.subr.bf16.mxu1 %v10316_v53  ;;  %v10395_v46 = vld [vmem:[#allocation8 + $0x808] ss:$16 sps:$4 sm:$0xff]   ;;  %v10400_v53 = vld [vmem:[#allocation8 + $0x824] ss:$16 sps:$4 sm:$0xff]  }
 0x2aa   :  { %4081 = vmatprep.subr.bf16.mxu0 %v10319_v45  ;;  %v10403_v45 = vld [vmem:[#allocation8 + $0x82c] ss:$16 sps:$4 sm:$0xff]  }
 0x2ac   :  { %3996 = vmatpush1.bf16.msra.mxu1 %v10314_v2  ;;  %v12974_v2 = vld [vmem:[#allocation56_spill] sm:$0xff] }
 0x2ad   :  { %4082 = vmatpush1.bf16.msra.mxu0 %v10317_v22  ;;  %3997 = vmatprep.subr.bf16.mxu1 %v10322_v47  ;;  %v10398_v22 = vld [vmem:[#allocation8 + $0x820] ss:$16 sps:$4 sm:$0xff]   ;;  %v10401_v47 = vld [vmem:[#allocation8 + $0x828] ss:$16 sps:$4 sm:$0xff]  }
 0x2ae   :  { %4083 = vmatprep.subr.bf16.mxu0 %v10325_v14  ;;  %v10406_v14 = vld [vmem:[#allocation8 + $0x844] ss:$16 sps:$4 sm:$0xff]  }
 0x2b0   :  { %3998 = vmatpush1.bf16.msra.mxu1 %v10320_v29  ;;  %v10409_v29 = vld [vmem:[#allocation8 + $0x84c] ss:$16 sps:$4 sm:$0xff]  }
 0x2b1   :  { %4084 = vmatpush1.bf16.msra.mxu0 %v10323_v13  ;;  %3999 = vmatprep.subr.bf16.mxu1 %v10328_v8  ;;  %v10404_v13 = vld [vmem:[#allocation8 + $0x840] ss:$16 sps:$4 sm:$0xff]   ;;  %v10407_v8 = vld [vmem:[#allocation8 + $0x848] ss:$16 sps:$4 sm:$0xff]  }
 0x2b2   :  { %4085 = vmatprep.subr.bf16.mxu0 %v10331_v35  ;;  %v10412_v35 = vld [vmem:[#allocation8 + $0x864] ss:$16 sps:$4 sm:$0xff]  }
 0x2b4   :  { %4000 = vmatpush1.bf16.msra.mxu1 %v10326_v34  ;;  %v10415_v34 = vld [vmem:[#allocation8 + $0x86c] ss:$16 sps:$4 sm:$0xff]  }
 0x2b5   :  { %4086 = vmatpush1.bf16.msra.mxu0 %v10329_v44  ;;  %4001 = vmatprep.subr.bf16.mxu1 %v10334_v37  ;;  %v10410_v44 = vld [vmem:[#allocation8 + $0x860] ss:$16 sps:$4 sm:$0xff]   ;;  %v10413_v37 = vld [vmem:[#allocation8 + $0x868] ss:$16 sps:$4 sm:$0xff]  }
 0x2b6   :  { %4087 = vmatprep.subr.bf16.mxu0 %v10337_v59  ;;  %v10418_v59 = vld [vmem:[#allocation8 + $0x884] ss:$16 sps:$4 sm:$0xff]  }
 0x2b8   :  { %4002 = vmatpush1.bf16.msra.mxu1 %v10332_v9  ;;  %v10421_v9 = vld [vmem:[#allocation8 + $0x88c] ss:$16 sps:$4 sm:$0xff]  }
 0x2b9   :  { %4088 = vmatpush1.bf16.msra.mxu0 %v10335_v6  ;;  %4003 = vmatprep.subr.bf16.mxu1 %v10340_v24  ;;  %v10416_v6 = vld [vmem:[#allocation8 + $0x880] ss:$16 sps:$4 sm:$0xff]   ;;  %v10419_v24 = vld [vmem:[#allocation8 + $0x888] ss:$16 sps:$4 sm:$0xff]  }
 0x2ba   :  { %4089 = vmatprep.subr.bf16.mxu0 %v10343_v0  ;;  %v10424_v0 = vld [vmem:[#allocation8 + $0x8a4] ss:$16 sps:$4 sm:$0xff]  }
 0x2bc   :  { %4004 = vmatpush1.bf16.msra.mxu1 %v10338_v30  ;;  %v10427_v30 = vld [vmem:[#allocation8 + $0x8ac] ss:$16 sps:$4 sm:$0xff]  }
 0x2bd   :  { %4090 = vmatpush1.bf16.msra.mxu0 %v10341_v54  ;;  %4005 = vmatprep.subr.bf16.mxu1 %v10346_v55  ;;  %v10422_v54 = vld [vmem:[#allocation8 + $0x8a0] ss:$16 sps:$4 sm:$0xff]   ;;  %v10425_v55 = vld [vmem:[#allocation8 + $0x8a8] ss:$16 sps:$4 sm:$0xff]  }
 0x2be   :  { %4091 = vmatprep.subr.bf16.mxu0 %v10349_v1  ;;  %v10430_v1 = vld [vmem:[#allocation8 + $0x8c4] ss:$16 sps:$4 sm:$0xff]  }
 0x2c0   :  { %4006 = vmatpush1.bf16.msra.mxu1 %v10344_v23  ;;  %v10433_v23 = vld [vmem:[#allocation8 + $0x8cc] ss:$16 sps:$4 sm:$0xff]  }
 0x2c1   :  { %4092 = vmatpush1.bf16.msra.mxu0 %v10347_v61  ;;  %4007 = vmatprep.subr.bf16.mxu1 %v10352_v28  ;;  %v10428_v61 = vld [vmem:[#allocation8 + $0x8c0] ss:$16 sps:$4 sm:$0xff]   ;;  %v10431_v28 = vld [vmem:[#allocation8 + $0x8c8] ss:$16 sps:$4 sm:$0xff]  }
 0x2c2   :  { %4093 = vmatprep.subr.bf16.mxu0 %v10355_v63  ;;  %v10436_v63 = vld [vmem:[#allocation8 + $0x8e4] ss:$16 sps:$4 sm:$0xff]  }
 0x2c4   :  { %4008 = vmatpush1.bf16.msra.mxu1 %v10350_v26  ;;  %v10439_v26 = vld [vmem:[#allocation8 + $0x8ec] ss:$16 sps:$4 sm:$0xff]  }
 0x2c5   :  { %4094 = vmatpush1.bf16.msra.mxu0 %v10353_v38  ;;  %4009 = vmatprep.subr.bf16.mxu1 %v10358_v16  ;;  %v10434_v38 = vld [vmem:[#allocation8 + $0x8e0] ss:$16 sps:$4 sm:$0xff]   ;;  %v10437_v16 = vld [vmem:[#allocation8 + $0x8e8] ss:$16 sps:$4 sm:$0xff]  }
 0x2c6   :  { %4095 = vmatprep.subr.bf16.mxu0 %v10361_v50  ;;  %v10442_v50 = vld [vmem:[#allocation8 + $0x904] ss:$16 sps:$4 sm:$0xff]  }
 0x2c8   :  { %4010 = vmatpush1.bf16.msra.mxu1 %v10356_v31  ;;  %v10445_v31 = vld [vmem:[#allocation8 + $0x90c] ss:$16 sps:$4 sm:$0xff]  }
 0x2c9   :  { %4096 = vmatpush1.bf16.msra.mxu0 %v10359_v25  ;;  %4011 = vmatprep.subr.bf16.mxu1 %v10364_v43  ;;  %v10440_v25 = vld [vmem:[#allocation8 + $0x900] ss:$16 sps:$4 sm:$0xff]   ;;  %v10443_v43 = vld [vmem:[#allocation8 + $0x908] ss:$16 sps:$4 sm:$0xff]  }
 0x2ca   :  { %4097 = vmatprep.subr.bf16.mxu0 %v10367_v48  ;;  %v10448_v48 = vld [vmem:[#allocation8 + $0x924] ss:$16 sps:$4 sm:$0xff]  }
 0x2cc   :  { %4012 = vmatpush1.bf16.msra.mxu1 %v10362_v42  ;;  %v12975_v42 = vld [vmem:[#allocation51_spill] sm:$0xff] }
 0x2cd   :  { %4098 = vmatpush1.bf16.msra.mxu0 %v10365_v7  ;;  %4013 = vmatprep.subr.bf16.mxu1 %v10370_v32  ;;  %v10451_v7 = vld [vmem:[#allocation8 + $0x92c] ss:$16 sps:$4 sm:$0xff]   ;;  %v10446_v32 = vld [vmem:[#allocation8 + $0x920] ss:$16 sps:$4 sm:$0xff]  }
 0x2ce   :  { %4099 = vmatprep.subr.bf16.mxu0 %v10373_v27  ;;  %v12976_v27 = vld [vmem:[#allocation37_spill] sm:$0xff] }
 0x2d0   :  { %4014 = vmatpush1.bf16.msra.mxu1 %v10368_v60  ;;  %v10449_v60 = vld [vmem:[#allocation8 + $0x928] ss:$16 sps:$4 sm:$0xff]  }
 0x2d1   :  { %4100 = vmatpush1.bf16.msra.mxu0 %v10371_v40  ;;  %4015 = vmatprep.subr.bf16.mxu1 %v10376_v56  ;;  %v10454_v40 = vld [vmem:[#allocation8 + $0x944] ss:$16 sps:$4 sm:$0xff]   ;;  %v10457_v56 = vld [vmem:[#allocation8 + $0x94c] ss:$16 sps:$4 sm:$0xff]  }
 0x2d2   :  { %4101 = vmatprep.subr.bf16.mxu0 %v10379_v10  ;;  %v10452_v10 = vld [vmem:[#allocation8 + $0x940] ss:$16 sps:$4 sm:$0xff]  }
 0x2d4   :  { %4016 = vmatpush1.bf16.msra.mxu1 %v10374_v62  ;;  %v10455_v62 = vld [vmem:[#allocation8 + $0x948] ss:$16 sps:$4 sm:$0xff]  }
 0x2d5   :  { %4102 = vmatpush1.bf16.msra.mxu0 %v10377_v52  ;;  %4017 = vmatprep.subr.bf16.mxu1 %v10382_v3  ;;  %v10460_v52 = vld [vmem:[#allocation8 + $0x964] ss:$16 sps:$4 sm:$0xff]   ;;  %v10463_v3 = vld [vmem:[#allocation8 + $0x96c] ss:$16 sps:$4 sm:$0xff]  }
 0x2d6   :  { %4103 = vmatprep.subr.bf16.mxu0 %v10385_v41  ;;  %v10458_v41 = vld [vmem:[#allocation8 + $0x960] ss:$16 sps:$4 sm:$0xff]  }
 0x2d8   :  { %4018 = vmatpush1.bf16.msra.mxu1 %v10380_v5  ;;  %v10461_v5 = vld [vmem:[#allocation8 + $0x968] ss:$16 sps:$4 sm:$0xff]  }
 0x2d9   :  { %4104 = vmatpush1.bf16.msra.mxu0 %v10383_v39  ;;  %4019 = vmatprep.subr.bf16.mxu1 %v10388_v21  ;;  %v10466_v39 = vld [vmem:[#allocation8 + $0x984] ss:$16 sps:$4 sm:$0xff]   ;;  %v10469_v21 = vld [vmem:[#allocation8 + $0x98c] ss:$16 sps:$4 sm:$0xff]  }
 0x2da   :  { %4105 = vmatprep.subr.bf16.mxu0 %v10391_v4  ;;  %v10464_v4 = vld [vmem:[#allocation8 + $0x980] ss:$16 sps:$4 sm:$0xff]  }
 0x2dc   :  { %4020 = vmatpush1.bf16.msra.mxu1 %v10386_v17  ;;  %v10467_v17 = vld [vmem:[#allocation8 + $0x988] ss:$16 sps:$4 sm:$0xff]  }
 0x2dd   :  { %4106 = vmatpush1.bf16.msra.mxu0 %v10389_v57  ;;  %4032 = vmatprep.subr.bf16.mxu1 %v10394_v18  ;;  %v10472_v57 = vld [vmem:[#allocation8 + $0x9a4] ss:$16 sps:$4 sm:$0xff]   ;;  %v10475_v18 = vld [vmem:[#allocation8 + $0x9ac] ss:$16 sps:$4 sm:$0xff]  }
 0x2de   :  { %4118 = vmatprep.subr.bf16.mxu0 %v10397_v15  ;;  %v10470_v15 = vld [vmem:[#allocation8 + $0x9a0] ss:$16 sps:$4 sm:$0xff]  }
 0x2df   :  { %4022 = vmatmul.mubr.bf16.vlgmr.msra.gmra.mrb[12].mxu1 %v12974_v2 }
 0x2e0   :  { %4108 = vmatmul.mubr.bf16.vlgmr.msra.gmra.mrb[24].mxu0 %v12974_v2  ;;  %4033 = vmatpush1.bf16.msra.mxu1 %v10392_v33  ;;  %v10473_v33 = vld [vmem:[#allocation8 + $0x9a8] ss:$16 sps:$4 sm:$0xff]  }
 0x2e1   :  { %4119 = vmatpush1.bf16.msra.mxu0 %v10395_v46  ;;  %4034 = vmatprep.subr.bf16.mxu1 %v10400_v53  ;;  %v10478_v46 = vld [vmem:[#allocation8 + $0x9c4] ss:$16 sps:$4 sm:$0xff]   ;;  %v10481_v53 = vld [vmem:[#allocation8 + $0x9cc] ss:$16 sps:$4 sm:$0xff]   ;;  %v10479_v2 = vld [vmem:[#allocation8 + $0x9c8] ss:$16 sps:$4 sm:$0xff]  }
 0x2e2   :  { %4120 = vmatprep.subr.bf16.mxu0 %v10403_v45  ;;  %4064 = vmatprep.mubr.bf16.mxu1 %v12971_v11  ;;  %v10476_v45 = vld [vmem:[#allocation8 + $0x9c0] ss:$16 sps:$4 sm:$0xff]  }
 0x2e3   :  { %4150 = vmatprep.mubr.bf16.mxu0 %v12971_v11 }
 0x2e4   :  { %4035 = vmatpush1.bf16.msra.mxu1 %v10398_v22  ;;  %v10484_v22 = vld [vmem:[#allocation8 + $0x9e4] ss:$16 sps:$4 sm:$0xff]  }
 0x2e5   :  { %4121 = vmatpush1.bf16.msra.mxu0 %v10401_v47  ;;  %4036 = vmatprep.subr.bf16.mxu1 %v10406_v14  ;;  %v10487_v47 = vld [vmem:[#allocation8 + $0x9ec] ss:$16 sps:$4 sm:$0xff]   ;;  %v10482_v14 = vld [vmem:[#allocation8 + $0x9e0] ss:$16 sps:$4 sm:$0xff]  }
 0x2e6   :  { %4122 = vmatprep.subr.bf16.mxu0 %v10409_v29  ;;  %v10485_v29 = vld [vmem:[#allocation8 + $0x9e8] ss:$16 sps:$4 sm:$0xff]  }
 0x2e8   :  { %4037 = vmatpush1.bf16.msra.mxu1 %v10404_v13  ;;  %v10490_v13 = vld [vmem:[#allocation8 + $0xa04] ss:$16 sps:$4 sm:$0xff]  }
 0x2e9   :  { %4123 = vmatpush1.bf16.msra.mxu0 %v10407_v8  ;;  %4038 = vmatprep.subr.bf16.mxu1 %v10412_v35  ;;  %v10493_v8 = vld [vmem:[#allocation8 + $0xa0c] ss:$16 sps:$4 sm:$0xff]   ;;  %v10488_v35 = vld [vmem:[#allocation8 + $0xa00] ss:$16 sps:$4 sm:$0xff]  }
 0x2ea   :  { %4124 = vmatprep.subr.bf16.mxu0 %v10415_v34  ;;  %v10491_v34 = vld [vmem:[#allocation8 + $0xa08] ss:$16 sps:$4 sm:$0xff]  }
 0x2ec   :  { %4039 = vmatpush1.bf16.msra.mxu1 %v10410_v44  ;;  %v10496_v44 = vld [vmem:[#allocation8 + $0xa24] ss:$16 sps:$4 sm:$0xff]  }
 0x2ed   :  { %4125 = vmatpush1.bf16.msra.mxu0 %v10413_v37  ;;  %4040 = vmatprep.subr.bf16.mxu1 %v10418_v59  ;;  %v10499_v37 = vld [vmem:[#allocation8 + $0xa2c] ss:$16 sps:$4 sm:$0xff]   ;;  %v10494_v59 = vld [vmem:[#allocation8 + $0xa20] ss:$16 sps:$4 sm:$0xff]  }
 0x2ee   :  { %4126 = vmatprep.subr.bf16.mxu0 %v10421_v9  ;;  %v10497_v9 = vld [vmem:[#allocation8 + $0xa28] ss:$16 sps:$4 sm:$0xff]  }
 0x2f0   :  { %4041 = vmatpush1.bf16.msra.mxu1 %v10416_v6  ;;  %v10502_v6 = vld [vmem:[#allocation8 + $0xa44] ss:$16 sps:$4 sm:$0xff]  }
 0x2f1   :  { %4127 = vmatpush1.bf16.msra.mxu0 %v10419_v24  ;;  %4042 = vmatprep.subr.bf16.mxu1 %v10424_v0  ;;  %v10505_v24 = vld [vmem:[#allocation8 + $0xa4c] ss:$16 sps:$4 sm:$0xff]   ;;  %v10500_v0 = vld [vmem:[#allocation8 + $0xa40] ss:$16 sps:$4 sm:$0xff]  }
 0x2f2   :  { %4128 = vmatprep.subr.bf16.mxu0 %v10427_v30  ;;  %v10503_v30 = vld [vmem:[#allocation8 + $0xa48] ss:$16 sps:$4 sm:$0xff]  }
 0x2f4   :  { %4043 = vmatpush1.bf16.msra.mxu1 %v10422_v54  ;;  %v10508_v54 = vld [vmem:[#allocation8 + $0xa64] ss:$16 sps:$4 sm:$0xff]  }
 0x2f5   :  { %4129 = vmatpush1.bf16.msra.mxu0 %v10425_v55  ;;  %4044 = vmatprep.subr.bf16.mxu1 %v10430_v1  ;;  %v10511_v55 = vld [vmem:[#allocation8 + $0xa6c] ss:$16 sps:$4 sm:$0xff]   ;;  %v10506_v1 = vld [vmem:[#allocation8 + $0xa60] ss:$16 sps:$4 sm:$0xff]  }
 0x2f6   :  { %4130 = vmatprep.subr.bf16.mxu0 %v10433_v23  ;;  %v10509_v23 = vld [vmem:[#allocation8 + $0xa68] ss:$16 sps:$4 sm:$0xff]  }
 0x2f8   :  { %4045 = vmatpush1.bf16.msra.mxu1 %v10428_v61  ;;  %v10514_v61 = vld [vmem:[#allocation8 + $0xa84] ss:$16 sps:$4 sm:$0xff]  }
 0x2f9   :  { %4131 = vmatpush1.bf16.msra.mxu0 %v10431_v28  ;;  %4046 = vmatprep.subr.bf16.mxu1 %v10436_v63  ;;  %v10517_v28 = vld [vmem:[#allocation8 + $0xa8c] ss:$16 sps:$4 sm:$0xff]   ;;  %v10512_v63 = vld [vmem:[#allocation8 + $0xa80] ss:$16 sps:$4 sm:$0xff]  }
 0x2fa   :  { %4132 = vmatprep.subr.bf16.mxu0 %v10439_v26  ;;  %v10515_v26 = vld [vmem:[#allocation8 + $0xa88] ss:$16 sps:$4 sm:$0xff]  }
 0x2fc   :  { %4047 = vmatpush1.bf16.msra.mxu1 %v10434_v38  ;;  %v10520_v38 = vld [vmem:[#allocation8 + $0xaa4] ss:$16 sps:$4 sm:$0xff]  }
 0x2fd   :  { %4133 = vmatpush1.bf16.msra.mxu0 %v10437_v16  ;;  %4886 = vmatprep.subr.bf16.mxu1 %v10442_v50  ;;  %v10523_v16 = vld [vmem:[#allocation8 + $0xaac] ss:$16 sps:$4 sm:$0xff]   ;;  %v10518_v50 = vld [vmem:[#allocation8 + $0xaa0] ss:$16 sps:$4 sm:$0xff]  }
 0x2fe   :  { %4972 = vmatprep.subr.bf16.mxu0 %v10445_v31  ;;  %v10521_v31 = vld [vmem:[#allocation8 + $0xaa8] ss:$16 sps:$4 sm:$0xff]  }
 0x2ff   :  { %4065 = vmatmul.mubr.bf16.vlgmr.msra.gmra.mrb[12].mxu1 %v12975_v42 }
 0x300   :  { %4151 = vmatmul.mubr.bf16.vlgmr.msra.gmra.mrb[24].mxu0 %v12975_v42  ;;  %4887 = vmatpush1.bf16.msra.mxu1 %v10440_v25  ;;  %v10526_v25 = vld [vmem:[#allocation8 + $0xac4] ss:$16 sps:$4 sm:$0xff]   ;;  %v10527_v42 = vld [vmem:[#allocation8 + $0xac8] ss:$16 sps:$4 sm:$0xff]  }
 0x301   :  { %4918 = vmatprep.mubr.bf16.mxu1 %v12976_v27  ;;  %4973 = vmatpush1.bf16.msra.mxu0 %v10443_v43  ;;  %v10529_v43 = vld [vmem:[#allocation8 + $0xacc] ss:$16 sps:$4 sm:$0xff]  }
 0x302   :  { %5004 = vmatprep.mubr.bf16.mxu0 %v12976_v27  ;;  %4888 = vmatprep.subr.bf16.mxu1 %v10448_v48  ;;  %v10524_v48 = vld [vmem:[#allocation8 + $0xac0] ss:$16 sps:$4 sm:$0xff]  }
 0x303   :  { %4974 = vmatprep.subr.bf16.mxu0 %v10451_v7  ;;  %v10532_v7 = vld [vmem:[#allocation8 + $0xae4] ss:$16 sps:$4 sm:$0xff]   ;;  %v10530_v27 = vld [vmem:[#allocation8 + $0xae0] ss:$16 sps:$4 sm:$0xff]  }
 0x304   :  { %4889 = vmatpush1.bf16.msra.mxu1 %v10446_v32  ;;  %v10535_v32 = vld [vmem:[#allocation8 + $0xaec] ss:$16 sps:$4 sm:$0xff]  }
 0x305   :  { %4975 = vmatpush1.bf16.msra.mxu0 %v10449_v60  ;;  %4890 = vmatprep.subr.bf16.mxu1 %v10454_v40  ;;  %v10533_v60 = vld [vmem:[#allocation8 + $0xae8] ss:$16 sps:$4 sm:$0xff]   ;;  %v10538_v40 = vld [vmem:[#allocation8 + $0xb04] ss:$16 sps:$4 sm:$0xff]  }
 0x306   :  { %4976 = vmatprep.subr.bf16.mxu0 %v10457_v56  ;;  %v10541_v56 = vld [vmem:[#allocation8 + $0xb0c] ss:$16 sps:$4 sm:$0xff]  }
 0x308   :  { %4891 = vmatpush1.bf16.msra.mxu1 %v10452_v10  ;;  %v10536_v10 = vld [vmem:[#allocation8 + $0xb00] ss:$16 sps:$4 sm:$0xff]  }
 0x309   :  { %4977 = vmatpush1.bf16.msra.mxu0 %v10455_v62  ;;  %4892 = vmatprep.subr.bf16.mxu1 %v10460_v52  ;;  %v10539_v62 = vld [vmem:[#allocation8 + $0xb08] ss:$16 sps:$4 sm:$0xff]   ;;  %v10544_v52 = vld [vmem:[#allocation8 + $0xb24] ss:$16 sps:$4 sm:$0xff]  }
 0x30a   :  { %4978 = vmatprep.subr.bf16.mxu0 %v10463_v3  ;;  %v10547_v3 = vld [vmem:[#allocation8 + $0xb2c] ss:$16 sps:$4 sm:$0xff]  }
 0x30c   :  { %4893 = vmatpush1.bf16.msra.mxu1 %v10458_v41  ;;  %v10542_v41 = vld [vmem:[#allocation8 + $0xb20] ss:$16 sps:$4 sm:$0xff]  }
 0x30d   :  { %4979 = vmatpush1.bf16.msra.mxu0 %v10461_v5  ;;  %4894 = vmatprep.subr.bf16.mxu1 %v10466_v39  ;;  %v10545_v5 = vld [vmem:[#allocation8 + $0xb28] ss:$16 sps:$4 sm:$0xff]   ;;  %v10550_v39 = vld [vmem:[#allocation8 + $0xb44] ss:$16 sps:$4 sm:$0xff]  }
 0x30e   :  { %4980 = vmatprep.subr.bf16.mxu0 %v10469_v21  ;;  %v10553_v21 = vld [vmem:[#allocation8 + $0xb4c] ss:$16 sps:$4 sm:$0xff]  }
 0x310   :  { %4895 = vmatpush1.bf16.msra.mxu1 %v10464_v4  ;;  %v10548_v4 = vld [vmem:[#allocation8 + $0xb40] ss:$16 sps:$4 sm:$0xff]  }
 0x311   :  { %4981 = vmatpush1.bf16.msra.mxu0 %v10467_v17  ;;  %4896 = vmatprep.subr.bf16.mxu1 %v10472_v57  ;;  %v10551_v17 = vld [vmem:[#allocation8 + $0xb48] ss:$16 sps:$4 sm:$0xff]   ;;  %v10556_v57 = vld [vmem:[#allocation8 + $0xb64] ss:$16 sps:$4 sm:$0xff]  }
 0x312   :  { %4982 = vmatprep.subr.bf16.mxu0 %v10475_v18  ;;  %v10554_v18 = vld [vmem:[#allocation8 + $0xb60] ss:$16 sps:$4 sm:$0xff]  }
 0x314   :  { %4897 = vmatpush1.bf16.msra.mxu1 %v10470_v15  ;;  %v10557_v15 = vld [vmem:[#allocation8 + $0xb68] ss:$16 sps:$4 sm:$0xff]  }
 0x315   :  { %4983 = vmatpush1.bf16.msra.mxu0 %v10473_v33  ;;  %4898 = vmatprep.subr.bf16.mxu1 %v10478_v46  ;;  %v10562_v33 = vld [vmem:[#allocation8 + $0xb84] ss:$16 sps:$4 sm:$0xff]   ;;  %v10565_v46 = vld [vmem:[#allocation8 + $0xb8c] ss:$16 sps:$4 sm:$0xff]  }
 0x316   :  { %4984 = vmatprep.subr.bf16.mxu0 %v10481_v53  ;;  %v10560_v53 = vld [vmem:[#allocation8 + $0xb80] ss:$16 sps:$4 sm:$0xff]  }
 0x318   :  { %4899 = vmatpush1.bf16.msra.mxu1 %v10476_v45  ;;  %v10563_v45 = vld [vmem:[#allocation8 + $0xb88] ss:$16 sps:$4 sm:$0xff]  }
 0x319   :  { %4985 = vmatpush1.bf16.msra.mxu0 %v10479_v2  ;;  %4900 = vmatprep.subr.bf16.mxu1 %v10484_v22  ;;  %v10568_v2 = vld [vmem:[#allocation8 + $0xba4] ss:$16 sps:$4 sm:$0xff]   ;;  %v10571_v22 = vld [vmem:[#allocation8 + $0xbac] ss:$16 sps:$4 sm:$0xff]  }
 0x31a   :  { %4986 = vmatprep.subr.bf16.mxu0 %v10487_v47  ;;  %v10566_v47 = vld [vmem:[#allocation8 + $0xba0] ss:$16 sps:$4 sm:$0xff]  }
 0x31c   :  { %4901 = vmatpush1.bf16.msra.mxu1 %v10482_v14  ;;  %v10569_v14 = vld [vmem:[#allocation8 + $0xba8] ss:$16 sps:$4 sm:$0xff]  }
 0x31d   :  { %4987 = vmatpush1.bf16.msra.mxu0 %v10485_v29  ;;  %4902 = vmatprep.subr.bf16.mxu1 %v10490_v13  ;;  %v10574_v29 = vld [vmem:[#allocation8 + $0xbc4] ss:$16 sps:$4 sm:$0xff]   ;;  %v10577_v13 = vld [vmem:[#allocation8 + $0xbcc] ss:$16 sps:$4 sm:$0xff]  }
 0x31e   :  { %4988 = vmatprep.subr.bf16.mxu0 %v10493_v8  ;;  %v10572_v8 = vld [vmem:[#allocation8 + $0xbc0] ss:$16 sps:$4 sm:$0xff]  }
 0x320   :  { %4903 = vmatpush1.bf16.msra.mxu1 %v10488_v35  ;;  %v10575_v35 = vld [vmem:[#allocation8 + $0xbc8] ss:$16 sps:$4 sm:$0xff]  }
 0x321   :  { %4989 = vmatpush1.bf16.msra.mxu0 %v10491_v34  ;;  %4904 = vmatprep.subr.bf16.mxu1 %v10496_v44  ;;  %v10580_v34 = vld [vmem:[#allocation8 + $0xbe4] ss:$16 sps:$4 sm:$0xff]   ;;  %v10583_v44 = vld [vmem:[#allocation8 + $0xbec] ss:$16 sps:$4 sm:$0xff]  }
 0x322   :  { %4990 = vmatprep.subr.bf16.mxu0 %v10499_v37  ;;  %v10578_v37 = vld [vmem:[#allocation8 + $0xbe0] ss:$16 sps:$4 sm:$0xff]  }
 0x324   :  { %4905 = vmatpush1.bf16.msra.mxu1 %v10494_v59  ;;  %v10581_v59 = vld [vmem:[#allocation8 + $0xbe8] ss:$16 sps:$4 sm:$0xff]  }
 0x325   :  { %4991 = vmatpush1.bf16.msra.mxu0 %v10497_v9  ;;  %4906 = vmatprep.subr.bf16.mxu1 %v10502_v6  ;;  %v10586_v9 = vld [vmem:[#allocation8 + $0xc04] ss:$16 sps:$4 sm:$0xff]   ;;  %v10589_v6 = vld [vmem:[#allocation8 + $0xc0c] ss:$16 sps:$4 sm:$0xff]  }
 0x326   :  { %4992 = vmatprep.subr.bf16.mxu0 %v10505_v24  ;;  %v10584_v24 = vld [vmem:[#allocation8 + $0xc00] ss:$16 sps:$4 sm:$0xff]  }
 0x328   :  { %4907 = vmatpush1.bf16.msra.mxu1 %v10500_v0  ;;  %v10587_v0 = vld [vmem:[#allocation8 + $0xc08] ss:$16 sps:$4 sm:$0xff]  }
 0x329   :  { %4993 = vmatpush1.bf16.msra.mxu0 %v10503_v30  ;;  %4908 = vmatprep.subr.bf16.mxu1 %v10508_v54  ;;  %v10592_v30 = vld [vmem:[#allocation8 + $0xc24] ss:$16 sps:$4 sm:$0xff]   ;;  %v10595_v54 = vld [vmem:[#allocation8 + $0xc2c] ss:$16 sps:$4 sm:$0xff]  }
 0x32a   :  { %4994 = vmatprep.subr.bf16.mxu0 %v10511_v55  ;;  %v10590_v55 = vld [vmem:[#allocation8 + $0xc20] ss:$16 sps:$4 sm:$0xff]  }
 0x32c   :  { %4909 = vmatpush1.bf16.msra.mxu1 %v10506_v1  ;;  %v10593_v1 = vld [vmem:[#allocation8 + $0xc28] ss:$16 sps:$4 sm:$0xff]  }
 0x32d   :  { %4995 = vmatpush1.bf16.msra.mxu0 %v10509_v23  ;;  %4910 = vmatprep.subr.bf16.mxu1 %v10514_v61  ;;  %v10598_v23 = vld [vmem:[#allocation8 + $0xc44] ss:$16 sps:$4 sm:$0xff]   ;;  %v10601_v61 = vld [vmem:[#allocation8 + $0xc4c] ss:$16 sps:$4 sm:$0xff]  }
 0x32e   :  { %4996 = vmatprep.subr.bf16.mxu0 %v10517_v28  ;;  %v10596_v28 = vld [vmem:[#allocation8 + $0xc40] ss:$16 sps:$4 sm:$0xff]  }
 0x330   :  { %4911 = vmatpush1.bf16.msra.mxu1 %v10512_v63  ;;  %v10599_v63 = vld [vmem:[#allocation8 + $0xc48] ss:$16 sps:$4 sm:$0xff]  }
 0x331   :  { %4997 = vmatpush1.bf16.msra.mxu0 %v10515_v26  ;;  %4912 = vmatprep.subr.bf16.mxu1 %v10520_v38  ;;  %v10604_v26 = vld [vmem:[#allocation8 + $0xc64] ss:$16 sps:$4 sm:$0xff]   ;;  %v10602_v38 = vld [vmem:[#allocation8 + $0xc60] ss:$16 sps:$4 sm:$0xff]  }
 0x332   :  { %4998 = vmatprep.subr.bf16.mxu0 %v10523_v16  ;;  %v10605_v16 = vld [vmem:[#allocation8 + $0xc68] ss:$16 sps:$4 sm:$0xff]  }
 0x334   :  { %4913 = vmatpush1.bf16.msra.mxu1 %v10518_v50  ;;  %v10610_v50 = vld [vmem:[#allocation8 + $0xc84] ss:$16 sps:$4 sm:$0xff]  }
 0x335   :  { %4999 = vmatpush1.bf16.msra.mxu0 %v10521_v31  ;;  %4914 = vmatprep.subr.bf16.mxu1 %v10526_v25  ;;  %v10613_v31 = vld [vmem:[#allocation8 + $0xc8c] ss:$16 sps:$4 sm:$0xff]   ;;  %v10611_v25 = vld [vmem:[#allocation8 + $0xc88] ss:$16 sps:$4 sm:$0xff]  }
 0x336   :  { %5000 = vmatprep.subr.bf16.mxu0 %v10529_v43  ;;  %v10616_v43 = vld [vmem:[#allocation8 + $0xca4] ss:$16 sps:$4 sm:$0xff]  }
 0x338   :  { %4915 = vmatpush1.bf16.msra.mxu1 %v10524_v48  ;;  %v10619_v48 = vld [vmem:[#allocation8 + $0xcac] ss:$16 sps:$4 sm:$0xff]  }
 0x339   :  { %5001 = vmatpush1.bf16.msra.mxu0 %v10527_v42  ;;  %4916 = vmatprep.subr.bf16.mxu1 %v10532_v7  ;;  %v10614_v42 = vld [vmem:[#allocation8 + $0xca0] ss:$16 sps:$4 sm:$0xff]   ;;  %v10617_v7 = vld [vmem:[#allocation8 + $0xca8] ss:$16 sps:$4 sm:$0xff]  }
 0x33a   :  { %5002 = vmatprep.subr.bf16.mxu0 %v10535_v32  ;;  %v10622_v32 = vld [vmem:[#allocation8 + $0xcc4] ss:$16 sps:$4 sm:$0xff]  }
 0x33c   :  { %4917 = vmatpush1.bf16.msra.mxu1 %v10530_v27  ;;  %v10625_v27 = vld [vmem:[#allocation8 + $0xccc] ss:$16 sps:$4 sm:$0xff]  }
 0x33d   :  { %5003 = vmatpush1.bf16.msra.mxu0 %v10533_v60  ;;  %4929 = vmatprep.subr.bf16.mxu1 %v10538_v40  ;;  %v10620_v60 = vld [vmem:[#allocation8 + $0xcc0] ss:$16 sps:$4 sm:$0xff]   ;;  %v10623_v40 = vld [vmem:[#allocation8 + $0xcc8] ss:$16 sps:$4 sm:$0xff]  }
 0x33e   :  { %5015 = vmatprep.subr.bf16.mxu0 %v10541_v56  ;;  %v10628_v56 = vld [vmem:[#allocation8 + $0xce4] ss:$16 sps:$4 sm:$0xff]  }
 0x33f   :  { %4919 = vmatmul.mubr.bf16.vlgmr.msra.gmra.mrb[12].mxu1 %v12505_v12 }
 0x340   :  { %5005 = vmatmul.mubr.bf16.vlgmr.msra.gmra.mrb[24].mxu0 %v12505_v12  ;;  %4930 = vmatpush1.bf16.msra.mxu1 %v10536_v10  ;;  %v10559_v12 = vld [vmem:[#allocation8 + $0xb6c] ss:$16 sps:$4 sm:$0xff]  }
 0x341   :  { %5016 = vmatpush1.bf16.msra.mxu0 %v10539_v62  ;;  %4931 = vmatprep.subr.bf16.mxu1 %v10544_v52  ;;  %v10631_v10 = vld [vmem:[#allocation8 + $0xcec] ss:$16 sps:$4 sm:$0xff]   ;;  %v10626_v62 = vld [vmem:[#allocation8 + $0xce0] ss:$16 sps:$4 sm:$0xff]   ;;  %v10629_v52 = vld [vmem:[#allocation8 + $0xce8] ss:$16 sps:$4 sm:$0xff]  }
 0x342   :  { %5017 = vmatprep.subr.bf16.mxu0 %v10547_v3  ;;  %4961 = vmatprep.mubr.bf16.mxu1 %v12971_v11  ;;  %v10634_v3 = vld [vmem:[#allocation8 + $0xd04] ss:$16 sps:$4 sm:$0xff]  }
 0x343   :  { %5047 = vmatprep.mubr.bf16.mxu0 %v12971_v11 }
 0x344   :  { %4932 = vmatpush1.bf16.msra.mxu1 %v10542_v41  ;;  %v10637_v41 = vld [vmem:[#allocation8 + $0xd0c] ss:$16 sps:$4 sm:$0xff]  }
 0x345   :  { %5018 = vmatpush1.bf16.msra.mxu0 %v10545_v5  ;;  %4933 = vmatprep.subr.bf16.mxu1 %v10550_v39  ;;  %v10632_v5 = vld [vmem:[#allocation8 + $0xd00] ss:$16 sps:$4 sm:$0xff]   ;;  %v10635_v39 = vld [vmem:[#allocation8 + $0xd08] ss:$16 sps:$4 sm:$0xff]  }
 0x346   :  { %5019 = vmatprep.subr.bf16.mxu0 %v10553_v21  ;;  %v10640_v21 = vld [vmem:[#allocation8 + $0xd24] ss:$16 sps:$4 sm:$0xff]  }
 0x348   :  { %4934 = vmatpush1.bf16.msra.mxu1 %v10548_v4  ;;  %v10643_v4 = vld [vmem:[#allocation8 + $0xd2c] ss:$16 sps:$4 sm:$0xff]  }
 0x349   :  { %5020 = vmatpush1.bf16.msra.mxu0 %v10551_v17  ;;  %4935 = vmatprep.subr.bf16.mxu1 %v10556_v57  ;;  %v10638_v17 = vld [vmem:[#allocation8 + $0xd20] ss:$16 sps:$4 sm:$0xff]   ;;  %v10641_v57 = vld [vmem:[#allocation8 + $0xd28] ss:$16 sps:$4 sm:$0xff]  }
 0x34a   :  { %5021 = vmatprep.subr.bf16.mxu0 %v10559_v12  ;;  %v10646_v12 = vld [vmem:[#allocation8 + $0xd44] ss:$16 sps:$4 sm:$0xff]  }
 0x34c   :  { %4936 = vmatpush1.bf16.msra.mxu1 %v10554_v18  ;;  %v10649_v18 = vld [vmem:[#allocation8 + $0xd4c] ss:$16 sps:$4 sm:$0xff]  }
 0x34d   :  { %5022 = vmatpush1.bf16.msra.mxu0 %v10557_v15  ;;  %4937 = vmatprep.subr.bf16.mxu1 %v10562_v33  ;;  %v10644_v15 = vld [vmem:[#allocation8 + $0xd40] ss:$16 sps:$4 sm:$0xff]   ;;  %v10647_v33 = vld [vmem:[#allocation8 + $0xd48] ss:$16 sps:$4 sm:$0xff]  }
 0x34e   :  { %5023 = vmatprep.subr.bf16.mxu0 %v10565_v46  ;;  %v10652_v46 = vld [vmem:[#allocation8 + $0xd64] ss:$16 sps:$4 sm:$0xff]  }
 0x350   :  { %4938 = vmatpush1.bf16.msra.mxu1 %v10560_v53  ;;  %v10655_v53 = vld [vmem:[#allocation8 + $0xd6c] ss:$16 sps:$4 sm:$0xff]  }
 0x351   :  { %5024 = vmatpush1.bf16.msra.mxu0 %v10563_v45  ;;  %4939 = vmatprep.subr.bf16.mxu1 %v10568_v2  ;;  %v10650_v45 = vld [vmem:[#allocation8 + $0xd60] ss:$16 sps:$4 sm:$0xff]   ;;  %v10653_v2 = vld [vmem:[#allocation8 + $0xd68] ss:$16 sps:$4 sm:$0xff]  }
 0x352   :  { %5025 = vmatprep.subr.bf16.mxu0 %v10571_v22  ;;  %v10658_v22 = vld [vmem:[#allocation8 + $0xd84] ss:$16 sps:$4 sm:$0xff]  }
 0x354   :  { %4940 = vmatpush1.bf16.msra.mxu1 %v10566_v47  ;;  %v10661_v47 = vld [vmem:[#allocation8 + $0xd8c] ss:$16 sps:$4 sm:$0xff]  }
 0x355   :  { %5026 = vmatpush1.bf16.msra.mxu0 %v10569_v14  ;;  %4941 = vmatprep.subr.bf16.mxu1 %v10574_v29  ;;  %v10656_v14 = vld [vmem:[#allocation8 + $0xd80] ss:$16 sps:$4 sm:$0xff]   ;;  %v10659_v29 = vld [vmem:[#allocation8 + $0xd88] ss:$16 sps:$4 sm:$0xff]  }
 0x356   :  { %5027 = vmatprep.subr.bf16.mxu0 %v10577_v13  ;;  %v10664_v13 = vld [vmem:[#allocation8 + $0xda4] ss:$16 sps:$4 sm:$0xff]  }
 0x358   :  { %4942 = vmatpush1.bf16.msra.mxu1 %v10572_v8  ;;  %v10667_v8 = vld [vmem:[#allocation8 + $0xdac] ss:$16 sps:$4 sm:$0xff]  }
 0x359   :  { %5028 = vmatpush1.bf16.msra.mxu0 %v10575_v35  ;;  %4943 = vmatprep.subr.bf16.mxu1 %v10580_v34  ;;  %v10662_v35 = vld [vmem:[#allocation8 + $0xda0] ss:$16 sps:$4 sm:$0xff]   ;;  %v10665_v34 = vld [vmem:[#allocation8 + $0xda8] ss:$16 sps:$4 sm:$0xff]  }
 0x35a   :  { %5029 = vmatprep.subr.bf16.mxu0 %v10583_v44  ;;  %v10670_v44 = vld [vmem:[#allocation8 + $0xdc4] ss:$16 sps:$4 sm:$0xff]  }
 0x35c   :  { %4944 = vmatpush1.bf16.msra.mxu1 %v10578_v37  ;;  %v10673_v37 = vld [vmem:[#allocation8 + $0xdcc] ss:$16 sps:$4 sm:$0xff]  }
 0x35d   :  { %5030 = vmatpush1.bf16.msra.mxu0 %v10581_v59  ;;  %5783 = vmatprep.subr.bf16.mxu1 %v10586_v9  ;;  %v10668_v59 = vld [vmem:[#allocation8 + $0xdc0] ss:$16 sps:$4 sm:$0xff]   ;;  %v10671_v9 = vld [vmem:[#allocation8 + $0xdc8] ss:$16 sps:$4 sm:$0xff]  }
 0x35e   :  { %5869 = vmatprep.subr.bf16.mxu0 %v10589_v6  ;;  %v10676_v6 = vld [vmem:[#allocation8 + $0xde4] ss:$16 sps:$4 sm:$0xff]  }
 0x35f   :  { %4962 = vmatmul.mubr.bf16.vlgmr.msra.gmra.mrb[12].mxu1 %v12535_v51 }
 0x360   :  { %5048 = vmatmul.mubr.bf16.vlgmr.msra.gmra.mrb[24].mxu0 %v12535_v51  ;;  %5784 = vmatpush1.bf16.msra.mxu1 %v10584_v24  ;;  %v10607_v51 = vld [vmem:[#allocation8 + $0xc6c] ss:$16 sps:$4 sm:$0xff]  }
 0x361   :  { %5815 = vmatprep.mubr.bf16.mxu1 %v12573_v36  ;;  %5870 = vmatpush1.bf16.msra.mxu0 %v10587_v0  ;;  %v10679_v24 = vld [vmem:[#allocation8 + $0xdec] ss:$16 sps:$4 sm:$0xff]   ;;  %v10674_v0 = vld [vmem:[#allocation8 + $0xde0] ss:$16 sps:$4 sm:$0xff]  }
 0x362   :  { %5901 = vmatprep.mubr.bf16.mxu0 %v12573_v36  ;;  %5785 = vmatprep.subr.bf16.mxu1 %v10592_v30  ;;  %v10608_v36 = vld [vmem:[#allocation8 + $0xc80] ss:$16 sps:$4 sm:$0xff]   ;;  %v10677_v30 = vld [vmem:[#allocation8 + $0xde8] ss:$16 sps:$4 sm:$0xff]  }
 0x363   :  { %5871 = vmatprep.subr.bf16.mxu0 %v10595_v54  ;;  %v10682_v54 = vld [vmem:[#allocation8 + $0xe04] ss:$16 sps:$4 sm:$0xff]  }
 0x364   :  { %5786 = vmatpush1.bf16.msra.mxu1 %v10590_v55  ;;  %v10685_v55 = vld [vmem:[#allocation8 + $0xe0c] ss:$16 sps:$4 sm:$0xff]  }
 0x365   :  { %5872 = vmatpush1.bf16.msra.mxu0 %v10593_v1  ;;  %5787 = vmatprep.subr.bf16.mxu1 %v10598_v23  ;;  %v10680_v1 = vld [vmem:[#allocation8 + $0xe00] ss:$16 sps:$4 sm:$0xff]   ;;  %v10683_v23 = vld [vmem:[#allocation8 + $0xe08] ss:$16 sps:$4 sm:$0xff]  }
 0x366   :  { %5873 = vmatprep.subr.bf16.mxu0 %v10601_v61  ;;  %v10688_v61 = vld [vmem:[#allocation8 + $0xe24] ss:$16 sps:$4 sm:$0xff]  }
 0x368   :  { %5788 = vmatpush1.bf16.msra.mxu1 %v10596_v28  ;;  %v10691_v28 = vld [vmem:[#allocation8 + $0xe2c] ss:$16 sps:$4 sm:$0xff]  }
 0x369   :  { %5874 = vmatpush1.bf16.msra.mxu0 %v10599_v63  ;;  %5789 = vmatprep.subr.bf16.mxu1 %v10604_v26  ;;  %v10686_v63 = vld [vmem:[#allocation8 + $0xe20] ss:$16 sps:$4 sm:$0xff]   ;;  %v10689_v26 = vld [vmem:[#allocation8 + $0xe28] ss:$16 sps:$4 sm:$0xff]  }
 0x36a   :  { %5875 = vmatprep.subr.bf16.mxu0 %v10607_v51  ;;  %v10694_v51 = vld [vmem:[#allocation8 + $0xe44] ss:$16 sps:$4 sm:$0xff]  }
 0x36c   :  { %5790 = vmatpush1.bf16.msra.mxu1 %v10602_v38  ;;  %v10697_v38 = vld [vmem:[#allocation8 + $0xe4c] ss:$16 sps:$4 sm:$0xff]  }
 0x36d   :  { %5876 = vmatpush1.bf16.msra.mxu0 %v10605_v16  ;;  %5791 = vmatprep.subr.bf16.mxu1 %v10610_v50  ;;  %v10692_v16 = vld [vmem:[#allocation8 + $0xe40] ss:$16 sps:$4 sm:$0xff]   ;;  %v10695_v50 = vld [vmem:[#allocation8 + $0xe48] ss:$16 sps:$4 sm:$0xff]  }
 0x36e   :  { %5877 = vmatprep.subr.bf16.mxu0 %v10613_v31  ;;  %v10700_v31 = vld [vmem:[#allocation8 + $0xe64] ss:$16 sps:$4 sm:$0xff]  }
 0x370   :  { %5792 = vmatpush1.bf16.msra.mxu1 %v10608_v36  ;;  %v10698_v36 = vld [vmem:[#allocation8 + $0xe60] ss:$16 sps:$4 sm:$0xff]  }
 0x371   :  { %5878 = vmatpush1.bf16.msra.mxu0 %v10611_v25  ;;  %5793 = vmatprep.subr.bf16.mxu1 %v10616_v43  ;;  %v10701_v25 = vld [vmem:[#allocation8 + $0xe68] ss:$16 sps:$4 sm:$0xff]   ;;  %v10706_v43 = vld [vmem:[#allocation8 + $0xe84] ss:$16 sps:$4 sm:$0xff]  }
 0x372   :  { %5879 = vmatprep.subr.bf16.mxu0 %v10619_v48  ;;  %v10709_v48 = vld [vmem:[#allocation8 + $0xe8c] ss:$16 sps:$4 sm:$0xff]  }
 0x374   :  { %5794 = vmatpush1.bf16.msra.mxu1 %v10614_v42  ;;  %v10704_v42 = vld [vmem:[#allocation8 + $0xe80] ss:$16 sps:$4 sm:$0xff]  }
 0x375   :  { %5880 = vmatpush1.bf16.msra.mxu0 %v10617_v7  ;;  %5795 = vmatprep.subr.bf16.mxu1 %v10622_v32  ;;  %v10712_v7 = vld [vmem:[#allocation8 + $0xea4] ss:$16 sps:$4 sm:$0xff]   ;;  %v10715_v32 = vld [vmem:[#allocation8 + $0xeac] ss:$16 sps:$4 sm:$0xff]  }
 0x376   :  { %5881 = vmatprep.subr.bf16.mxu0 %v10625_v27  ;;  %v10710_v27 = vld [vmem:[#allocation8 + $0xea0] ss:$16 sps:$4 sm:$0xff]  }
 0x378   :  { %5796 = vmatpush1.bf16.msra.mxu1 %v10620_v60  ;;  %v10713_v60 = vld [vmem:[#allocation8 + $0xea8] ss:$16 sps:$4 sm:$0xff]  }
 0x379   :  { %5882 = vmatpush1.bf16.msra.mxu0 %v10623_v40  ;;  %5797 = vmatprep.subr.bf16.mxu1 %v10628_v56  ;;  %v10718_v40 = vld [vmem:[#allocation8 + $0xec4] ss:$16 sps:$4 sm:$0xff]   ;;  %v10721_v56 = vld [vmem:[#allocation8 + $0xecc] ss:$16 sps:$4 sm:$0xff]  }
 0x37a   :  { %5883 = vmatprep.subr.bf16.mxu0 %v10631_v10  ;;  %v10716_v10 = vld [vmem:[#allocation8 + $0xec0] ss:$16 sps:$4 sm:$0xff]  }
 0x37c   :  { %5798 = vmatpush1.bf16.msra.mxu1 %v10626_v62  ;;  %v10719_v62 = vld [vmem:[#allocation8 + $0xec8] ss:$16 sps:$4 sm:$0xff]  }
 0x37d   :  { %5884 = vmatpush1.bf16.msra.mxu0 %v10629_v52  ;;  %5799 = vmatprep.subr.bf16.mxu1 %v10634_v3  ;;  %v10724_v52 = vld [vmem:[#allocation8 + $0xee4] ss:$16 sps:$4 sm:$0xff]   ;;  %v10727_v3 = vld [vmem:[#allocation8 + $0xeec] ss:$16 sps:$4 sm:$0xff]  }
 0x37e   :  { %5885 = vmatprep.subr.bf16.mxu0 %v10637_v41  ;;  %v10722_v41 = vld [vmem:[#allocation8 + $0xee0] ss:$16 sps:$4 sm:$0xff]  }
 0x380   :  { %5800 = vmatpush1.bf16.msra.mxu1 %v10632_v5  ;;  %v10725_v5 = vld [vmem:[#allocation8 + $0xee8] ss:$16 sps:$4 sm:$0xff]  }
 0x381   :  { %5886 = vmatpush1.bf16.msra.mxu0 %v10635_v39  ;;  %5801 = vmatprep.subr.bf16.mxu1 %v10640_v21  ;;  %v10730_v39 = vld [vmem:[#allocation11 + $0x4] ss:$16 sps:$4 sm:$0xff]   ;;  %v10733_v21 = vld [vmem:[#allocation11 + $0xc] ss:$16 sps:$4 sm:$0xff]  }
 0x382   :  { %5887 = vmatprep.subr.bf16.mxu0 %v10643_v4  ;;  %v10728_v4 = vld [vmem:[#allocation11] ss:$16 sps:$4 sm:$0xff]  }
 0x384   :  { %5802 = vmatpush1.bf16.msra.mxu1 %v10638_v17  ;;  %v10731_v17 = vld [vmem:[#allocation11 + $0x8] ss:$16 sps:$4 sm:$0xff]  }
 0x385   :  { %5888 = vmatpush1.bf16.msra.mxu0 %v10641_v57  ;;  %5803 = vmatprep.subr.bf16.mxu1 %v10646_v12  ;;  %v10736_v57 = vld [vmem:[#allocation11 + $0x24] ss:$16 sps:$4 sm:$0xff]   ;;  %v10739_v12 = vld [vmem:[#allocation11 + $0x2c] ss:$16 sps:$4 sm:$0xff]  }
 0x386   :  { %5889 = vmatprep.subr.bf16.mxu0 %v10649_v18  ;;  %v10734_v18 = vld [vmem:[#allocation11 + $0x20] ss:$16 sps:$4 sm:$0xff]  }
 0x388   :  { %5804 = vmatpush1.bf16.msra.mxu1 %v10644_v15  ;;  %v10737_v15 = vld [vmem:[#allocation11 + $0x28] ss:$16 sps:$4 sm:$0xff]  }
 0x389   :  { %5890 = vmatpush1.bf16.msra.mxu0 %v10647_v33  ;;  %5805 = vmatprep.subr.bf16.mxu1 %v10652_v46  ;;  %v10742_v33 = vld [vmem:[#allocation11 + $0x44] ss:$16 sps:$4 sm:$0xff]   ;;  %v10745_v46 = vld [vmem:[#allocation11 + $0x4c] ss:$16 sps:$4 sm:$0xff]  }
 0x38a   :  { %5891 = vmatprep.subr.bf16.mxu0 %v10655_v53  ;;  %v10740_v53 = vld [vmem:[#allocation11 + $0x40] ss:$16 sps:$4 sm:$0xff]  }
 0x38c   :  { %5806 = vmatpush1.bf16.msra.mxu1 %v10650_v45  ;;  %v10743_v45 = vld [vmem:[#allocation11 + $0x48] ss:$16 sps:$4 sm:$0xff]  }
 0x38d   :  { %5892 = vmatpush1.bf16.msra.mxu0 %v10653_v2  ;;  %5807 = vmatprep.subr.bf16.mxu1 %v10658_v22  ;;  %v10746_v2 = vld [vmem:[#allocation11 + $0x60] ss:$16 sps:$4 sm:$0xff]   ;;  %v10748_v22 = vld [vmem:[#allocation11 + $0x64] ss:$16 sps:$4 sm:$0xff]  }
 0x38e   :  { %5893 = vmatprep.subr.bf16.mxu0 %v10661_v47  ;;  %v10749_v47 = vld [vmem:[#allocation11 + $0x68] ss:$16 sps:$4 sm:$0xff]  }
 0x390   :  { %5808 = vmatpush1.bf16.msra.mxu1 %v10656_v14  ;;  %v10754_v14 = vld [vmem:[#allocation11 + $0x84] ss:$16 sps:$4 sm:$0xff]  }
 0x391   :  { %5894 = vmatpush1.bf16.msra.mxu0 %v10659_v29  ;;  %5809 = vmatprep.subr.bf16.mxu1 %v10664_v13  ;;  %v10757_v29 = vld [vmem:[#allocation11 + $0x8c] ss:$16 sps:$4 sm:$0xff]   ;;  %v10752_v13 = vld [vmem:[#allocation11 + $0x80] ss:$16 sps:$4 sm:$0xff]  }
 0x392   :  { %5895 = vmatprep.subr.bf16.mxu0 %v10667_v8  ;;  %v10755_v8 = vld [vmem:[#allocation11 + $0x88] ss:$16 sps:$4 sm:$0xff]  }
 0x394   :  { %5810 = vmatpush1.bf16.msra.mxu1 %v10662_v35  ;;  %v10760_v35 = vld [vmem:[#allocation11 + $0xa4] ss:$16 sps:$4 sm:$0xff]  }
 0x395   :  { %5896 = vmatpush1.bf16.msra.mxu0 %v10665_v34  ;;  %5811 = vmatprep.subr.bf16.mxu1 %v10670_v44  ;;  %v10763_v34 = vld [vmem:[#allocation11 + $0xac] ss:$16 sps:$4 sm:$0xff]   ;;  %v10758_v44 = vld [vmem:[#allocation11 + $0xa0] ss:$16 sps:$4 sm:$0xff]  }
 0x396   :  { %5897 = vmatprep.subr.bf16.mxu0 %v10673_v37  ;;  %v10761_v37 = vld [vmem:[#allocation11 + $0xa8] ss:$16 sps:$4 sm:$0xff]  }
 0x398   :  { %5812 = vmatpush1.bf16.msra.mxu1 %v10668_v59  ;;  %v10766_v59 = vld [vmem:[#allocation11 + $0xc4] ss:$16 sps:$4 sm:$0xff]  }
 0x399   :  { %5898 = vmatpush1.bf16.msra.mxu0 %v10671_v9  ;;  %5813 = vmatprep.subr.bf16.mxu1 %v10676_v6  ;;  %v10769_v9 = vld [vmem:[#allocation11 + $0xcc] ss:$16 sps:$4 sm:$0xff]   ;;  %v10764_v6 = vld [vmem:[#allocation11 + $0xc0] ss:$16 sps:$4 sm:$0xff]  }
 0x39a   :  { %5899 = vmatprep.subr.bf16.mxu0 %v10679_v24  ;;  %v10767_v24 = vld [vmem:[#allocation11 + $0xc8] ss:$16 sps:$4 sm:$0xff]  }
 0x39c   :  { %5814 = vmatpush1.bf16.msra.mxu1 %v10674_v0  ;;  %v10772_v0 = vld [vmem:[#allocation11 + $0xe4] ss:$16 sps:$4 sm:$0xff]  }
 0x39d   :  { %5900 = vmatpush1.bf16.msra.mxu0 %v10677_v30  ;;  %5826 = vmatprep.subr.bf16.mxu1 %v10682_v54  ;;  %v10775_v30 = vld [vmem:[#allocation11 + $0xec] ss:$16 sps:$4 sm:$0xff]   ;;  %v10770_v54 = vld [vmem:[#allocation11 + $0xe0] ss:$16 sps:$4 sm:$0xff]  }
 0x39e   :  { %5912 = vmatprep.subr.bf16.mxu0 %v10685_v55  ;;  %v10773_v55 = vld [vmem:[#allocation11 + $0xe8] ss:$16 sps:$4 sm:$0xff]  }
 0x39f   :  { %5816 = vmatmul.mubr.bf16.vlgmr.msra.gmra.mrb[12].mxu1 %v12602_v19 }
 0x3a0   :  { %5902 = vmatmul.mubr.bf16.vlgmr.msra.gmra.mrb[24].mxu0 %v12602_v19  ;;  %5827 = vmatpush1.bf16.msra.mxu1 %v10680_v1  ;;  %v10703_v19 = vld [vmem:[#allocation8 + $0xe6c] ss:$16 sps:$4 sm:$0xff]   ;;  %v10778_v1 = vld [vmem:[#allocation11 + $0x104] ss:$16 sps:$4 sm:$0xff]  }
 0x3a1   :  { %5913 = vmatpush1.bf16.msra.mxu0 %v10683_v23  ;;  %5828 = vmatprep.subr.bf16.mxu1 %v10688_v61  ;;  %v10781_v23 = vld [vmem:[#allocation11 + $0x10c] ss:$16 sps:$4 sm:$0xff]   ;;  %v10776_v61 = vld [vmem:[#allocation11 + $0x100] ss:$16 sps:$4 sm:$0xff]  }
 0x3a2   :  { %5914 = vmatprep.subr.bf16.mxu0 %v10691_v28  ;;  %5858 = vmatprep.mubr.bf16.mxu1 %v12971_v11  ;;  %v10779_v28 = vld [vmem:[#allocation11 + $0x108] ss:$16 sps:$4 sm:$0xff]  }
 0x3a3   :  { %5944 = vmatprep.mubr.bf16.mxu0 %v12971_v11  ;;  %v10707_v11 = vld [vmem:[#allocation8 + $0xe88] ss:$16 sps:$4 sm:$0xff]  }
 0x3a4   :  { %5829 = vmatpush1.bf16.msra.mxu1 %v10686_v63  ;;  %v10784_v63 = vld [vmem:[#allocation11 + $0x124] ss:$16 sps:$4 sm:$0xff]  }
 0x3a5   :  { %5915 = vmatpush1.bf16.msra.mxu0 %v10689_v26  ;;  %5830 = vmatprep.subr.bf16.mxu1 %v10694_v51  ;;  %v10787_v26 = vld [vmem:[#allocation11 + $0x12c] ss:$16 sps:$4 sm:$0xff]   ;;  %v10782_v51 = vld [vmem:[#allocation11 + $0x120] ss:$16 sps:$4 sm:$0xff]  }
 0x3a6   :  { %5916 = vmatprep.subr.bf16.mxu0 %v10697_v38  ;;  %v10785_v38 = vld [vmem:[#allocation11 + $0x128] ss:$16 sps:$4 sm:$0xff]  }
 0x3a8   :  { %5831 = vmatpush1.bf16.msra.mxu1 %v10692_v16  ;;  %v10790_v16 = vld [vmem:[#allocation11 + $0x144] ss:$16 sps:$4 sm:$0xff]  }
 0x3a9   :  { %5917 = vmatpush1.bf16.msra.mxu0 %v10695_v50  ;;  %5832 = vmatprep.subr.bf16.mxu1 %v10700_v31  ;;  %v10793_v50 = vld [vmem:[#allocation11 + $0x14c] ss:$16 sps:$4 sm:$0xff]   ;;  %v10788_v31 = vld [vmem:[#allocation11 + $0x140] ss:$16 sps:$4 sm:$0xff]  }
 0x3aa   :  { %5918 = vmatprep.subr.bf16.mxu0 %v10703_v19  ;;  %v10791_v19 = vld [vmem:[#allocation11 + $0x148] ss:$16 sps:$4 sm:$0xff]  }
 0x3ac   :  { %5833 = vmatpush1.bf16.msra.mxu1 %v10698_v36  ;;  %v10796_v36 = vld [vmem:[#allocation11 + $0x164] ss:$16 sps:$4 sm:$0xff]  }
 0x3ad   :  { %5919 = vmatpush1.bf16.msra.mxu0 %v10701_v25  ;;  %5834 = vmatprep.subr.bf16.mxu1 %v10706_v43  ;;  %v10799_v25 = vld [vmem:[#allocation11 + $0x16c] ss:$16 sps:$4 sm:$0xff]   ;;  %v10794_v43 = vld [vmem:[#allocation11 + $0x160] ss:$16 sps:$4 sm:$0xff]  }
 0x3ae   :  { %5920 = vmatprep.subr.bf16.mxu0 %v10709_v48  ;;  %v10797_v48 = vld [vmem:[#allocation11 + $0x168] ss:$16 sps:$4 sm:$0xff]  }
 0x3b0   :  { %5835 = vmatpush1.bf16.msra.mxu1 %v10704_v42  ;;  %v10802_v42 = vld [vmem:[#allocation11 + $0x184] ss:$16 sps:$4 sm:$0xff]  }
 0x3b1   :  { %5921 = vmatpush1.bf16.msra.mxu0 %v10707_v11  ;;  %5836 = vmatprep.subr.bf16.mxu1 %v10712_v7  ;;  %v10805_v11 = vld [vmem:[#allocation11 + $0x18c] ss:$16 sps:$4 sm:$0xff]   ;;  %v10800_v7 = vld [vmem:[#allocation11 + $0x180] ss:$16 sps:$4 sm:$0xff]  }
 0x3b2   :  { %5922 = vmatprep.subr.bf16.mxu0 %v10715_v32  ;;  %v10803_v32 = vld [vmem:[#allocation11 + $0x188] ss:$16 sps:$4 sm:$0xff]  }
 0x3b4   :  { %5837 = vmatpush1.bf16.msra.mxu1 %v10710_v27  ;;  %v10808_v27 = vld [vmem:[#allocation11 + $0x1a4] ss:$16 sps:$4 sm:$0xff]  }
 0x3b5   :  { %5923 = vmatpush1.bf16.msra.mxu0 %v10713_v60  ;;  %5838 = vmatprep.subr.bf16.mxu1 %v10718_v40  ;;  %v10811_v60 = vld [vmem:[#allocation11 + $0x1ac] ss:$16 sps:$4 sm:$0xff]   ;;  %v10806_v40 = vld [vmem:[#allocation11 + $0x1a0] ss:$16 sps:$4 sm:$0xff]  }
 0x3b6   :  { %5924 = vmatprep.subr.bf16.mxu0 %v10721_v56  ;;  %v10809_v56 = vld [vmem:[#allocation11 + $0x1a8] ss:$16 sps:$4 sm:$0xff]  }
 0x3b8   :  { %5839 = vmatpush1.bf16.msra.mxu1 %v10716_v10  ;;  %v10814_v10 = vld [vmem:[#allocation11 + $0x1c4] ss:$16 sps:$4 sm:$0xff]  }
 0x3b9   :  { %5925 = vmatpush1.bf16.msra.mxu0 %v10719_v62  ;;  %5840 = vmatprep.subr.bf16.mxu1 %v10724_v52  ;;  %v10817_v62 = vld [vmem:[#allocation11 + $0x1cc] ss:$16 sps:$4 sm:$0xff]   ;;  %v10812_v52 = vld [vmem:[#allocation11 + $0x1c0] ss:$16 sps:$4 sm:$0xff]  }
 0x3ba   :  { %5926 = vmatprep.subr.bf16.mxu0 %v10727_v3  ;;  %v10815_v3 = vld [vmem:[#allocation11 + $0x1c8] ss:$16 sps:$4 sm:$0xff]  }
 0x3bc   :  { %5841 = vmatpush1.bf16.msra.mxu1 %v10722_v41  ;;  %v10820_v41 = vld [vmem:[#allocation11 + $0x1e4] ss:$16 sps:$4 sm:$0xff]  }
 0x3bd   :  { %5927 = vmatpush1.bf16.msra.mxu0 %v10725_v5  ;;  %8154 = vmatprep.subr.bf16.mxu1 %v10730_v39  ;;  %v10823_v5 = vld [vmem:[#allocation11 + $0x1ec] ss:$16 sps:$4 sm:$0xff]   ;;  %v10818_v39 = vld [vmem:[#allocation11 + $0x1e0] ss:$16 sps:$4 sm:$0xff]  }
 0x3be   :  { %8318 = vmatprep.subr.bf16.mxu0 %v10733_v21  ;;  %v10821_v21 = vld [vmem:[#allocation11 + $0x1e8] ss:$16 sps:$4 sm:$0xff]  }
 0x3bf   :  { %5859 = vmatmul.mubr.bf16.vlgmr.msra.gmra.mrb[12].mxu1 %v12630_v20 }
 0x3c0   :  { %5945 = vmatmul.mubr.bf16.vlgmr.msra.gmra.mrb[24].mxu0 %v12630_v20  ;;  %8155 = vmatpush1.bf16.msra.mxu1 %v10728_v4  ;;  %v10751_v20 = vld [vmem:[#allocation11 + $0x6c] ss:$16 sps:$4 sm:$0xff]   ;;  %v10826_v4 = vld [vmem:[#allocation11 + $0x204] ss:$16 sps:$4 sm:$0xff]  }
 0x3c1   :  { %8319 = vmatpush1.bf16.msra.mxu0 %v10731_v17  ;;  %8156 = vmatprep.subr.bf16.mxu1 %v10736_v57  ;;  %v10829_v17 = vld [vmem:[#allocation11 + $0x20c] ss:$16 sps:$4 sm:$0xff]  }
 0x3c2   :  { %8320 = vmatprep.subr.bf16.mxu0 %v10739_v12  ;;  %v5963_v57 = vld [vmem:[#allocation9] sm:$0xf] }
 0x3c3   :  { %v5968_v12 = vrot.slane %v5963_v57, %v12946_v49 }
 0x3c4   :  { %8157 = vmatpush1.bf16.msra.mxu1 %v10734_v18  ;;  %v5976_v18 = vrot.slane %v5963_v57, %v12937_v58 }
 0x3c5   :  { %8321 = vmatpush1.bf16.msra.mxu0 %v10737_v15  ;;  %8158 = vmatprep.subr.bf16.mxu1 %v10742_v33  ;;  %v12977_v15 = vld [vmem:[#allocation28_spill] sm:$0xff] }
 0x3c6   :  { %8322 = vmatprep.subr.bf16.mxu0 %v10745_v46  ;;  %v5972_v33 = vrot.slane %v5963_v57, %v12977_v15  ;;  %v12978_v46 = vld [vmem:[#allocation26_spill] sm:$0xff] }
 0x3c8   :  { %8159 = vmatpush1.bf16.msra.mxu1 %v10740_v53  ;;  %v5980_v53 = vrot.slane %v5963_v57, %v12978_v46 }
 0x3c9   :  { %8323 = vmatpush1.bf16.msra.mxu0 %v10743_v45  ;;  %8160 = vmatprep.subr.bf16.mxu1 %v10748_v22 }
 0x3ca   :  { %8324 = vmatprep.subr.bf16.mxu0 %v10751_v20 }
 0x3cc   :  { %8161 = vmatpush1.bf16.msra.mxu1 %v10746_v2 }
 0x3cd   :  { %8325 = vmatpush1.bf16.msra.mxu0 %v10749_v47  ;;  %8162 = vmatprep.subr.bf16.mxu1 %v10754_v14 }
 0x3ce   :  { %8326 = vmatprep.subr.bf16.mxu0 %v10757_v29 }
 0x3d0   :  { %8163 = vmatpush1.bf16.msra.mxu1 %v10752_v13 }
 0x3d1   :  { %8327 = vmatpush1.bf16.msra.mxu0 %v10755_v8  ;;  %8164 = vmatprep.subr.bf16.mxu1 %v10760_v35 }
 0x3d2   :  { %8328 = vmatprep.subr.bf16.mxu0 %v10763_v34 }
 0x3d4   :  { %8165 = vmatpush1.bf16.msra.mxu1 %v10758_v44 }
 0x3d5   :  { %8329 = vmatpush1.bf16.msra.mxu0 %v10761_v37  ;;  %8166 = vmatprep.subr.bf16.mxu1 %v10766_v59 }
 0x3d6   :  { %8330 = vmatprep.subr.bf16.mxu0 %v10769_v9 }
 0x3d8   :  { %8167 = vmatpush1.bf16.msra.mxu1 %v10764_v6 }
 0x3d9   :  { %8331 = vmatpush1.bf16.msra.mxu0 %v10767_v24  ;;  %8168 = vmatprep.subr.bf16.mxu1 %v10772_v0 }
 0x3da   :  { %8332 = vmatprep.subr.bf16.mxu0 %v10775_v30 }
 0x3dc   :  { %8169 = vmatpush1.bf16.msra.mxu1 %v10770_v54 }
 0x3dd   :  { %8333 = vmatpush1.bf16.msra.mxu0 %v10773_v55  ;;  %8170 = vmatprep.subr.bf16.mxu1 %v10778_v1 }
 0x3de   :  { %8334 = vmatprep.subr.bf16.mxu0 %v10781_v23  ;;  %v11375_v23 = vmov 1966171168  }
 0x3e0   :  { %8171 = vmatpush1.bf16.msra.mxu1 %v10776_v61  ;;  %v6117_v61 = vunpack.c.l.s4 %v11375_v23 }
 0x3e1   :  { %8335 = vmatpush1.bf16.msra.mxu0 %v10779_v28  ;;  %8172 = vmatprep.subr.bf16.mxu1 %v10784_v63 }
 0x3e2   :  { %8336 = vmatprep.subr.bf16.mxu0 %v10787_v26 }
 0x3e4   :  { %8173 = vmatpush1.bf16.msra.mxu1 %v10782_v51 }
 0x3e5   :  { %8337 = vmatpush1.bf16.msra.mxu0 %v10785_v38  ;;  %8174 = vmatprep.subr.bf16.mxu1 %v10790_v16 }
 0x3e6   :  { %8338 = vmatprep.subr.bf16.mxu0 %v10793_v50 }
 0x3e8   :  { %8175 = vmatpush1.bf16.msra.mxu1 %v10788_v31 }
 0x3e9   :  { %8339 = vmatpush1.bf16.msra.mxu0 %v10791_v19  ;;  %8176 = vmatprep.subr.bf16.mxu1 %v10796_v36  ;;  %v6118_v19 = vunpack.c.0.s8 %v6117_v61  ;;  %v11376_v36 = vmov 1935823168  }
 0x3ea   :  { %8340 = vmatprep.subr.bf16.mxu0 %v10799_v25  ;;  %v6146_v25 = vunpack.c.l.s4 %v11376_v36 }
 0x3ec   :  { %8177 = vmatpush1.bf16.msra.mxu1 %v10794_v43  ;;  %v12979_v43 = vld [vmem:[#allocation30_spill] sm:$0xff] }
 0x3ed   :  { %8341 = vmatpush1.bf16.msra.mxu0 %v10797_v48  ;;  %8178 = vmatprep.subr.bf16.mxu1 %v10802_v42 }
 0x3ee   :  { %8342 = vmatprep.subr.bf16.mxu0 %v10805_v11 }
 0x3f0   :  { %8179 = vmatpush1.bf16.msra.mxu1 %v10800_v7 }
 0x3f1   :  { %8343 = vmatpush1.bf16.msra.mxu0 %v10803_v32  ;;  %8180 = vmatprep.subr.bf16.mxu1 %v10808_v27 }
 0x3f2   :  { %8344 = vmatprep.subr.bf16.mxu0 %v10811_v60 }
 0x3f4   :  { %8181 = vmatpush1.bf16.msra.mxu1 %v10806_v40 }
 0x3f5   :  { %8345 = vmatpush1.bf16.msra.mxu0 %v10809_v56  ;;  %8182 = vmatprep.subr.bf16.mxu1 %v10814_v10  ;;  %v12980_v56 = vld [vmem:[#allocation24_spill] sm:$0xff] }
 0x3f6   :  { %8346 = vmatprep.subr.bf16.mxu0 %v10817_v62  ;;  %v12665_v10 = vsub.s32 %v6118_v19, %v12980_v56  ;;  %v6147_v62 = vunpack.c.0.s8 %v6146_v25 }
 0x3f8   :  { %8183 = vmatpush1.bf16.msra.mxu1 %v10812_v52 }
 0x3f9   :  { %8347 = vmatpush1.bf16.msra.mxu0 %v10815_v3  ;;  %8184 = vmatprep.subr.bf16.mxu1 %v10820_v41 }
 0x3fa   :  { %8348 = vmatprep.subr.bf16.mxu0 %v10823_v5 }
 0x3fc   :  { %8185 = vmatpush1.bf16.msra.mxu1 %v10818_v39 }
 0x3fd   :  { %8349 = vmatpush1.bf16.msra.mxu0 %v10821_v21  ;;  %8195 = vmatprep.subr.bf16.mxu1 %v10826_v4 }
 0x3fe   :  { %8359 = vmatprep.subr.bf16.mxu0 %v10829_v17 }
 0x492   :  { %v5860_v45 = vpop.f32.mrb[12].mxu1 }
 0x493   :  { %v5985_v2 = vadd.f32 %v5968_v12, %v5860_v45  ;;  %v5946_v22 = vpop.f32.mrb[24].mxu0  ;;  %v5862_v47 = vpop.f32.mrb[13].mxu1 }
 0x494   :  { %v5987_v20 = vadd.f32 %v5976_v18, %v5946_v22  ;;  %v5986_v14 = vadd.f32 %v5972_v33, %v5862_v47  ;;  %v5948_v29 = vpop.f32.mrb[25].mxu0  ;;  %v5864_v13 = vpop.f32.mrb[14].mxu1 }
 0x495   :  { %v5993_v8 = vmax.f32 %v5985_v2, 0.0  ;;  %v5988_v35 = vadd.f32 %v5980_v53, %v5948_v29  ;;  %v5989_v34 = vadd.f32 %v5968_v12, %v5864_v13  ;;  %v5950_v44 = vpop.f32.mrb[26].mxu0  ;;  %v5866_v37 = vpop.f32.mrb[15].mxu1 }
 0x496   :  { %v5995_v59 = vmax.f32 %v5987_v20, 0.0  ;;  %v5994_v9 = vmax.f32 %v5986_v14, 0.0  ;;  %v5991_v6 = vadd.f32 %v5976_v18, %v5950_v44  ;;  %v5990_v24 = vadd.f32 %v5972_v33, %v5866_v37  ;;  %v5952_v0 = vpop.f32.mrb[27].mxu0 }
 0x497   :  { %v5996_v30 = vmax.f32 %v5988_v35, 0.0  ;;  %v5997_v54 = vmax.f32 %v5989_v34, 0.0  ;;  %v5992_v55 = vadd.f32 %v5980_v53, %v5952_v0 }
 0x498   :  { %v6001_v1 = vmax.f32 %v5993_v8, %v5995_v59  ;;  %v5999_v28 = vmax.f32 %v5991_v6, 0.0  ;;  %v5998_v63 = vmax.f32 %v5990_v24, 0.0 }
 0x499   :  { %v6002_v26 = vmax.f32 %v5994_v9, %v5996_v30  ;;  %v6000_v51 = vmax.f32 %v5992_v55, 0.0  ;;  %v12679_v9 = vsub.s32 %v6147_v62, %v12980_v56 }
 0x49a   :  { %v6003_v38 = vmax.f32 %v5997_v54, %v5999_v28 }
 0x49b   :  { %v6009_v16 = vcombine.low %v6001_v1, %v6002_v26  ;;  %v6010_v50 = vcombine.high %v6001_v1, %v6002_v26  ;;  %v6004_v31 = vmax.f32 %v5998_v63, %v6000_v51 }
 0x49d   :  { %v6017_v48 = vrot.slane %v6009_v16, %v12979_v43  ;;  %v6024_v42 = vrot.slane %v6010_v50, %v12979_v43  ;;  %v6027_v11 = vcombine.low %v6003_v38, %v6004_v31  ;;  %v6028_v7 = vcombine.high %v6003_v38, %v6004_v31 }
 0x49f   :  { %v6025_v32 = vcombine.high %v6017_v48, %v6017_v48  ;;  %v6026_v27 = vcombine.high %v6024_v42, %v6024_v42  ;;  %v9446_v60 = vrot.slane %v6017_v48, 9  ;;  %v9448_v40 = vrot.slane %v6024_v42, 9 }
 0x4a0   :  { %v6035_v52 = vrot.slane %v6027_v11, %v12979_v43  ;;  %v6042_v3 = vrot.slane %v6028_v7, %v12979_v43 }
 0x4a1   :  { %v9447_v41 = vrot.slane %v6025_v32, 9  ;;  %v9449_v5 = vrot.slane %v6026_v27, 9  ;;  %v6077_v39 = vmax.f32 %v6017_v48, %v9446_v60  ;;  %v6079_v21 = vmax.f32 %v6024_v42, %v9448_v40 }
 0x4a2   :  { %v6043_v4 = vcombine.high %v6035_v52, %v6035_v52  ;;  %v6044_v17 = vcombine.high %v6042_v3, %v6042_v3  ;;  %v9450_v57 = vrot.slane %v6035_v52, 9  ;;  %v9452_v12 = vrot.slane %v6042_v3, 9 }
 0x4a3   :  { %v6078_v18 = vmax.f32 %v6025_v32, %v9447_v41  ;;  %v6080_v33 = vmax.f32 %v6026_v27, %v9449_v5  ;;  %v6090_v53 = vrot.slane %v6077_v39, %v12946_v49  ;;  %v6094_v45 = vrot.slane %v6077_v39, %v12937_v58 }
 0x4a4   :  { %v6316_v2 = vrot.slane %v6079_v21, %v12946_v49  ;;  %v6320_v22 = vrot.slane %v6079_v21, %v12937_v58  ;;  %v9451_v47 = vrot.slane %v6043_v4, 9  ;;  %v9453_v20 = vrot.slane %v6044_v17, 9 }
 0x4a5   :  { %v9454_v14 = vpack.c.bf16 %v6094_v45, %v6090_v53  ;;  %v6203_v29 = vrot.slane %v6078_v18, %v12946_v49  ;;  %v6207_v13 = vrot.slane %v6078_v18, %v12937_v58  ;;  %v6429_v8 = vrot.slane %v6080_v33, %v12946_v49 }
 0x4a6   :  { %v9460_v35 = vpack.c.bf16 %v6320_v22, %v6316_v2  ;;  %v6433_v34 = vrot.slane %v6080_v33, %v12937_v58  ;;  %v6081_v44 = vmax.f32 %v6035_v52, %v9450_v57  ;;  %v6082_v37 = vmax.f32 %v6043_v4, %v9451_v47 }
 0x4a7   :  { %v6122_v59 = vrot.slane %v9454_v14, %v12665_v10  ;;  %v9457_v6 = vpack.c.bf16 %v6207_v13, %v6203_v29  ;;  %v6083_v24 = vmax.f32 %v6042_v3, %v9452_v12  ;;  %v6084_v26 = vmax.f32 %v6044_v17, %v9453_v20 }
 0x4a8   :  { %v6348_v0 = vrot.slane %v9460_v35, %v12665_v10  ;;  %v9463_v30 = vpack.c.bf16 %v6433_v34, %v6429_v8  ;;  %v6098_v54 = vrot.slane %v6081_v44, %v12946_v49  ;;  %v6102_v55 = vrot.slane %v6081_v44, %v12937_v58 }
 0x4a9   :  { %v6129_v1 = vrot.slane %v6122_v59, %v12665_v10  ;;  %v6235_v23 = vrot.slane %v9457_v6, %v12665_v10  ;;  %v6211_v61 = vrot.slane %v6082_v37, %v12946_v49  ;;  %v6215_v28 = vrot.slane %v6082_v37, %v12937_v58 }
 0x4aa   :  { %v6355_v63 = vrot.slane %v6348_v0, %v12665_v10  ;;  %v9455_v51 = vpack.c.bf16 %v6102_v55, %v6098_v54  ;;  %v6324_v38 = vrot.slane %v6083_v24, %v12946_v49  ;;  %v6461_v50 = vrot.slane %v9463_v30, %v12665_v10 }
 0x4ab   :  { %v6242_v16 = vrot.slane %v6235_v23, %v12665_v10  ;;  %v9458_v31 = vpack.c.bf16 %v6215_v28, %v6211_v61  ;;  %v6328_v19 = vrot.slane %v6083_v24, %v12937_v58  ;;  %v6151_v36 = vrot.slane %v6129_v1, %v12679_v9 }
 0x4ac   :  { %v6137_v25 = vrot.slane %v9455_v51, %v12665_v10  ;;  %v6437_v7 = vrot.slane %v6084_v26, %v12946_v49  ;;  %v6441_v32 = vrot.slane %v6084_v26, %v12937_v58  ;;  %v6377_v27 = vrot.slane %v6355_v63, %v12679_v9 }
 0x4ad   :  { %v6250_v43 = vrot.slane %v9458_v31, %v12665_v10  ;;  %v9461_v48 = vpack.c.bf16 %v6328_v19, %v6324_v38  ;;  %v6264_v42 = vrot.slane %v6242_v16, %v12679_v9  ;;  %v6468_v60 = vrot.slane %v6461_v50, %v12665_v10 }
 0x4ae   :  { %v6144_v11 = vrot.slane %v6137_v25, %v12665_v10  ;;  %v6158_v56 = vrot.slane %v6151_v36, %v12679_v9  ;;  %v9464_v39 = vpack.c.bf16 %v6441_v32, %v6437_v7  ;;  %v6384_v21 = vrot.slane %v6377_v27, %v12679_v9 }
 0x4af   :  { %v6257_v40 = vrot.slane %v6250_v43, %v12665_v10  ;;  %v6363_v3 = vrot.slane %v9461_v48, %v12665_v10  ;;  %v6271_v41 = vrot.slane %v6264_v42, %v12679_v9  ;;  %v6490_v4 = vrot.slane %v6468_v60, %v12679_v9 }
 0x4b0   :  { %v6165_v62 = vrot.slane %v6144_v11, %v12679_v9  ;;  %v6173_v12 = vunpack.c.l.b16 %v6158_v56  ;;  %v6476_v53 = vrot.slane %v9464_v39, %v12665_v10  ;;  %v6174_v45 = vunpack.c.h.b16 %v6158_v56  ;;  %v10827_v39 = vld [vmem:[#allocation11 + $0x208] ss:$16 sps:$4 sm:$0xff]  }
 0x4b1   :  { %v6278_v52 = vrot.slane %v6257_v40, %v12679_v9  ;;  %v6370_v57 = vrot.slane %v6363_v3, %v12665_v10  ;;  %v6286_v20 = vunpack.c.l.b16 %v6271_v41  ;;  %v6287_v8 = vunpack.c.h.b16 %v6271_v41 }
 0x4b2   :  { %v6172_v5 = vrot.slane %v6165_v62, %v12679_v9  ;;  %v6483_v13 = vrot.slane %v6476_v53, %v12665_v10  ;;  %v6497_v37 = vrot.slane %v6490_v4, %v12679_v9  ;;  %v6399_v28 = vunpack.c.l.b16 %v6384_v21  ;;  %v10830_v53 = vld [vmem:[#allocation11 + $0x220] ss:$16 sps:$4 sm:$0xff]  }
 0x4b3   :  { %v6285_v17 = vrot.slane %v6278_v52, %v12679_v9  ;;  %v6391_v47 = vrot.slane %v6370_v57, %v12679_v9  ;;  %v6400_v63 = vunpack.c.h.b16 %v6384_v21 }
 0x4b4   :  { %v6175_v18 = vunpack.c.l.b16 %v6172_v5  ;;  %v6176_v33 = vunpack.c.h.b16 %v6172_v5  ;;  %v6504_v24 = vrot.slane %v6483_v13, %v12679_v9  ;;  %v6512_v19 = vunpack.c.l.b16 %v6497_v37  ;;  %v10824_v5 = vld [vmem:[#allocation11 + $0x200] ss:$16 sps:$4 sm:$0xff]   ;;  %v10845_v13 = vld [vmem:[#allocation11 + $0x268] ss:$16 sps:$4 sm:$0xff]  }
 0x4b5   :  { %v6288_v2 = vunpack.c.l.b16 %v6285_v17  ;;  %v6289_v22 = vunpack.c.h.b16 %v6285_v17  ;;  %v6398_v44 = vrot.slane %v6391_v47, %v12679_v9  ;;  %v6513_v25 = vunpack.c.h.b16 %v6497_v37  ;;  %v10836_v47 = vld [vmem:[#allocation11 + $0x240] ss:$16 sps:$4 sm:$0xff]   ;;  %v10856_v37 = vld [vmem:[#allocation11 + $0x2a4] ss:$16 sps:$4 sm:$0xff]  }
 0x4b6   :  { %v6177_v14 = vrot.slane %v6175_v18, 7  ;;  %v6179_v29 = vrot.slane %v6176_v33, 7  ;;  %v6511_v61 = vrot.slane %v6504_v24, %v12679_v9  ;;  %v10835_v18 = vld [vmem:[#allocation11 + $0x22c] ss:$16 sps:$4 sm:$0xff]   ;;  %v10857_v24 = vld [vmem:[#allocation11 + $0x2a8] ss:$16 sps:$4 sm:$0xff]  }
 0x4b7   :  { %v6290_v35 = vrot.slane %v6288_v2, 7  ;;  %v6292_v34 = vrot.slane %v6289_v22, 7  ;;  %v6401_v55 = vunpack.c.l.b16 %v6398_v44  ;;  %v6402_v23 = vunpack.c.h.b16 %v6398_v44  ;;  %v10838_v2 = vld [vmem:[#allocation11 + $0x244] ss:$16 sps:$4 sm:$0xff]   ;;  %v10841_v22 = vld [vmem:[#allocation11 + $0x24c] ss:$16 sps:$4 sm:$0xff]  }
 0x4b8   :  { %v6178_v59 = vsel %vm1770_vm2, %v6177_v14, %v6173_v12  ;;  %v6180_v6 = vsel %vm1770_vm2, %v6179_v29, %v6174_v45  ;;  %v6514_v50 = vunpack.c.l.b16 %v6511_v61  ;;  %v6515_v31 = vunpack.c.h.b16 %v6511_v61  ;;  %v10832_v12 = vld [vmem:[#allocation11 + $0x224] ss:$16 sps:$4 sm:$0xff]   ;;  %v10833_v45 = vld [vmem:[#allocation11 + $0x228] ss:$16 sps:$4 sm:$0xff]   ;;  %v10847_v14 = vld [vmem:[#allocation11 + $0x26c] ss:$16 sps:$4 sm:$0xff]  }
 0x4b9   :  { %v6181_v0 = vpack.c.b16 %v6180_v6, %v6178_v59  ;;  %v6291_v30 = vsel %vm1770_vm2, %v6290_v35, %v6286_v20  ;;  %v6293_v54 = vsel %vm1770_vm2, %v6292_v34, %v6287_v8  ;;  %v6403_v51 = vrot.slane %v6401_v55, 7  ;;  %v10839_v20 = vld [vmem:[#allocation11 + $0x248] ss:$16 sps:$4 sm:$0xff]   ;;  %v10842_v29 = vld [vmem:[#allocation11 + $0x260] ss:$16 sps:$4 sm:$0xff]  }
 0x4ba   :  { %v6294_v1 = vpack.c.b16 %v6293_v54, %v6291_v30  ;;  %v6405_v16 = vrot.slane %v6402_v23, 7  ;;  %v6516_v48 = vrot.slane %v6514_v50, 7  ;;  %v6518_v9 = vrot.slane %v6515_v31, 7  ;;  %v10850_v8 = vld [vmem:[#allocation11 + $0x284] ss:$16 sps:$4 sm:$0xff]  }
 0x4bb   :  { %v6188_v26 = vrot.slane %v6181_v0, %v12665_v10  ;;  %v6404_v36 = vsel %vm1770_vm2, %v6403_v51, %v6399_v28  ;;  %v10853_v35 = vld [vmem:[#allocation11 + $0x28c] ss:$16 sps:$4 sm:$0xff]   ;;  %v10848_v34 = vld [vmem:[#allocation11 + $0x280] ss:$16 sps:$4 sm:$0xff]   ;;  %v10851_v44 = vld [vmem:[#allocation11 + $0x288] ss:$16 sps:$4 sm:$0xff]  }
 0x4bc   :  { %v6301_v38 = vrot.slane %v6294_v1, %v12665_v10  ;;  %v6406_v43 = vsel %vm1770_vm2, %v6405_v16, %v6400_v63  ;;  %v6517_v11 = vsel %vm1770_vm2, %v6516_v48, %v6512_v19  ;;  %v6519_v7 = vsel %vm1770_vm2, %v6518_v9, %v6513_v25  ;;  %v10859_v59 = vld [vmem:[#allocation11 + $0x2ac] ss:$16 sps:$4 sm:$0xff]   ;;  %v10854_v6 = vld [vmem:[#allocation11 + $0x2a0] ss:$16 sps:$4 sm:$0xff]   ;;  %v10862_v0 = vld [vmem:[#allocation11 + $0x2c4] ss:$16 sps:$4 sm:$0xff]  }
 0x4bd   :  { %9456 = vst.sshfl [vmem:[#allocation2] sm:$0x5 pattern:$0x73625140] %v6188_v26  ;;  %v6407_v42 = vpack.c.b16 %v6406_v43, %v6404_v36  ;;  %v6520_v27 = vpack.c.b16 %v6519_v7, %v6517_v11  ;;  %v10865_v30 = vld [vmem:[#allocation11 + $0x2cc] ss:$16 sps:$4 sm:$0xff]  }
 0x4be   :  { %9459 = vst.sshfl [vmem:[#allocation2 + $0x2] sm:$0x5 pattern:$0x73625140] %v6301_v38  ;;  %v10860_v54 = vld [vmem:[#allocation11 + $0x2c0] ss:$16 sps:$4 sm:$0xff]  }
 0x4bf   :  { %v6414_v32 = vrot.slane %v6407_v42, %v12665_v10  ;;  %v6527_v60 = vrot.slane %v6520_v27, %v12665_v10  ;;  %v10863_v55 = vld [vmem:[#allocation11 + $0x2c8] ss:$16 sps:$4 sm:$0xff]   ;;  %v10868_v1 = vld [vmem:[#allocation11 + $0x2e4] ss:$16 sps:$4 sm:$0xff]   ;;  %v10871_v23 = vld [vmem:[#allocation11 + $0x2ec] ss:$16 sps:$4 sm:$0xff]  }
 0x4c0   :  { %v10866_v61 = vld [vmem:[#allocation11 + $0x2e0] ss:$16 sps:$4 sm:$0xff]   ;;  %v10869_v28 = vld [vmem:[#allocation11 + $0x2e8] ss:$16 sps:$4 sm:$0xff]   ;;  %v10874_v63 = vld [vmem:[#allocation11 + $0x304] ss:$16 sps:$4 sm:$0xff]  }
 0x4c1   :  { %9462 = vst.sshfl [vmem:[#allocation2 + $0x4] sm:$0x5 pattern:$0x73625140] %v6414_v32  ;;  %v10877_v26 = vld [vmem:[#allocation11 + $0x30c] ss:$16 sps:$4 sm:$0xff]  }
 0x4c2   :  { %9465 = vst.sshfl [vmem:[#allocation2 + $0x6] sm:$0x5 pattern:$0x73625140] %v6527_v60  ;;  %v10872_v51 = vld [vmem:[#allocation11 + $0x300] ss:$16 sps:$4 sm:$0xff]  }
 0x4c3   :  { %v10875_v38 = vld [vmem:[#allocation11 + $0x308] ss:$16 sps:$4 sm:$0xff]   ;;  %v10880_v16 = vld [vmem:[#allocation11 + $0x324] ss:$16 sps:$4 sm:$0xff]   ;;  %v10883_v50 = vld [vmem:[#allocation11 + $0x32c] ss:$16 sps:$4 sm:$0xff]  }
 0x4c4   :  { %v10878_v31 = vld [vmem:[#allocation11 + $0x320] ss:$16 sps:$4 sm:$0xff]   ;;  %v10881_v19 = vld [vmem:[#allocation11 + $0x328] ss:$16 sps:$4 sm:$0xff]   ;;  %v10886_v36 = vld [vmem:[#allocation11 + $0x344] ss:$16 sps:$4 sm:$0xff]  }
 0x4c5   :  { %v10889_v25 = vld [vmem:[#allocation11 + $0x34c] ss:$16 sps:$4 sm:$0xff]   ;;  %v10884_v43 = vld [vmem:[#allocation11 + $0x340] ss:$16 sps:$4 sm:$0xff]   ;;  %v10887_v48 = vld [vmem:[#allocation11 + $0x348] ss:$16 sps:$4 sm:$0xff]  }
 0x4c6   :  { %v10892_v9 = vld [vmem:[#allocation11 + $0x364] ss:$16 sps:$4 sm:$0xff]   ;;  %v10895_v42 = vld [vmem:[#allocation11 + $0x36c] ss:$16 sps:$4 sm:$0xff]   ;;  %v10890_v11 = vld [vmem:[#allocation11 + $0x360] ss:$16 sps:$4 sm:$0xff]  }
 0x4c7   :  { %v10893_v7 = vld [vmem:[#allocation11 + $0x368] ss:$16 sps:$4 sm:$0xff]   ;;  %v10898_v32 = vld [vmem:[#allocation11 + $0x384] ss:$16 sps:$4 sm:$0xff]   ;;  %v10901_v27 = vld [vmem:[#allocation11 + $0x38c] ss:$16 sps:$4 sm:$0xff]  }
 0x4c8   :  { %v10896_v60 = vld [vmem:[#allocation11 + $0x380] ss:$16 sps:$4 sm:$0xff]  }
 0x4c9   :  { %v6537_v40 = vld [vmem:[#allocation2] sm:$0xff] }
 0x4ca   :  { %v6824_v56 = vrot.slane %v6537_v40, %v12665_v10  ;;  %v6817_v62 = vcombine.high %v6537_v40, %v6537_v40  ;;  %v10899_v40 = vld [vmem:[#allocation11 + $0x388] ss:$16 sps:$4 sm:$0xff]  }
 0x4cc   :  { %v6832_v52 = vcombine.high %v6824_v56, %v6824_v56  ;;  %v6831_v3 = vrot.slane %v6817_v62, %v12665_v10  ;;  %v12739_v17 = vrot.slane %v6824_v56, %v12665_v10  ;;  %v10904_v56 = vld [vmem:[#allocation11 + $0x3a4] ss:$16 sps:$4 sm:$0xff]   ;;  %v10907_v62 = vld [vmem:[#allocation11 + $0x3ac] ss:$16 sps:$4 sm:$0xff]  }
 0x4ce   :  { %v6854_v41 = vrot.slane %v6832_v52, %v12665_v10  ;;  %v6833_v21 = vcombine.high %v6831_v3, %v6831_v3  ;;  %v12736_v4 = vrot.slane %v6831_v3, %v12665_v10  ;;  %v10902_v52 = vld [vmem:[#allocation11 + $0x3a0] ss:$16 sps:$4 sm:$0xff]   ;;  %v10905_v3 = vld [vmem:[#allocation11 + $0x3a8] ss:$16 sps:$4 sm:$0xff]  }
 0x4d0   :  { %8186 = vmatprep.mubr.bf16.mxu1 %v6854_v41  ;;  %8350 = vmatprep.mubr.bf16.mxu0 %v6854_v41  ;;  %v6864_v57 = vcombine.high %v6854_v41, %v6854_v41  ;;  %v12742_v33 = vrot.slane %v6833_v21, %v12665_v10  ;;  %v10844_v10 = vld [vmem:[#allocation11 + $0x264] ss:$16 sps:$4 sm:$0xff]   ;;  %v10911_v21 = vld [vmem:[#allocation11 + $0x3c8] ss:$16 sps:$4 sm:$0xff]  }
 0x4d1   :  { %8187 = vmatmul.mubr.bf16.vlgmr.msra.gmra.mrb[16].mxu1 %v12739_v17  ;;  %8351 = vmatmul.mubr.bf16.vlgmr.msra.gmra.mrb[28].mxu0 %v12739_v17  ;;  %v10910_v41 = vld [vmem:[#allocation11 + $0x3c4] ss:$16 sps:$4 sm:$0xff]  }
 0x4d2   :  { %8196 = vmatpush1.bf16.msra.mxu1 %v10824_v5  ;;  %8360 = vmatpush1.bf16.msra.mxu0 %v10827_v39  ;;  %v10913_v5 = vld [vmem:[#allocation11 + $0x3cc] ss:$16 sps:$4 sm:$0xff]   ;;  %v10908_v39 = vld [vmem:[#allocation11 + $0x3c0] ss:$16 sps:$4 sm:$0xff]  }
 0x4d3   :  { %8227 = vmatprep.mubr.bf16.mxu1 %v6864_v57  ;;  %8391 = vmatprep.mubr.bf16.mxu0 %v6864_v57  ;;  %v10916_v57 = vld [vmem:[#allocation11 + $0x3e4] ss:$16 sps:$4 sm:$0xff]  }
 0x4d4   :  { %8197 = vmatprep.subr.bf16.mxu1 %v10832_v12  ;;  %8361 = vmatprep.subr.bf16.mxu0 %v10835_v18  ;;  %v10919_v12 = vld [vmem:[#allocation11 + $0x3ec] ss:$16 sps:$4 sm:$0xff]   ;;  %v10914_v18 = vld [vmem:[#allocation11 + $0x3e0] ss:$16 sps:$4 sm:$0xff]  }
 0x4d6   :  { %8198 = vmatpush1.bf16.msra.mxu1 %v10830_v53  ;;  %8362 = vmatpush1.bf16.msra.mxu0 %v10833_v45  ;;  %v10917_v53 = vld [vmem:[#allocation11 + $0x3e8] ss:$16 sps:$4 sm:$0xff]   ;;  %v10922_v45 = vld [vmem:[#allocation11 + $0x404] ss:$16 sps:$4 sm:$0xff]  }
 0x4d7   :  { %8199 = vmatprep.subr.bf16.mxu1 %v10838_v2  ;;  %8363 = vmatprep.subr.bf16.mxu0 %v10841_v22  ;;  %v10925_v2 = vld [vmem:[#allocation11 + $0x40c] ss:$16 sps:$4 sm:$0xff]   ;;  %v10920_v22 = vld [vmem:[#allocation11 + $0x400] ss:$16 sps:$4 sm:$0xff]  }
 0x4da   :  { %8200 = vmatpush1.bf16.msra.mxu1 %v10836_v47  ;;  %8364 = vmatpush1.bf16.msra.mxu0 %v10839_v20  ;;  %v6862_v47 = vcombine.high %v12739_v17, %v12739_v17  ;;  %v10923_v20 = vld [vmem:[#allocation11 + $0x408] ss:$16 sps:$4 sm:$0xff]   ;;  %v10933_v17 = vld [vmem:[#allocation11 + $0x440] ss:$16 sps:$4 sm:$0xff]  }
 0x4db   :  { %8201 = vmatprep.subr.bf16.mxu1 %v10844_v10  ;;  %8365 = vmatprep.subr.bf16.mxu0 %v10847_v14  ;;  %v10929_v10 = vld [vmem:[#allocation11 + $0x424] ss:$16 sps:$4 sm:$0xff]   ;;  %v10932_v14 = vld [vmem:[#allocation11 + $0x42c] ss:$16 sps:$4 sm:$0xff]  }
 0x4de   :  { %8202 = vmatpush1.bf16.msra.mxu1 %v10842_v29  ;;  %8366 = vmatpush1.bf16.msra.mxu0 %v10845_v13  ;;  %v10927_v29 = vld [vmem:[#allocation11 + $0x420] ss:$16 sps:$4 sm:$0xff]   ;;  %v10930_v13 = vld [vmem:[#allocation11 + $0x428] ss:$16 sps:$4 sm:$0xff]  }
 0x4df   :  { %8203 = vmatprep.subr.bf16.mxu1 %v10850_v8  ;;  %8367 = vmatprep.subr.bf16.mxu0 %v10853_v35  ;;  %v10935_v8 = vld [vmem:[#allocation11 + $0x444] ss:$16 sps:$4 sm:$0xff]   ;;  %v10938_v35 = vld [vmem:[#allocation11 + $0x44c] ss:$16 sps:$4 sm:$0xff]  }
 0x4e2   :  { %8204 = vmatpush1.bf16.msra.mxu1 %v10848_v34  ;;  %8368 = vmatpush1.bf16.msra.mxu0 %v10851_v44  ;;  %v10936_v34 = vld [vmem:[#allocation11 + $0x448] ss:$16 sps:$4 sm:$0xff]   ;;  %v10941_v44 = vld [vmem:[#allocation11 + $0x464] ss:$16 sps:$4 sm:$0xff]  }
 0x4e3   :  { %8205 = vmatprep.subr.bf16.mxu1 %v10856_v37  ;;  %8369 = vmatprep.subr.bf16.mxu0 %v10859_v59  ;;  %v10944_v37 = vld [vmem:[#allocation11 + $0x46c] ss:$16 sps:$4 sm:$0xff]   ;;  %v10939_v59 = vld [vmem:[#allocation11 + $0x460] ss:$16 sps:$4 sm:$0xff]  }
 0x4e6   :  { %8206 = vmatpush1.bf16.msra.mxu1 %v10854_v6  ;;  %8370 = vmatpush1.bf16.msra.mxu0 %v10857_v24  ;;  %v10942_v6 = vld [vmem:[#allocation11 + $0x468] ss:$16 sps:$4 sm:$0xff]   ;;  %v10947_v24 = vld [vmem:[#allocation11 + $0x484] ss:$16 sps:$4 sm:$0xff]  }
 0x4e7   :  { %8207 = vmatprep.subr.bf16.mxu1 %v10862_v0  ;;  %8371 = vmatprep.subr.bf16.mxu0 %v10865_v30  ;;  %v10950_v0 = vld [vmem:[#allocation11 + $0x48c] ss:$16 sps:$4 sm:$0xff]   ;;  %v10945_v30 = vld [vmem:[#allocation11 + $0x480] ss:$16 sps:$4 sm:$0xff]  }
 0x4ea   :  { %8208 = vmatpush1.bf16.msra.mxu1 %v10860_v54  ;;  %8372 = vmatpush1.bf16.msra.mxu0 %v10863_v55  ;;  %v10948_v54 = vld [vmem:[#allocation11 + $0x488] ss:$16 sps:$4 sm:$0xff]   ;;  %v10953_v55 = vld [vmem:[#allocation11 + $0x4a4] ss:$16 sps:$4 sm:$0xff]  }
 0x4eb   :  { %8209 = vmatprep.subr.bf16.mxu1 %v10868_v1  ;;  %8373 = vmatprep.subr.bf16.mxu0 %v10871_v23  ;;  %v10956_v1 = vld [vmem:[#allocation11 + $0x4ac] ss:$16 sps:$4 sm:$0xff]   ;;  %v10951_v23 = vld [vmem:[#allocation11 + $0x4a0] ss:$16 sps:$4 sm:$0xff]  }
 0x4ee   :  { %8210 = vmatpush1.bf16.msra.mxu1 %v10866_v61  ;;  %8374 = vmatpush1.bf16.msra.mxu0 %v10869_v28  ;;  %v10954_v61 = vld [vmem:[#allocation11 + $0x4a8] ss:$16 sps:$4 sm:$0xff]   ;;  %v10959_v28 = vld [vmem:[#allocation11 + $0x4c4] ss:$16 sps:$4 sm:$0xff]  }
 0x4ef   :  { %8211 = vmatprep.subr.bf16.mxu1 %v10874_v63  ;;  %8375 = vmatprep.subr.bf16.mxu0 %v10877_v26  ;;  %v10962_v63 = vld [vmem:[#allocation11 + $0x4cc] ss:$16 sps:$4 sm:$0xff]   ;;  %v10957_v26 = vld [vmem:[#allocation11 + $0x4c0] ss:$16 sps:$4 sm:$0xff]  }
 0x4f2   :  { %8212 = vmatpush1.bf16.msra.mxu1 %v10872_v51  ;;  %8376 = vmatpush1.bf16.msra.mxu0 %v10875_v38  ;;  %v10960_v51 = vld [vmem:[#allocation11 + $0x4c8] ss:$16 sps:$4 sm:$0xff]   ;;  %v10965_v38 = vld [vmem:[#allocation11 + $0x4e4] ss:$16 sps:$4 sm:$0xff]  }
 0x4f3   :  { %8213 = vmatprep.subr.bf16.mxu1 %v10880_v16  ;;  %8377 = vmatprep.subr.bf16.mxu0 %v10883_v50  ;;  %v10968_v16 = vld [vmem:[#allocation11 + $0x4ec] ss:$16 sps:$4 sm:$0xff]   ;;  %v10963_v50 = vld [vmem:[#allocation11 + $0x4e0] ss:$16 sps:$4 sm:$0xff]  }
 0x4f6   :  { %8214 = vmatpush1.bf16.msra.mxu1 %v10878_v31  ;;  %8378 = vmatpush1.bf16.msra.mxu0 %v10881_v19  ;;  %v10966_v31 = vld [vmem:[#allocation11 + $0x4e8] ss:$16 sps:$4 sm:$0xff]   ;;  %v10971_v19 = vld [vmem:[#allocation11 + $0x504] ss:$16 sps:$4 sm:$0xff]  }
 0x4f7   :  { %8215 = vmatprep.subr.bf16.mxu1 %v10886_v36  ;;  %8379 = vmatprep.subr.bf16.mxu0 %v10889_v25  ;;  %v10974_v36 = vld [vmem:[#allocation11 + $0x50c] ss:$16 sps:$4 sm:$0xff]   ;;  %v10969_v25 = vld [vmem:[#allocation11 + $0x500] ss:$16 sps:$4 sm:$0xff]  }
 0x4fa   :  { %8216 = vmatpush1.bf16.msra.mxu1 %v10884_v43  ;;  %8380 = vmatpush1.bf16.msra.mxu0 %v10887_v48  ;;  %v10972_v43 = vld [vmem:[#allocation11 + $0x508] ss:$16 sps:$4 sm:$0xff]   ;;  %v10977_v48 = vld [vmem:[#allocation11 + $0x524] ss:$16 sps:$4 sm:$0xff]  }
 0x4fb   :  { %8217 = vmatprep.subr.bf16.mxu1 %v10892_v9  ;;  %8381 = vmatprep.subr.bf16.mxu0 %v10895_v42  ;;  %v10980_v9 = vld [vmem:[#allocation11 + $0x52c] ss:$16 sps:$4 sm:$0xff]   ;;  %v10975_v42 = vld [vmem:[#allocation11 + $0x520] ss:$16 sps:$4 sm:$0xff]  }
 0x4fe   :  { %8218 = vmatpush1.bf16.msra.mxu1 %v10890_v11  ;;  %8382 = vmatpush1.bf16.msra.mxu0 %v10893_v7  ;;  %v10978_v11 = vld [vmem:[#allocation11 + $0x528] ss:$16 sps:$4 sm:$0xff]   ;;  %v10983_v7 = vld [vmem:[#allocation11 + $0x544] ss:$16 sps:$4 sm:$0xff]  }
 0x4ff   :  { %8219 = vmatprep.subr.bf16.mxu1 %v10898_v32  ;;  %8383 = vmatprep.subr.bf16.mxu0 %v10901_v27  ;;  %v10986_v32 = vld [vmem:[#allocation11 + $0x54c] ss:$16 sps:$4 sm:$0xff]   ;;  %v10981_v27 = vld [vmem:[#allocation11 + $0x540] ss:$16 sps:$4 sm:$0xff]  }
 0x502   :  { %8220 = vmatpush1.bf16.msra.mxu1 %v10896_v60  ;;  %8384 = vmatpush1.bf16.msra.mxu0 %v10899_v40  ;;  %v10984_v60 = vld [vmem:[#allocation11 + $0x548] ss:$16 sps:$4 sm:$0xff]   ;;  %v10989_v40 = vld [vmem:[#allocation11 + $0x564] ss:$16 sps:$4 sm:$0xff]  }
 0x503   :  { %8221 = vmatprep.subr.bf16.mxu1 %v10904_v56  ;;  %8385 = vmatprep.subr.bf16.mxu0 %v10907_v62  ;;  %v10992_v56 = vld [vmem:[#allocation11 + $0x56c] ss:$16 sps:$4 sm:$0xff]   ;;  %v10987_v62 = vld [vmem:[#allocation11 + $0x560] ss:$16 sps:$4 sm:$0xff]  }
 0x506   :  { %8222 = vmatpush1.bf16.msra.mxu1 %v10902_v52  ;;  %8386 = vmatpush1.bf16.msra.mxu0 %v10905_v3  ;;  %v10990_v52 = vld [vmem:[#allocation11 + $0x568] ss:$16 sps:$4 sm:$0xff]   ;;  %v10995_v3 = vld [vmem:[#allocation11 + $0x584] ss:$16 sps:$4 sm:$0xff]  }
 0x507   :  { %8223 = vmatprep.subr.bf16.mxu1 %v10910_v41  ;;  %8387 = vmatprep.subr.bf16.mxu0 %v10913_v5  ;;  %v10998_v41 = vld [vmem:[#allocation11 + $0x58c] ss:$16 sps:$4 sm:$0xff]   ;;  %v10993_v5 = vld [vmem:[#allocation11 + $0x580] ss:$16 sps:$4 sm:$0xff]  }
 0x50a   :  { %8224 = vmatpush1.bf16.msra.mxu1 %v10908_v39  ;;  %8388 = vmatpush1.bf16.msra.mxu0 %v10911_v21  ;;  %v10996_v39 = vld [vmem:[#allocation11 + $0x588] ss:$16 sps:$4 sm:$0xff]   ;;  %v11001_v21 = vld [vmem:[#allocation11 + $0x5a4] ss:$16 sps:$4 sm:$0xff]  }
 0x50b   :  { %8225 = vmatprep.subr.bf16.mxu1 %v10916_v57  ;;  %8389 = vmatprep.subr.bf16.mxu0 %v10919_v12  ;;  %v11004_v57 = vld [vmem:[#allocation11 + $0x5ac] ss:$16 sps:$4 sm:$0xff]   ;;  %v10999_v12 = vld [vmem:[#allocation11 + $0x5a0] ss:$16 sps:$4 sm:$0xff]  }
 0x50e   :  { %8226 = vmatpush1.bf16.msra.mxu1 %v10914_v18  ;;  %8390 = vmatpush1.bf16.msra.mxu0 %v10917_v53  ;;  %v11002_v18 = vld [vmem:[#allocation11 + $0x5a8] ss:$16 sps:$4 sm:$0xff]   ;;  %v11007_v53 = vld [vmem:[#allocation11 + $0x5c4] ss:$16 sps:$4 sm:$0xff]  }
 0x50f   :  { %8236 = vmatprep.subr.bf16.mxu1 %v10922_v45  ;;  %8400 = vmatprep.subr.bf16.mxu0 %v10925_v2  ;;  %v11010_v45 = vld [vmem:[#allocation11 + $0x5cc] ss:$16 sps:$4 sm:$0xff]   ;;  %v11005_v2 = vld [vmem:[#allocation11 + $0x5c0] ss:$16 sps:$4 sm:$0xff]  }
 0x511   :  { %8228 = vmatmul.mubr.bf16.vlgmr.msra.gmra.mrb[16].mxu1 %v6862_v47  ;;  %8392 = vmatmul.mubr.bf16.vlgmr.msra.gmra.mrb[28].mxu0 %v6862_v47  ;;  %v11013_v47 = vld [vmem:[#allocation11 + $0x5e4] ss:$16 sps:$4 sm:$0xff]  }
 0x512   :  { %8237 = vmatpush1.bf16.msra.mxu1 %v10920_v22  ;;  %8268 = vmatprep.mubr.bf16.mxu1 %v12742_v33  ;;  %v11008_v22 = vld [vmem:[#allocation11 + $0x5c8] ss:$16 sps:$4 sm:$0xff]  }
 0x513   :  { %8401 = vmatpush1.bf16.msra.mxu0 %v10923_v20  ;;  %8432 = vmatprep.mubr.bf16.mxu0 %v12742_v33  ;;  %v11016_v20 = vld [vmem:[#allocation11 + $0x5ec] ss:$16 sps:$4 sm:$0xff]  }
 0x514   :  { %8238 = vmatprep.subr.bf16.mxu1 %v10929_v10  ;;  %8402 = vmatprep.subr.bf16.mxu0 %v10932_v14  ;;  %v11011_v10 = vld [vmem:[#allocation11 + $0x5e0] ss:$16 sps:$4 sm:$0xff]   ;;  %v11014_v14 = vld [vmem:[#allocation11 + $0x5e8] ss:$16 sps:$4 sm:$0xff]  }
 0x516   :  { %8239 = vmatpush1.bf16.msra.mxu1 %v10927_v29  ;;  %v11019_v29 = vld [vmem:[#allocation11 + $0x604] ss:$16 sps:$4 sm:$0xff]  }
 0x517   :  { %8403 = vmatpush1.bf16.msra.mxu0 %v10930_v13  ;;  %8240 = vmatprep.subr.bf16.mxu1 %v10935_v8  ;;  %v11022_v13 = vld [vmem:[#allocation11 + $0x60c] ss:$16 sps:$4 sm:$0xff]   ;;  %v11017_v8 = vld [vmem:[#allocation11 + $0x600] ss:$16 sps:$4 sm:$0xff]  }
 0x518   :  { %8404 = vmatprep.subr.bf16.mxu0 %v10938_v35  ;;  %v11020_v35 = vld [vmem:[#allocation11 + $0x608] ss:$16 sps:$4 sm:$0xff]  }
 0x51a   :  { %8241 = vmatpush1.bf16.msra.mxu1 %v10933_v17  ;;  %v11025_v17 = vld [vmem:[#allocation11 + $0x624] ss:$16 sps:$4 sm:$0xff]  }
 0x51b   :  { %8405 = vmatpush1.bf16.msra.mxu0 %v10936_v34  ;;  %8242 = vmatprep.subr.bf16.mxu1 %v10941_v44  ;;  %v6865_v34 = vcombine.high %v12742_v33, %v12742_v33  ;;  %v11028_v44 = vld [vmem:[#allocation11 + $0x62c] ss:$16 sps:$4 sm:$0xff]  }
 0x51c   :  { %8406 = vmatprep.subr.bf16.mxu0 %v10944_v37  ;;  %v11023_v37 = vld [vmem:[#allocation11 + $0x620] ss:$16 sps:$4 sm:$0xff]   ;;  %v11040_v33 = vld [vmem:[#allocation11 + $0x66c] ss:$16 sps:$4 sm:$0xff]  }
 0x51e   :  { %8243 = vmatpush1.bf16.msra.mxu1 %v10939_v59  ;;  %v11026_v59 = vld [vmem:[#allocation11 + $0x628] ss:$16 sps:$4 sm:$0xff]  }
 0x51f   :  { %8407 = vmatpush1.bf16.msra.mxu0 %v10942_v6  ;;  %8244 = vmatprep.subr.bf16.mxu1 %v10947_v24  ;;  %v11031_v6 = vld [vmem:[#allocation11 + $0x644] ss:$16 sps:$4 sm:$0xff]   ;;  %v11034_v24 = vld [vmem:[#allocation11 + $0x64c] ss:$16 sps:$4 sm:$0xff]  }
 0x520   :  { %8408 = vmatprep.subr.bf16.mxu0 %v10950_v0  ;;  %v11029_v0 = vld [vmem:[#allocation11 + $0x640] ss:$16 sps:$4 sm:$0xff]  }
 0x522   :  { %8245 = vmatpush1.bf16.msra.mxu1 %v10945_v30  ;;  %v11032_v30 = vld [vmem:[#allocation11 + $0x648] ss:$16 sps:$4 sm:$0xff]  }
 0x523   :  { %8409 = vmatpush1.bf16.msra.mxu0 %v10948_v54  ;;  %8246 = vmatprep.subr.bf16.mxu1 %v10953_v55  ;;  %v11037_v54 = vld [vmem:[#allocation11 + $0x664] ss:$16 sps:$4 sm:$0xff]   ;;  %v11035_v55 = vld [vmem:[#allocation11 + $0x660] ss:$16 sps:$4 sm:$0xff]  }
 0x524   :  { %8410 = vmatprep.subr.bf16.mxu0 %v10956_v1  ;;  %v11038_v1 = vld [vmem:[#allocation11 + $0x668] ss:$16 sps:$4 sm:$0xff]  }
 0x526   :  { %8247 = vmatpush1.bf16.msra.mxu1 %v10951_v23  ;;  %v11043_v23 = vld [vmem:[#allocation11 + $0x684] ss:$16 sps:$4 sm:$0xff]  }
 0x527   :  { %8411 = vmatpush1.bf16.msra.mxu0 %v10954_v61  ;;  %8248 = vmatprep.subr.bf16.mxu1 %v10959_v28  ;;  %v11046_v61 = vld [vmem:[#allocation11 + $0x68c] ss:$16 sps:$4 sm:$0xff]   ;;  %v11041_v28 = vld [vmem:[#allocation11 + $0x680] ss:$16 sps:$4 sm:$0xff]  }
 0x528   :  { %8412 = vmatprep.subr.bf16.mxu0 %v10962_v63  ;;  %v11044_v63 = vld [vmem:[#allocation11 + $0x688] ss:$16 sps:$4 sm:$0xff]  }
 0x52a   :  { %8249 = vmatpush1.bf16.msra.mxu1 %v10957_v26  ;;  %v11049_v26 = vld [vmem:[#allocation11 + $0x6a4] ss:$16 sps:$4 sm:$0xff]  }
 0x52b   :  { %8413 = vmatpush1.bf16.msra.mxu0 %v10960_v51  ;;  %8250 = vmatprep.subr.bf16.mxu1 %v10965_v38  ;;  %v11052_v51 = vld [vmem:[#allocation11 + $0x6ac] ss:$16 sps:$4 sm:$0xff]   ;;  %v11047_v38 = vld [vmem:[#allocation11 + $0x6a0] ss:$16 sps:$4 sm:$0xff]  }
 0x52c   :  { %8414 = vmatprep.subr.bf16.mxu0 %v10968_v16  ;;  %v11050_v16 = vld [vmem:[#allocation11 + $0x6a8] ss:$16 sps:$4 sm:$0xff]  }
 0x52e   :  { %8251 = vmatpush1.bf16.msra.mxu1 %v10963_v50  ;;  %v11055_v50 = vld [vmem:[#allocation11 + $0x6c4] ss:$16 sps:$4 sm:$0xff]  }
 0x52f   :  { %8415 = vmatpush1.bf16.msra.mxu0 %v10966_v31  ;;  %8252 = vmatprep.subr.bf16.mxu1 %v10971_v19  ;;  %v11058_v31 = vld [vmem:[#allocation11 + $0x6cc] ss:$16 sps:$4 sm:$0xff]   ;;  %v11053_v19 = vld [vmem:[#allocation11 + $0x6c0] ss:$16 sps:$4 sm:$0xff]  }
 0x530   :  { %8416 = vmatprep.subr.bf16.mxu0 %v10974_v36  ;;  %v11056_v36 = vld [vmem:[#allocation11 + $0x6c8] ss:$16 sps:$4 sm:$0xff]  }
 0x532   :  { %8253 = vmatpush1.bf16.msra.mxu1 %v10969_v25  ;;  %v11061_v25 = vld [vmem:[#allocation11 + $0x6e4] ss:$16 sps:$4 sm:$0xff]  }
 0x533   :  { %8417 = vmatpush1.bf16.msra.mxu0 %v10972_v43  ;;  %8254 = vmatprep.subr.bf16.mxu1 %v10977_v48  ;;  %v11064_v43 = vld [vmem:[#allocation11 + $0x6ec] ss:$16 sps:$4 sm:$0xff]   ;;  %v11059_v48 = vld [vmem:[#allocation11 + $0x6e0] ss:$16 sps:$4 sm:$0xff]  }
 0x534   :  { %8418 = vmatprep.subr.bf16.mxu0 %v10980_v9  ;;  %v11062_v9 = vld [vmem:[#allocation11 + $0x6e8] ss:$16 sps:$4 sm:$0xff]  }
 0x536   :  { %8255 = vmatpush1.bf16.msra.mxu1 %v10975_v42  ;;  %v11067_v42 = vld [vmem:[#allocation11 + $0x704] ss:$16 sps:$4 sm:$0xff]  }
 0x537   :  { %8419 = vmatpush1.bf16.msra.mxu0 %v10978_v11  ;;  %8256 = vmatprep.subr.bf16.mxu1 %v10983_v7  ;;  %v11070_v11 = vld [vmem:[#allocation11 + $0x70c] ss:$16 sps:$4 sm:$0xff]   ;;  %v11065_v7 = vld [vmem:[#allocation11 + $0x700] ss:$16 sps:$4 sm:$0xff]  }
 0x538   :  { %8420 = vmatprep.subr.bf16.mxu0 %v10986_v32  ;;  %v11068_v32 = vld [vmem:[#allocation11 + $0x708] ss:$16 sps:$4 sm:$0xff]  }
 0x53a   :  { %8257 = vmatpush1.bf16.msra.mxu1 %v10981_v27  ;;  %v11073_v27 = vld [vmem:[#allocation11 + $0x724] ss:$16 sps:$4 sm:$0xff]  }
 0x53b   :  { %8421 = vmatpush1.bf16.msra.mxu0 %v10984_v60  ;;  %8258 = vmatprep.subr.bf16.mxu1 %v10989_v40  ;;  %v11076_v60 = vld [vmem:[#allocation11 + $0x72c] ss:$16 sps:$4 sm:$0xff]   ;;  %v11071_v40 = vld [vmem:[#allocation11 + $0x720] ss:$16 sps:$4 sm:$0xff]  }
 0x53c   :  { %8422 = vmatprep.subr.bf16.mxu0 %v10992_v56  ;;  %v11074_v56 = vld [vmem:[#allocation11 + $0x728] ss:$16 sps:$4 sm:$0xff]  }
 0x53e   :  { %8259 = vmatpush1.bf16.msra.mxu1 %v10987_v62  ;;  %v11079_v62 = vld [vmem:[#allocation11 + $0x744] ss:$16 sps:$4 sm:$0xff]  }
 0x53f   :  { %8423 = vmatpush1.bf16.msra.mxu0 %v10990_v52  ;;  %8260 = vmatprep.subr.bf16.mxu1 %v10995_v3  ;;  %v11082_v52 = vld [vmem:[#allocation11 + $0x74c] ss:$16 sps:$4 sm:$0xff]   ;;  %v11077_v3 = vld [vmem:[#allocation11 + $0x740] ss:$16 sps:$4 sm:$0xff]  }
 0x540   :  { %8424 = vmatprep.subr.bf16.mxu0 %v10998_v41  ;;  %v11080_v41 = vld [vmem:[#allocation11 + $0x748] ss:$16 sps:$4 sm:$0xff]  }
 0x542   :  { %8261 = vmatpush1.bf16.msra.mxu1 %v10993_v5  ;;  %v11085_v5 = vld [vmem:[#allocation11 + $0x764] ss:$16 sps:$4 sm:$0xff]  }
 0x543   :  { %8425 = vmatpush1.bf16.msra.mxu0 %v10996_v39  ;;  %8262 = vmatprep.subr.bf16.mxu1 %v11001_v21  ;;  %v11088_v39 = vld [vmem:[#allocation11 + $0x76c] ss:$16 sps:$4 sm:$0xff]   ;;  %v11083_v21 = vld [vmem:[#allocation11 + $0x760] ss:$16 sps:$4 sm:$0xff]  }
 0x544   :  { %8426 = vmatprep.subr.bf16.mxu0 %v11004_v57  ;;  %v11086_v57 = vld [vmem:[#allocation11 + $0x768] ss:$16 sps:$4 sm:$0xff]  }
 0x546   :  { %8263 = vmatpush1.bf16.msra.mxu1 %v10999_v12  ;;  %v11091_v12 = vld [vmem:[#allocation11 + $0x784] ss:$16 sps:$4 sm:$0xff]  }
 0x547   :  { %8427 = vmatpush1.bf16.msra.mxu0 %v11002_v18  ;;  %8264 = vmatprep.subr.bf16.mxu1 %v11007_v53  ;;  %v11094_v18 = vld [vmem:[#allocation11 + $0x78c] ss:$16 sps:$4 sm:$0xff]   ;;  %v11089_v53 = vld [vmem:[#allocation11 + $0x780] ss:$16 sps:$4 sm:$0xff]  }
 0x548   :  { %8428 = vmatprep.subr.bf16.mxu0 %v11010_v45  ;;  %v11092_v45 = vld [vmem:[#allocation11 + $0x788] ss:$16 sps:$4 sm:$0xff]  }
 0x54a   :  { %8265 = vmatpush1.bf16.msra.mxu1 %v11005_v2  ;;  %v11097_v2 = vld [vmem:[#allocation11 + $0x7a4] ss:$16 sps:$4 sm:$0xff]  }
 0x54b   :  { %8429 = vmatpush1.bf16.msra.mxu0 %v11008_v22  ;;  %8266 = vmatprep.subr.bf16.mxu1 %v11013_v47  ;;  %v11100_v22 = vld [vmem:[#allocation11 + $0x7ac] ss:$16 sps:$4 sm:$0xff]   ;;  %v11095_v47 = vld [vmem:[#allocation11 + $0x7a0] ss:$16 sps:$4 sm:$0xff]  }
 0x54c   :  { %8430 = vmatprep.subr.bf16.mxu0 %v11016_v20  ;;  %v11098_v20 = vld [vmem:[#allocation11 + $0x7a8] ss:$16 sps:$4 sm:$0xff]  }
 0x54e   :  { %8267 = vmatpush1.bf16.msra.mxu1 %v11011_v10  ;;  %v11103_v10 = vld [vmem:[#allocation11 + $0x7c4] ss:$16 sps:$4 sm:$0xff]  }
 0x54f   :  { %8431 = vmatpush1.bf16.msra.mxu0 %v11014_v14  ;;  %8277 = vmatprep.subr.bf16.mxu1 %v11019_v29  ;;  %v11106_v14 = vld [vmem:[#allocation11 + $0x7cc] ss:$16 sps:$4 sm:$0xff]   ;;  %v11101_v29 = vld [vmem:[#allocation11 + $0x7c0] ss:$16 sps:$4 sm:$0xff]  }
 0x550   :  { %8441 = vmatprep.subr.bf16.mxu0 %v11022_v13  ;;  %v11104_v13 = vld [vmem:[#allocation11 + $0x7c8] ss:$16 sps:$4 sm:$0xff]  }
 0x551   :  { %8269 = vmatmul.mubr.bf16.vlgmr.msra.gmra.mrb[16].mxu1 %v12736_v4 }
 0x552   :  { %8433 = vmatmul.mubr.bf16.vlgmr.msra.gmra.mrb[28].mxu0 %v12736_v4  ;;  %8278 = vmatpush1.bf16.msra.mxu1 %v11017_v8  ;;  %v11109_v8 = vld [vmem:[#allocation11 + $0x7e4] ss:$16 sps:$4 sm:$0xff]  }
 0x553   :  { %8309 = vmatprep.mubr.bf16.mxu1 %v6865_v34  ;;  %8442 = vmatpush1.bf16.msra.mxu0 %v11020_v35  ;;  %v11112_v35 = vld [vmem:[#allocation11 + $0x7ec] ss:$16 sps:$4 sm:$0xff]  }
 0x554   :  { %8473 = vmatprep.mubr.bf16.mxu0 %v6865_v34  ;;  %8279 = vmatprep.subr.bf16.mxu1 %v11025_v17  ;;  %v11107_v17 = vld [vmem:[#allocation11 + $0x7e0] ss:$16 sps:$4 sm:$0xff]   ;;  %v11110_v34 = vld [vmem:[#allocation11 + $0x7e8] ss:$16 sps:$4 sm:$0xff]  }
 0x555   :  { %8443 = vmatprep.subr.bf16.mxu0 %v11028_v44  ;;  %v11113_v44 = vld [vmem:[#allocation14 + $0x40] sm:$0xff]  }
 0x556   :  { %8280 = vmatpush1.bf16.msra.mxu1 %v11023_v37  ;;  %v11114_v37 = vld [vmem:[#allocation14] sm:$0xff]  }
 0x557   :  { %8444 = vmatpush1.bf16.msra.mxu0 %v11026_v59  ;;  %8281 = vmatprep.subr.bf16.mxu1 %v11031_v6  ;;  %v6863_v59 = vcombine.high %v12736_v4, %v12736_v4  ;;  %v11115_v6 = vld [vmem:[#allocation14 + $0x48] sm:$0xff]  }
 0x558   :  { %8445 = vmatprep.subr.bf16.mxu0 %v11034_v24  ;;  %v11116_v24 = vld [vmem:[#allocation14 + $0x8] sm:$0xff]  }
 0x559   :  { %v11123_v4 = vld [vmem:[#allocation14 + $0x68] sm:$0xff]  }
 0x55a   :  { %8282 = vmatpush1.bf16.msra.mxu1 %v11029_v0  ;;  %v11117_v0 = vld [vmem:[#allocation14 + $0x50] sm:$0xff]  }
 0x55b   :  { %8446 = vmatpush1.bf16.msra.mxu0 %v11032_v30  ;;  %8283 = vmatprep.subr.bf16.mxu1 %v11037_v54  ;;  %v11118_v30 = vld [vmem:[#allocation14 + $0x10] sm:$0xff]   ;;  %v11119_v54 = vld [vmem:[#allocation14 + $0x58] sm:$0xff]  }
 0x55c   :  { %8447 = vmatprep.subr.bf16.mxu0 %v11040_v33  ;;  %v11120_v33 = vld [vmem:[#allocation14 + $0x18] sm:$0xff]  }
 0x55e   :  { %8284 = vmatpush1.bf16.msra.mxu1 %v11035_v55  ;;  %v11121_v55 = vld [vmem:[#allocation14 + $0x60] sm:$0xff]  }
 0x55f   :  { %8448 = vmatpush1.bf16.msra.mxu0 %v11038_v1  ;;  %8285 = vmatprep.subr.bf16.mxu1 %v11043_v23  ;;  %v11122_v1 = vld [vmem:[#allocation14 + $0x20] sm:$0xff]   ;;  %v11124_v23 = vld [vmem:[#allocation14 + $0x28] sm:$0xff]  }
 0x560   :  { %8449 = vmatprep.subr.bf16.mxu0 %v11046_v61  ;;  %v11125_v61 = vld [vmem:[#allocation14 + $0x70] sm:$0xff]  }
 0x562   :  { %8286 = vmatpush1.bf16.msra.mxu1 %v11041_v28  ;;  %v11126_v28 = vld [vmem:[#allocation14 + $0x30] sm:$0xff]  }
 0x563   :  { %8450 = vmatpush1.bf16.msra.mxu0 %v11044_v63  ;;  %8287 = vmatprep.subr.bf16.mxu1 %v11049_v26  ;;  %v11127_v63 = vld [vmem:[#allocation14 + $0x78] sm:$0xff]  }
 0x564   :  { %8451 = vmatprep.subr.bf16.mxu0 %v11052_v51  ;;  %v11128_v26 = vld [vmem:[#allocation14 + $0x38] sm:$0xff]   ;;  %v11129_v51 = vld [vmem:[#allocation14 + $0xc0] sm:$0xff]  }
 0x566   :  { %8288 = vmatpush1.bf16.msra.mxu1 %v11047_v38  ;;  %v6794_v38 = vld [vmem:[#allocation12] sm:$0xf] }
 0x567   :  { %8452 = vmatpush1.bf16.msra.mxu0 %v11050_v16  ;;  %8289 = vmatprep.subr.bf16.mxu1 %v11055_v50  ;;  %v6799_v16 = vrot.slane %v6794_v38, %v12946_v49  ;;  %v6803_v50 = vrot.slane %v6794_v38, %v12977_v15  ;;  %v11130_v49 = vld [vmem:[#allocation14 + $0x80] sm:$0xff]   ;;  %v11131_v15 = vld [vmem:[#allocation14 + $0xc8] sm:$0xff]  }
 0x568   :  { %8453 = vmatprep.subr.bf16.mxu0 %v11058_v31  ;;  %v6811_v31 = vrot.slane %v6794_v38, %v12978_v46  ;;  %v11132_v46 = vld [vmem:[#allocation14 + $0x88] sm:$0xff]  }
 0x56a   :  { %8290 = vmatpush1.bf16.msra.mxu1 %v11053_v19 }
 0x56b   :  { %8454 = vmatpush1.bf16.msra.mxu0 %v11056_v36  ;;  %8291 = vmatprep.subr.bf16.mxu1 %v11061_v25 }
 0x56c   :  { %8455 = vmatprep.subr.bf16.mxu0 %v11064_v43 }
 0x56e   :  { %8292 = vmatpush1.bf16.msra.mxu1 %v11059_v48 }
 0x56f   :  { %8456 = vmatpush1.bf16.msra.mxu0 %v11062_v9  ;;  %8293 = vmatprep.subr.bf16.mxu1 %v11067_v42 }
 0x570   :  { %8457 = vmatprep.subr.bf16.mxu0 %v11070_v11 }
 0x572   :  { %8294 = vmatpush1.bf16.msra.mxu1 %v11065_v7 }
 0x573   :  { %8458 = vmatpush1.bf16.msra.mxu0 %v11068_v32  ;;  %8295 = vmatprep.subr.bf16.mxu1 %v11073_v27 }
 0x574   :  { %8459 = vmatprep.subr.bf16.mxu0 %v11076_v60 }
 0x576   :  { %8296 = vmatpush1.bf16.msra.mxu1 %v11071_v40 }
 0x577   :  { %8460 = vmatpush1.bf16.msra.mxu0 %v11074_v56  ;;  %8297 = vmatprep.subr.bf16.mxu1 %v11079_v62 }
 0x578   :  { %8461 = vmatprep.subr.bf16.mxu0 %v11082_v52 }
 0x57a   :  { %8298 = vmatpush1.bf16.msra.mxu1 %v11077_v3 }
 0x57b   :  { %8462 = vmatpush1.bf16.msra.mxu0 %v11080_v41  ;;  %8299 = vmatprep.subr.bf16.mxu1 %v11085_v5  ;;  %v11133_v41 = vld [vmem:[#allocation14 + $0xd0] sm:$0xff]  }
 0x57c   :  { %8463 = vmatprep.subr.bf16.mxu0 %v11088_v39  ;;  %v11134_v5 = vld [vmem:[#allocation14 + $0x90] sm:$0xff]   ;;  %v11135_v39 = vld [vmem:[#allocation14 + $0xd8] sm:$0xff]  }
 0x57e   :  { %8300 = vmatpush1.bf16.msra.mxu1 %v11083_v21  ;;  %v11136_v21 = vld [vmem:[#allocation14 + $0x98] sm:$0xff]  }
 0x57f   :  { %8464 = vmatpush1.bf16.msra.mxu0 %v11086_v57  ;;  %8301 = vmatprep.subr.bf16.mxu1 %v11091_v12  ;;  %v11137_v57 = vld [vmem:[#allocation14 + $0xe0] sm:$0xff]  }
 0x580   :  { %8465 = vmatprep.subr.bf16.mxu0 %v11094_v18  ;;  %v11138_v12 = vld [vmem:[#allocation14 + $0xa0] sm:$0xff]   ;;  %v11139_v18 = vld [vmem:[#allocation14 + $0xe8] sm:$0xff]  }
 0x582   :  { %8302 = vmatpush1.bf16.msra.mxu1 %v11089_v53  ;;  %v11140_v53 = vld [vmem:[#allocation14 + $0xa8] sm:$0xff]  }
 0x583   :  { %8466 = vmatpush1.bf16.msra.mxu0 %v11092_v45  ;;  %8303 = vmatprep.subr.bf16.mxu1 %v11097_v2  ;;  %v6807_v45 = vrot.slane %v6794_v38, %v12937_v58  ;;  %v11141_v2 = vld [vmem:[#allocation14 + $0xf0] sm:$0xff]   ;;  %v9722_v58 = vld [vmem:[#allocation15] ss:$0 sm:$0xff] }
 0x584   :  { %8467 = vmatprep.subr.bf16.mxu0 %v11100_v22  ;;  %v11142_v22 = vld [vmem:[#allocation14 + $0xb0] sm:$0xff]  }
 0x586   :  { %8304 = vmatpush1.bf16.msra.mxu1 %v11095_v47 }
 0x587   :  { %8468 = vmatpush1.bf16.msra.mxu0 %v11098_v20  ;;  %8305 = vmatprep.subr.bf16.mxu1 %v11103_v10  ;;  %v11143_v20 = vld [vmem:[#allocation14 + $0xf8] sm:$0xff]  }
 0x588   :  { %8469 = vmatprep.subr.bf16.mxu0 %v11106_v14  ;;  %v11144_v10 = vld [vmem:[#allocation14 + $0xb8] sm:$0xff]  }
 0x58a   :  { %8306 = vmatpush1.bf16.msra.mxu1 %v11101_v29 }
 0x58b   :  { %8470 = vmatpush1.bf16.msra.mxu0 %v11104_v13  ;;  %8307 = vmatprep.subr.bf16.mxu1 %v11109_v8 }
 0x58c   :  { %8471 = vmatprep.subr.bf16.mxu0 %v11112_v35 }
 0x58e   :  { %8308 = vmatpush1.bf16.msra.mxu1 %v11107_v17 }
 0x58f   :  { %8472 = vmatpush1.bf16.msra.mxu0 %v11110_v34  ;;  %9755 = vmatprep.subr.bf16.mxu1 %v11113_v44  ;;  %v12981_v44 = vlaneseq }
 0x591   :  { %8310 = vmatmul.mubr.bf16.vlgmr.msra.gmra.mrb[16].mxu1 %v6863_v59 }
 0x592   :  { %8474 = vmatmul.mubr.bf16.vlgmr.msra.gmra.mrb[28].mxu0 %v6863_v59  ;;  %9756 = vmatpush3.bf16.msra.mxu1 %v11114_v37  ;;  %v8834_v37 = vand.u32 127, %v12981_v44 }
 0x593   :  { %9757 = vmatprep.subr.bf16.mxu1 %v11115_v6 }
 0x594   :  { %vm8835_vm9 = vcmp.lt.s32.totalorder %v8834_v37, 10 }
 0x596   :  { %9758 = vmatpush3.bf16.msra.mxu1 %v11116_v24 }
 0x597   :  { %9759 = vmatprep.subr.bf16.mxu1 %v11117_v0 }
 0x59a   :  { %9760 = vmatpush3.bf16.msra.mxu1 %v11118_v30 }
 0x59b   :  { %9761 = vmatprep.subr.bf16.mxu1 %v11119_v54 }
 0x59e   :  { %9762 = vmatpush3.bf16.msra.mxu1 %v11120_v33 }
 0x59f   :  { %9763 = vmatprep.subr.bf16.mxu1 %v11121_v55 }
 0x5a2   :  { %9764 = vmatpush3.bf16.msra.mxu1 %v11122_v1 }
 0x5a3   :  { %9765 = vmatprep.subr.bf16.mxu1 %v11123_v4 }
 0x5a6   :  { %9766 = vmatpush3.bf16.msra.mxu1 %v11124_v23 }
 0x5a7   :  { %9767 = vmatprep.subr.bf16.mxu1 %v11125_v61 }
 0x5aa   :  { %9768 = vmatpush3.bf16.msra.mxu1 %v11126_v28 }
 0x5ab   :  { %9769 = vmatprep.subr.bf16.mxu1 %v11127_v63 }
 0x5ae   :  { %9770 = vmatpush3.bf16.msra.mxu1 %v11128_v26 }
 0x5af   :  { %9777 = vmatprep.subr.bf16.mxu1 %v11129_v51 }
 0x664   :  { %v8311_v19 = vpop.f32.mrb[16].mxu1 }
 0x665   :  { %v9799_v36 = vadd.f32 %v8311_v19, %v6799_v16  ;;  %v8475_v25 = vpop.f32.mrb[28].mxu0  ;;  %v8313_v43 = vpop.f32.mrb[17].mxu1 }
 0x666   :  { %v9800_v48 = vadd.f32 %v8313_v43, %v6803_v50  ;;  %v8477_v9 = vpop.f32.mrb[29].mxu0  ;;  %v8315_v42 = vpop.f32.mrb[18].mxu1  ;;  %v9801_v47 = vadd.f32 %v8475_v25, %v6807_v45 }
 0x667   :  { %v8482_v11 = vmax.f32 %v9799_v36, 0.0  ;;  %v9802_v7 = vadd.f32 %v8477_v9, %v6811_v31  ;;  %v8479_v32 = vpop.f32.mrb[30].mxu0  ;;  %v8316_v27 = vpop.f32.mrb[19].mxu1 }
 0x668   :  { %v8483_v60 = vmax.f32 %v9800_v48, 0.0  ;;  %v8480_v40 = vpop.f32.mrb[31].mxu0  ;;  %v8484_v14 = vmax.f32 %v9801_v47, 0.0 }
 0x669   :  { %v8485_v56 = vmax.f32 %v9802_v7, 0.0  ;;  %v8486_v52 = vpack.c.bf16 %v8482_v11, %v8482_v11 }
 0x66a   :  { %v8487_v62 = vpack.c.bf16 %v8483_v60, %v8483_v60  ;;  %v8488_v29 = vpack.c.bf16 %v8484_v14, %v8484_v14 }
 0x66b   :  { %v8489_v3 = vpack.c.bf16 %v8485_v56, %v8485_v56 }
 0x66c   :  { %8785 = vmatprep.mubr.bf16.mxu1 %v8487_v62 }
 0x66d   :  { %8786 = vmatmul.mubr.bf16.vlgmr.msra.gmra.mrb[20].mxu1 %v8486_v52 }
 0x66e   :  { %9778 = vmatpush3.bf16.msra.mxu1 %v11130_v49  ;;  %8825 = vmatprep.mubr.bf16.mxu1 %v8489_v3 }
 0x66f   :  { %9779 = vmatprep.subr.bf16.mxu1 %v11131_v15 }
 0x672   :  { %9780 = vmatpush3.bf16.msra.mxu1 %v11132_v46 }
 0x673   :  { %9781 = vmatprep.subr.bf16.mxu1 %v11133_v41 }
 0x676   :  { %9782 = vmatpush3.bf16.msra.mxu1 %v11134_v5 }
 0x677   :  { %9783 = vmatprep.subr.bf16.mxu1 %v11135_v39 }
 0x67a   :  { %9784 = vmatpush3.bf16.msra.mxu1 %v11136_v21 }
 0x67b   :  { %9785 = vmatprep.subr.bf16.mxu1 %v11137_v57 }
 0x67e   :  { %9786 = vmatpush3.bf16.msra.mxu1 %v11138_v12 }
 0x67f   :  { %9787 = vmatprep.subr.bf16.mxu1 %v11139_v18 }
 0x682   :  { %9788 = vmatpush3.bf16.msra.mxu1 %v11140_v53 }
 0x683   :  { %9789 = vmatprep.subr.bf16.mxu1 %v11141_v2 }
 0x686   :  { %9790 = vmatpush3.bf16.msra.mxu1 %v11142_v22 }
 0x687   :  { %9791 = vmatprep.subr.bf16.mxu1 %v11143_v20 }
 0x68a   :  { %9792 = vmatpush3.bf16.msra.mxu1 %v11144_v10 }
 0x68d   :  { %8826 = vmatmul.mubr.bf16.vlgmr.msra.gmra.mrb[24].mxu1 %v8488_v29 }
 0x740   :  { %v9771_v13 = vpop.f32.mrb[20].mxu1 }
 0x741   :  { %v9772_v8 = vpop.f32.mrb[21].mxu1 }
 0x742   :  { %v9773_v35 = vadd.f32 %v9772_v8, %v9771_v13  ;;  %v9774_v17 = vpop.f32.mrb[22].mxu1 }
 0x743   :  { %v9775_v34 = vpop.f32.mrb[23].mxu1 }
 0x744   :  { %v8788_v24 = vadd.f32 %v9773_v35, %v9722_v58 }
 0x760   :  { %v9793_v59 = vpop.f32.mrb[24].mxu1 }
 0x761   :  { %v9794_v6 = vpop.f32.mrb[25].mxu1 }
 0x762   :  { %v9795_v0 = vadd.f32 %v9794_v6, %v9793_v59  ;;  %v9796_v30 = vpop.f32.mrb[26].mxu1 }
 0x763   :  { %v9797_v54 = vpop.f32.mrb[27].mxu1 }
 0x764   :  { %v8828_v33 = vadd.f32 %v9795_v0, %v8788_v24 }
 0x766   :  { %v8836_v55 = vsel %vm8835_vm9, %v8828_v33, -1e+30 }
 0x767   :  { %v8838_v1 = vsel %vm8837_vm10, %v8836_v55, -inf }
 0x768   :  { %8839 = vmax.xlane.f32.xlu0 %v8838_v1 }
 0x7f5   :  { %v8840_v4 = vpop.xlane.xlu0 %8839 }
 0x7f6   :  { %v8841_v23 = vsub.f32 %v8836_v55, %v8840_v4 }
 0x7f8   :  { %v8842_v61 = vmul.f32 1.442695, %v8841_v23 }
 0x7fa   :  { %11145 = vpow2.f32 %v8842_v61 }
 0x804   :  { %v11146_v28 = vpop.eup %11145 }
 0x805   :  { %v8844_v63 = vsel %vm8837_vm10, %v11146_v28, 0.0 }
 0x806   :  { %8845 = vadd.xlane.f32.xlu0 %v8844_v63 }
 0x893   :  { %v8846_v26 = vpop.xlane.xlu0 %8845 }
 0x894   :  { %11147 = vlog2.f32 %v8846_v26 }
 0x89e   :  { %v11148_v51 = vpop.eup %11147 }
 0x89f   :  { %v8848_v38 = vmul.f32 0.6931472, %v11148_v51 }
 0x8a1   :  { %v8849_v16 = vsub.f32 %v8841_v23, %v8848_v38 }
 0x8a3   :  { %8850 = vst [vmem:[#allocation17] sm:$0x3] %v8849_v16 }
 0x8a4   :  { %11336 = shalt.err (!%p11333_p12)
}
 0x8a5   :  { %s11337_s24 = scalar_lea.hbm %s12782_s9, 32 }
 0x8a6   :  { %p11338_p13 = scmp.ne.s32.totalorder %s12782_s9, %s11337_s24  ;;  %p11341_p0 = scmp.lt.u32.totalorder %s11337_s24, %s12782_s9 }
 0x8a8   :  { %p11343_p1 = pnand %p11341_p0, %p11338_p13 }
 0x8aa   :  { %11346 = shalt.err (!%p11343_p1)
}
 0x8ab   :  { %8860 = dma.vmem_to_hbm [thread:$0]  %s8858_s5, 32, %s12782_s9, [#allocation5]  }
 0x8ac   :  { %11357 = dma.done.wait [#allocation5], 32  }
 0x8ad   :  { %11358 = vsyncadd [#allocation5], 4294967264 }
 0x8ae   :  { %8864 = vsyncpa [#allocation4], 1 }
 0x8af   :  { %8865 = vsyncpa [#allocation7], 1 }
 0x8b0   :  { %8866 = vsyncpa [#allocation10], 1 }
 0x8b1   :  { %8867 = vsyncpa [#allocation13], 1 }
 0x8b2   :  { %8868 = vsyncpa [#allocation16], 1 }
 0x8b3   :  { %8869 = vsyncpa [#allocation5], 1 }

</bundles_post_ra>
